<compile_context>
chip_gen: v6e
topology: v6e:2x2x1
jax: 0.10.0
libtpu: 0.0.40
codegen_flags: <defaults>
</compile_context>

<pallas_src>
import functools

import jax
import jax.numpy as jnp
from jax import lax
from jax.experimental import pallas as pl
from jax.experimental.pallas import tpu as pltpu


# ----------------------------------------------------------------------------
# Fused kernel: conv1+bn1+relu -> conv4+bn4+relu for NB images per grid step.
# Only full-ref reads/writes; all slicing happens on values (contiguous only).
# ----------------------------------------------------------------------------
def _stem_kernel(x_ref, m10_ref, m11_ref, m12_ref, s1_ref,
                 m20_ref, m21_ref, m22_ref, s2_ref, o_ref,
                 *, NB, H1h, Ho2, L1, L2):
    # x_ref  : (NB, 4, Hp4, Wp*Cin)  bf16   padded input, rows split by parity-of-4
    # m1*    : (Wp*Cin, L1)          bf16   banded conv1 weights (BN1 scale folded)
    # s1_ref : (1, L1)               f32    BN1 shift, tiled over wo1
    # m2*    : (L1, L2)              bf16   banded conv4 weights (BN4 scale folded)
    # s2_ref : (1, L2)               f32    BN4 shift, tiled over wo2
    # o_ref  : (NB, Ho2, L2)         f32    L1 = Wo1*Cmid, L2 = Wo2*Cout
    WpC = x_ref.shape[-1]
    xv = x_ref[...]
    m1 = (m10_ref[...], m11_ref[...], m12_ref[...])
    m2 = (m20_ref[...], m21_ref[...], m22_ref[...])

    # ---- stage 1: y1 rows of parity class ch (ho1 = 2a + ch) need padded-input
    #      rows 4a + 2*ch + kh -> row-plane s = (2ch+kh)%4 at offset (2ch+kh)//4.
    #      3 banded GEMMs per class, contiguous slices only.
    y1 = []
    for ch in (0, 1):
        acc = None
        for kh in range(3):
            s = (2 * ch + kh) % 4
            q0 = (2 * ch + kh) // 4
            x_tap = xv[:, s, q0:q0 + H1h, :].reshape(NB * H1h, WpC)
            part = jnp.dot(x_tap, m1[kh], preferred_element_type=jnp.float32)
            acc = part if acc is None else acc + part
        yc = jnp.maximum(acc + s1_ref[...], 0.0)                  # BN shift + ReLU
        y1.append(yc.astype(jnp.bfloat16).reshape(NB, H1h, L1))   # lane-dense (256)
    y1_even, y1_odd = y1                                          # ho1 even / odd

    # ---- stage 2: padded y1 row 2*ho2+kh is  kh=0 -> odd row ho2-1 (zero at top),
    #      kh=1 -> even row ho2,  kh=2 -> odd row ho2.  Contiguous slices only.
    zrow = jnp.zeros((NB, 1, L1), jnp.bfloat16)
    y_taps = (jnp.concatenate([zrow, y1_odd[:, :Ho2 - 1, :]], axis=1),
              y1_even[:, :Ho2, :],
              y1_odd[:, :Ho2, :])
    acc2 = None
    for kh in range(3):
        part = jnp.dot(y_taps[kh].reshape(NB * Ho2, L1), m2[kh],
                       preferred_element_type=jnp.float32)
        acc2 = part if acc2 is None else acc2 + part
    out = jnp.maximum(acc2 + s2_ref[...], 0.0)                    # BN shift + ReLU
    o_ref[...] = out.reshape(NB, Ho2, L2)                         # lane-dense store


# ----------------------------------------------------------------------------
# BN folding helper
# ----------------------------------------------------------------------------
def _bn_scale_shift(gamma, beta, mean, var, eps=1e-5):
    scale = gamma / jnp.sqrt(var + eps)
    shift = beta - mean * scale
    return scale, shift


# ----------------------------------------------------------------------------
# PanStem0 forward (NCHW in, NCHW out -- matching the PyTorch module)
# ----------------------------------------------------------------------------
@jax.jit
def pan_stem0_forward(x_nchw, params):
    N, Cin, H, W = x_nchw.shape
    assert H % 4 == 0 and W % 4 == 0, "fast path assumes H, W multiples of 4"
    # TODO(synk): generalize the row-parity split to H, W not divisible by 4.

    Ho1, Wo1 = H // 2, W // 2
    Ho2, Wo2 = Ho1 // 2, Wo1 // 2
    H1h = Ho1 // 2

    w1, w2 = params["w1"], params["w2"]                    # HWIO
    Cmid, Cout = w1.shape[-1], w2.shape[-1]
    L1, L2 = Wo1 * Cmid, Wo2 * Cout

    # fold BN scale into the conv weights; kernel epilogues are shift + ReLU only
    s1, sh1 = _bn_scale_shift(params["g1"], params["b1"], params["m1"], params["v1"])
    s2, sh2 = _bn_scale_shift(params["g2"], params["b2"], params["m2"], params["v2"])
    w1f = w1 * s1                                          # (3,3,Cin,Cmid)
    w2f = w2 * s2                                          # (3,3,Cmid,Cout)

    # pad (+1 conv halo, bottom rows up to a multiple of 4) and split padded rows
    # into 4 parity planes: pure permutation, no im2col inflation
    x = jnp.transpose(x_nchw, (0, 2, 3, 1))                # NCHW -> NHWC
    Hp, Wp = H + 2, W + 2
    Hp4 = -(-Hp // 4)
    x_pad = jnp.pad(x, ((0, 0), (1, 1 + (4 * Hp4 - Hp)), (1, 1), (0, 0)))
    WpC = Wp * Cin
    x_p4 = (x_pad.reshape(N, Hp4, 4, WpC)
            .transpose(0, 2, 1, 3)
            .astype(jnp.bfloat16))                         # (N, 4, Hp4, Wp*Cin)

    # banded weights: fold the 3x3/stride-2 W-window structure into one matrix per kh
    kw_idx = jnp.arange(3)
    sel1 = (jnp.arange(Wp)[:, None, None]
            == 2 * jnp.arange(Wo1)[None, None, :] + kw_idx[None, :, None])
    M1 = jnp.einsum("wko,hkic->hwioc", sel1.astype(jnp.float32), w1f)
    M1 = M1.reshape(3, WpC, L1).astype(jnp.bfloat16)       # (3, Wp*Cin, Wo1*Cmid)

    sel2 = (jnp.arange(Wo1)[:, None, None]
            == 2 * jnp.arange(Wo2)[None, None, :] + kw_idx[None, :, None] - 1)
    M2 = jnp.einsum("wko,hkcd->hwcod", sel2.astype(jnp.float32), w2f)
    M2 = M2.reshape(3, L1, L2).astype(jnp.bfloat16)        # (3, Wo1*Cmid, Wo2*Cout)

    s1t = jnp.tile(sh1, Wo1)[None, :].astype(jnp.float32)  # (1, L1)
    s2t = jnp.tile(sh2, Wo2)[None, :].astype(jnp.float32)  # (1, L2)

    # fold batch into the GEMM M dimension; "parallel" grid over batch tiles
    P1 = Ho1 * Wo1
    NB = min(N, max(1, 256 // max(P1, 1)))
    while N % NB:
        NB -= 1

    kernel = functools.partial(_stem_kernel, NB=NB, H1h=H1h, Ho2=Ho2, L1=L1, L2=L2)
    out = pl.pallas_call(
        kernel,
        out_shape=jax.ShapeDtypeStruct((N, Ho2, L2), jnp.float32),
        grid=(N // NB,),
        in_specs=[
            pl.BlockSpec((NB, 4, Hp4, WpC), lambda i: (i, 0, 0, 0)),   # input (per tile)
            pl.BlockSpec((WpC, L1), lambda i: (0, 0)),                 # M1 kh=0 (resident)
            pl.BlockSpec((WpC, L1), lambda i: (0, 0)),                 # M1 kh=1
            pl.BlockSpec((WpC, L1), lambda i: (0, 0)),                 # M1 kh=2
            pl.BlockSpec((1, L1), lambda i: (0, 0)),                   # bn1 shift
            pl.BlockSpec((L1, L2), lambda i: (0, 0)),                  # M2 kh=0
            pl.BlockSpec((L1, L2), lambda i: (0, 0)),                  # M2 kh=1
            pl.BlockSpec((L1, L2), lambda i: (0, 0)),                  # M2 kh=2
            pl.BlockSpec((1, L2), lambda i: (0, 0)),                   # bn4 shift
        ],
        out_specs=pl.BlockSpec((NB, Ho2, L2), lambda i: (i, 0, 0)),
        compiler_params=pltpu.CompilerParams(dimension_semantics=("parallel",)),
    )(x_p4, M1[0], M1[1], M1[2], s1t, M2[0], M2[1], M2[2], s2t)

    y = out.reshape(N, Ho2, Wo2, Cout)                     # lanes were (wo2, cout)
    return jnp.transpose(y, (0, 3, 1, 2))                  # NHWC -> NCHW


# ----------------------------------------------------------------------------
# Pure-JAX reference (for self-check)
# ----------------------------------------------------------------------------
def _reference_forward(x_nchw, params, eps=1e-5):
    x = jnp.transpose(x_nchw, (0, 2, 3, 1))
    dn = ("NHWC", "HWIO", "NHWC")

    def stage(x, w, g, b, m, v):
        y = lax.conv_general_dilated(x, w, window_strides=(2, 2),
                                     padding=((1, 1), (1, 1)),
                                     dimension_numbers=dn)
        y = (y - m) / jnp.sqrt(v + eps) * g + b
        return jnp.maximum(y, 0.0)

    y = stage(x, params["w1"], params["g1"], params["b1"], params["m1"], params["v1"])
    y = stage(y, params["w2"], params["g2"], params["b2"], params["m2"], params["v2"])
    return jnp.transpose(y, (0, 3, 1, 2))


# ----------------------------------------------------------------------------
# Deterministic synthetic parameters (shapes from PanStem0.__init__)
# ----------------------------------------------------------------------------
def make_params(key, in_channels=1, out_channels=64):
    ks = jax.random.split(key, 10)
    f32 = jnp.float32
    return {
        # conv weights stored HWIO: (kh, kw, Cin, Cout)
        "w1": jax.random.normal(ks[0], (3, 3, in_channels, 32), f32) * 0.1,
        "g1": 1.0 + 0.1 * jax.random.normal(ks[1], (32,), f32),
        "b1": 0.1 * jax.random.normal(ks[2], (32,), f32),
        "m1": 0.05 * jax.random.normal(ks[3], (32,), f32),
        "v1": 1.0 + 0.1 * jax.random.uniform(ks[4], (32,), f32),
        "w2": jax.random.normal(ks[5], (3, 3, 32, out_channels), f32) * 0.05,
        "g2": 1.0 + 0.1 * jax.random.normal(ks[6], (out_channels,), f32),
        "b2": 0.1 * jax.random.normal(ks[7], (out_channels,), f32),
        "m2": 0.05 * jax.random.normal(ks[8], (out_channels,), f32),
        "v2": 1.0 + 0.1 * jax.random.uniform(ks[9], (out_channels,), f32),
    }


if __name__ == "__main__":
    key = jax.random.PRNGKey(0)
    kx, kp = jax.random.split(key)

    N, Cin, H, W = 2, 1, 16, 16                            # NCHW, as in PyTorch
    x = jax.random.normal(kx, (N, Cin, H, W), jnp.float32)
    params = make_params(kp, in_channels=Cin, out_channels=64)

    out = jax.block_until_ready(pan_stem0_forward(x, params))
    assert out.shape == (N, 64, H // 4, W // 4), out.shape

    ref = _reference_forward(x, params)
    err = float(jnp.max(jnp.abs(out - ref)))
    assert jnp.allclose(out, ref, rtol=3e-2, atol=3e-2), f"mismatch vs reference: {err}"

    print("KERNEL_OK")
</pallas_src>

<mosaic_0001>
module attributes {stable_mosaic.version = 11 : i64} {
  func.func @_stem_kernel(%arg0: i32, %arg1: memref<2x4x5x18xbf16, #tpu.memory_space<vmem>>, %arg2: memref<18x256xbf16, #tpu.memory_space<vmem>>, %arg3: memref<18x256xbf16, #tpu.memory_space<vmem>>, %arg4: memref<18x256xbf16, #tpu.memory_space<vmem>>, %arg5: memref<1x256xf32, #tpu.memory_space<vmem>>, %arg6: memref<256x256xbf16, #tpu.memory_space<vmem>>, %arg7: memref<256x256xbf16, #tpu.memory_space<vmem>>, %arg8: memref<256x256xbf16, #tpu.memory_space<vmem>>, %arg9: memref<1x256xf32, #tpu.memory_space<vmem>>, %arg10: memref<2x4x256xf32, #tpu.memory_space<vmem>>) attributes {dimension_semantics = [#tpu.dimension_semantics<parallel>], iteration_bounds = array<i64: 1>, scalar_prefetch = 0 : i64, scratch_operands = 0 : i64, tpu.core_type = #tpu.core_type<tc>, window_params = [{transform_indices = @transform_0, window_bounds = array<i64: 2, 4, 5, 18>}, {pipeline_mode = #tpu.pipeline_mode<synchronous>, transform_indices = @transform_1, window_bounds = array<i64: 18, 256>}, {pipeline_mode = #tpu.pipeline_mode<synchronous>, transform_indices = @transform_2, window_bounds = array<i64: 18, 256>}, {pipeline_mode = #tpu.pipeline_mode<synchronous>, transform_indices = @transform_3, window_bounds = array<i64: 18, 256>}, {pipeline_mode = #tpu.pipeline_mode<synchronous>, transform_indices = @transform_4, window_bounds = array<i64: 1, 256>}, {pipeline_mode = #tpu.pipeline_mode<synchronous>, transform_indices = @transform_5, window_bounds = array<i64: 256, 256>}, {pipeline_mode = #tpu.pipeline_mode<synchronous>, transform_indices = @transform_6, window_bounds = array<i64: 256, 256>}, {pipeline_mode = #tpu.pipeline_mode<synchronous>, transform_indices = @transform_7, window_bounds = array<i64: 256, 256>}, {pipeline_mode = #tpu.pipeline_mode<synchronous>, transform_indices = @transform_8, window_bounds = array<i64: 1, 256>}, {transform_indices = @transform_9, window_bounds = array<i64: 2, 4, 256>}]} {
    %c0 = arith.constant 0 : index
    %c0_0 = arith.constant 0 : index
    %c0_1 = arith.constant 0 : index
    %c0_2 = arith.constant 0 : index
    %0 = vector.load %arg1[%c0, %c0_0, %c0_1, %c0_2] : memref<2x4x5x18xbf16, #tpu.memory_space<vmem>>, vector<2x4x5x18xbf16>
    %c0_3 = arith.constant 0 : index
    %c0_4 = arith.constant 0 : index
    %1 = vector.load %arg2[%c0_3, %c0_4] : memref<18x256xbf16, #tpu.memory_space<vmem>>, vector<18x256xbf16>
    %c0_5 = arith.constant 0 : index
    %c0_6 = arith.constant 0 : index
    %2 = vector.load %arg3[%c0_5, %c0_6] : memref<18x256xbf16, #tpu.memory_space<vmem>>, vector<18x256xbf16>
    %c0_7 = arith.constant 0 : index
    %c0_8 = arith.constant 0 : index
    %3 = vector.load %arg4[%c0_7, %c0_8] : memref<18x256xbf16, #tpu.memory_space<vmem>>, vector<18x256xbf16>
    %c0_9 = arith.constant 0 : index
    %c0_10 = arith.constant 0 : index
    %4 = vector.load %arg6[%c0_9, %c0_10] : memref<256x256xbf16, #tpu.memory_space<vmem>>, vector<256x256xbf16>
    %c0_11 = arith.constant 0 : index
    %c0_12 = arith.constant 0 : index
    %5 = vector.load %arg7[%c0_11, %c0_12] : memref<256x256xbf16, #tpu.memory_space<vmem>>, vector<256x256xbf16>
    %c0_13 = arith.constant 0 : index
    %c0_14 = arith.constant 0 : index
    %6 = vector.load %arg8[%c0_13, %c0_14] : memref<256x256xbf16, #tpu.memory_space<vmem>>, vector<256x256xbf16>
    %7 = vector.extract_strided_slice %0 {offsets = [0, 0, 0, 0], sizes = [2, 1, 4, 18], strides = [1, 1, 1, 1]} : vector<2x4x5x18xbf16> to vector<2x1x4x18xbf16>
    %8 = vector.shape_cast %7 : vector<2x1x4x18xbf16> to vector<2x4x18xbf16>
    %9 = vector.shape_cast %8 : vector<2x4x18xbf16> to vector<8x18xbf16>
    %cst = arith.constant dense<0.000000e+00> : vector<8x256xf32>
    %10 = tpu.matmul %9, %1, %cst {dimension_numbers = #tpu.dot_dimension_numbers<[1], [0], [0], [1], [0, 0, 1, 1], [], []>} : vector<8x18xbf16>, vector<18x256xbf16>, vector<8x256xf32> -> vector<8x256xf32>
    %11 = vector.extract_strided_slice %0 {offsets = [0, 1, 0, 0], sizes = [2, 1, 4, 18], strides = [1, 1, 1, 1]} : vector<2x4x5x18xbf16> to vector<2x1x4x18xbf16>
    %12 = vector.shape_cast %11 : vector<2x1x4x18xbf16> to vector<2x4x18xbf16>
    %13 = vector.shape_cast %12 : vector<2x4x18xbf16> to vector<8x18xbf16>
    %cst_15 = arith.constant dense<0.000000e+00> : vector<8x256xf32>
    %14 = tpu.matmul %13, %2, %cst_15 {dimension_numbers = #tpu.dot_dimension_numbers<[1], [0], [0], [1], [0, 0, 1, 1], [], []>} : vector<8x18xbf16>, vector<18x256xbf16>, vector<8x256xf32> -> vector<8x256xf32>
    %15 = arith.addf %10, %14 : vector<8x256xf32>
    %16 = vector.extract_strided_slice %0 {offsets = [0, 2, 0, 0], sizes = [2, 1, 4, 18], strides = [1, 1, 1, 1]} : vector<2x4x5x18xbf16> to vector<2x1x4x18xbf16>
    %17 = vector.shape_cast %16 : vector<2x1x4x18xbf16> to vector<2x4x18xbf16>
    %18 = vector.shape_cast %17 : vector<2x4x18xbf16> to vector<8x18xbf16>
    %cst_16 = arith.constant dense<0.000000e+00> : vector<8x256xf32>
    %19 = tpu.matmul %18, %3, %cst_16 {dimension_numbers = #tpu.dot_dimension_numbers<[1], [0], [0], [1], [0, 0, 1, 1], [], []>} : vector<8x18xbf16>, vector<18x256xbf16>, vector<8x256xf32> -> vector<8x256xf32>
    %20 = arith.addf %15, %19 : vector<8x256xf32>
    %c0_17 = arith.constant 0 : index
    %c0_18 = arith.constant 0 : index
    %21 = vector.load %arg5[%c0_17, %c0_18] : memref<1x256xf32, #tpu.memory_space<vmem>>, vector<1x256xf32>
    %22 = vector.broadcast %21 : vector<1x256xf32> to vector<8x256xf32>
    %23 = arith.addf %20, %22 : vector<8x256xf32>
    %cst_19 = arith.constant 0.000000e+00 : f32
    %24 = vector.broadcast %cst_19 : f32 to vector<8x256xf32>
    %25 = arith.maximumf %23, %24 : vector<8x256xf32>
    %26 = arith.truncf %25 : vector<8x256xf32> to vector<8x256xbf16>
    %27 = vector.shape_cast %26 : vector<8x256xbf16> to vector<2x4x256xbf16>
    %28 = vector.extract_strided_slice %0 {offsets = [0, 2, 0, 0], sizes = [2, 1, 4, 18], strides = [1, 1, 1, 1]} : vector<2x4x5x18xbf16> to vector<2x1x4x18xbf16>
    %29 = vector.shape_cast %28 : vector<2x1x4x18xbf16> to vector<2x4x18xbf16>
    %30 = vector.shape_cast %29 : vector<2x4x18xbf16> to vector<8x18xbf16>
    %cst_20 = arith.constant dense<0.000000e+00> : vector<8x256xf32>
    %31 = tpu.matmul %30, %1, %cst_20 {dimension_numbers = #tpu.dot_dimension_numbers<[1], [0], [0], [1], [0, 0, 1, 1], [], []>} : vector<8x18xbf16>, vector<18x256xbf16>, vector<8x256xf32> -> vector<8x256xf32>
    %32 = vector.extract_strided_slice %0 {offsets = [0, 3, 0, 0], sizes = [2, 1, 4, 18], strides = [1, 1, 1, 1]} : vector<2x4x5x18xbf16> to vector<2x1x4x18xbf16>
    %33 = vector.shape_cast %32 : vector<2x1x4x18xbf16> to vector<2x4x18xbf16>
    %34 = vector.shape_cast %33 : vector<2x4x18xbf16> to vector<8x18xbf16>
    %cst_21 = arith.constant dense<0.000000e+00> : vector<8x256xf32>
    %35 = tpu.matmul %34, %2, %cst_21 {dimension_numbers = #tpu.dot_dimension_numbers<[1], [0], [0], [1], [0, 0, 1, 1], [], []>} : vector<8x18xbf16>, vector<18x256xbf16>, vector<8x256xf32> -> vector<8x256xf32>
    %36 = arith.addf %31, %35 : vector<8x256xf32>
    %37 = vector.extract_strided_slice %0 {offsets = [0, 0, 1, 0], sizes = [2, 1, 4, 18], strides = [1, 1, 1, 1]} : vector<2x4x5x18xbf16> to vector<2x1x4x18xbf16>
    %38 = vector.shape_cast %37 : vector<2x1x4x18xbf16> to vector<2x4x18xbf16>
    %39 = vector.shape_cast %38 : vector<2x4x18xbf16> to vector<8x18xbf16>
    %cst_22 = arith.constant dense<0.000000e+00> : vector<8x256xf32>
    %40 = tpu.matmul %39, %3, %cst_22 {dimension_numbers = #tpu.dot_dimension_numbers<[1], [0], [0], [1], [0, 0, 1, 1], [], []>} : vector<8x18xbf16>, vector<18x256xbf16>, vector<8x256xf32> -> vector<8x256xf32>
    %41 = arith.addf %36, %40 : vector<8x256xf32>
    %c0_23 = arith.constant 0 : index
    %c0_24 = arith.constant 0 : index
    %42 = vector.load %arg5[%c0_23, %c0_24] : memref<1x256xf32, #tpu.memory_space<vmem>>, vector<1x256xf32>
    %43 = vector.broadcast %42 : vector<1x256xf32> to vector<8x256xf32>
    %44 = arith.addf %41, %43 : vector<8x256xf32>
    %cst_25 = arith.constant 0.000000e+00 : f32
    %45 = vector.broadcast %cst_25 : f32 to vector<8x256xf32>
    %46 = arith.maximumf %44, %45 : vector<8x256xf32>
    %47 = arith.truncf %46 : vector<8x256xf32> to vector<8x256xbf16>
    %48 = vector.shape_cast %47 : vector<8x256xbf16> to vector<2x4x256xbf16>
    %cst_26 = arith.constant 0.000000e+00 : bf16
    %49 = vector.broadcast %cst_26 : bf16 to vector<2x1x256xbf16>
    %50 = vector.extract_strided_slice %48 {offsets = [0, 0, 0], sizes = [2, 3, 256], strides = [1, 1, 1]} : vector<2x4x256xbf16> to vector<2x3x256xbf16>
    %51 = tpu.concatenate %49, %50 in 1 : vector<2x1x256xbf16>, vector<2x3x256xbf16> -> vector<2x4x256xbf16>
    %52 = vector.shape_cast %51 : vector<2x4x256xbf16> to vector<8x256xbf16>
    %cst_27 = arith.constant dense<0.000000e+00> : vector<8x256xf32>
    %53 = tpu.matmul %52, %4, %cst_27 {dimension_numbers = #tpu.dot_dimension_numbers<[1], [0], [0], [1], [0, 0, 1, 1], [], []>} : vector<8x256xbf16>, vector<256x256xbf16>, vector<8x256xf32> -> vector<8x256xf32>
    %54 = vector.shape_cast %27 : vector<2x4x256xbf16> to vector<8x256xbf16>
    %cst_28 = arith.constant dense<0.000000e+00> : vector<8x256xf32>
    %55 = tpu.matmul %54, %5, %cst_28 {dimension_numbers = #tpu.dot_dimension_numbers<[1], [0], [0], [1], [0, 0, 1, 1], [], []>} : vector<8x256xbf16>, vector<256x256xbf16>, vector<8x256xf32> -> vector<8x256xf32>
    %56 = arith.addf %53, %55 : vector<8x256xf32>
    %57 = vector.shape_cast %48 : vector<2x4x256xbf16> to vector<8x256xbf16>
    %cst_29 = arith.constant dense<0.000000e+00> : vector<8x256xf32>
    %58 = tpu.matmul %57, %6, %cst_29 {dimension_numbers = #tpu.dot_dimension_numbers<[1], [0], [0], [1], [0, 0, 1, 1], [], []>} : vector<8x256xbf16>, vector<256x256xbf16>, vector<8x256xf32> -> vector<8x256xf32>
    %59 = arith.addf %56, %58 : vector<8x256xf32>
    %c0_30 = arith.constant 0 : index
    %c0_31 = arith.constant 0 : index
    %60 = vector.load %arg9[%c0_30, %c0_31] : memref<1x256xf32, #tpu.memory_space<vmem>>, vector<1x256xf32>
    %61 = vector.broadcast %60 : vector<1x256xf32> to vector<8x256xf32>
    %62 = arith.addf %59, %61 : vector<8x256xf32>
    %cst_32 = arith.constant 0.000000e+00 : f32
    %63 = vector.broadcast %cst_32 : f32 to vector<8x256xf32>
    %64 = arith.maximumf %62, %63 : vector<8x256xf32>
    %65 = vector.shape_cast %64 : vector<8x256xf32> to vector<2x4x256xf32>
    %c0_33 = arith.constant 0 : index
    %c0_34 = arith.constant 0 : index
    %c0_35 = arith.constant 0 : index
    %66 = vector.load %arg10[%c0_33, %c0_34, %c0_35] : memref<2x4x256xf32, #tpu.memory_space<vmem>>, vector<2x4x256xf32>
    tpu.vector_store %arg10[%c0_33, %c0_34, %c0_35], %65 {strides = array<i32>} : memref<2x4x256xf32, #tpu.memory_space<vmem>>, vector<2x4x256xf32>,
    return
  }
  func.func @transform_0(%arg0: i32) -> (i32, i32, i32, i32) {
    %c0_i32 = arith.constant 0 : i32
    %c0_i32_0 = arith.constant 0 : i32
    %c0_i32_1 = arith.constant 0 : i32
    %c0_i32_2 = arith.constant 0 : i32
    return %arg0, %c0_i32, %c0_i32_0, %c0_i32_1 : i32, i32, i32, i32
  }
  func.func @transform_1(%arg0: i32) -> (i32, i32) {
    %c0_i32 = arith.constant 0 : i32
    %c0_i32_0 = arith.constant 0 : i32
    %c0_i32_1 = arith.constant 0 : i32
    return %c0_i32, %c0_i32_0 : i32, i32
  }
  func.func @transform_2(%arg0: i32) -> (i32, i32) {
    %c0_i32 = arith.constant 0 : i32
    %c0_i32_0 = arith.constant 0 : i32
    %c0_i32_1 = arith.constant 0 : i32
    return %c0_i32, %c0_i32_0 : i32, i32
  }
  func.func @transform_3(%arg0: i32) -> (i32, i32) {
    %c0_i32 = arith.constant 0 : i32
    %c0_i32_0 = arith.constant 0 : i32
    %c0_i32_1 = arith.constant 0 : i32
    return %c0_i32, %c0_i32_0 : i32, i32
  }
  func.func @transform_4(%arg0: i32) -> (i32, i32) {
    %c0_i32 = arith.constant 0 : i32
    %c0_i32_0 = arith.constant 0 : i32
    %c0_i32_1 = arith.constant 0 : i32
    return %c0_i32, %c0_i32_0 : i32, i32
  }
  func.func @transform_5(%arg0: i32) -> (i32, i32) {
    %c0_i32 = arith.constant 0 : i32
    %c0_i32_0 = arith.constant 0 : i32
    %c0_i32_1 = arith.constant 0 : i32
    return %c0_i32, %c0_i32_0 : i32, i32
  }
  func.func @transform_6(%arg0: i32) -> (i32, i32) {
    %c0_i32 = arith.constant 0 : i32
    %c0_i32_0 = arith.constant 0 : i32
    %c0_i32_1 = arith.constant 0 : i32
    return %c0_i32, %c0_i32_0 : i32, i32
  }
  func.func @transform_7(%arg0: i32) -> (i32, i32) {
    %c0_i32 = arith.constant 0 : i32
    %c0_i32_0 = arith.constant 0 : i32
    %c0_i32_1 = arith.constant 0 : i32
    return %c0_i32, %c0_i32_0 : i32, i32
  }
  func.func @transform_8(%arg0: i32) -> (i32, i32) {
    %c0_i32 = arith.constant 0 : i32
    %c0_i32_0 = arith.constant 0 : i32
    %c0_i32_1 = arith.constant 0 : i32
    return %c0_i32, %c0_i32_0 : i32, i32
  }
  func.func @transform_9(%arg0: i32) -> (i32, i32, i32) {
    %c0_i32 = arith.constant 0 : i32
    %c0_i32_0 = arith.constant 0 : i32
    %c0_i32_1 = arith.constant 0 : i32
    return %arg0, %c0_i32, %c0_i32_0 : i32, i32, i32
  }
}

</mosaic_0001>

<bundles_post_ra>
// kernel: squeeze.6
= control target key start
LH: loop header
LB: loop body
LE: loop exit
PB: predicated region body
PF: predicated region fallthrough
CT: control target
= control target key end

     0   :  { %s744_s24 = smov 3  ;;  %s746_s25 = smov 192  ;;  %vm343_vm0 = vcmask 1047556   ;;  %vm373_vm1 = vcmask 1044482   ;;  %vm377_vm2 = vcmask 1047557   ;;  %vm354_vm3 = vcmask 1045506   ;;  %s834_s0 = inlined_call_operand.vmem [shape: bf16[1,18,1,8,32], index: 0, kind: input, shape index: {}]   ;;  %s835_s1 = inlined_call_operand.vmem [shape: bf16[18,256], index: 1, kind: output, shape index: {}]  }
   0x1   :  { %v677_v0 = vld [vmem:[%s834_s0 + $0x38] sm:$0xff]   ;;  %v678_v1 = vld [vmem:[%s834_s0 + $0x30] sm:$0xff]   ;;  %v679_v2 = vld [vmem:[%s834_s0 + $0x28] sm:$0xff]   ;;  %s748_s26 = smov 3  ;;  %s750_s27 = smov 192  ;;  %vm359_vm4 = vcmask 1047558  }
   0x2   :  { %v631_v3 = vunpack.c.l.bf16 %v677_v0  ;;  %v632_v4 = vunpack.c.h.bf16 %v677_v0  ;;  %v635_v5 = vunpack.c.l.bf16 %v678_v1  ;;  %v636_v6 = vunpack.c.h.bf16 %v678_v1  ;;  %v680_v7 = vld [vmem:[%s834_s0 + $0x20] sm:$0xff]   ;;  %v681_v8 = vld [vmem:[%s834_s0 + $0x18] sm:$0xff]   ;;  %v682_v9 = vld [vmem:[%s834_s0 + $0x10] sm:$0xff]   ;;  %s704_s28 = smov 96   ;;  %s705_s29 = smov 64  }
   0x3   :  { %v639_v10 = vunpack.c.l.bf16 %v679_v2  ;;  %v640_v11 = vunpack.c.h.bf16 %v679_v2  ;;  %v643_v12 = vunpack.c.l.bf16 %v680_v7  ;;  %v644_v13 = vunpack.c.h.bf16 %v680_v7  ;;  %v683_v14 = vld [vmem:[%s834_s0 + $0x8] sm:$0xff]   ;;  %v658_v15 = vld [vmem:[%s834_s0] sm:$0xff]   ;;  %s480_s30 = smov 3  ;;  %s434_s2 = smov 3 }
   0x4   :  { %v676_v16 = vld [vmem:[%s834_s0 + $0x40] sm:$0xff]   ;;  %53 = vst [vmem:[#allocation1 + $0x78] sm:$0xff] %v632_v4  ;;  %69 = vst [vmem:[#allocation1 + $0x70] sm:$0xff] %v631_v3  ;;  %v647_v17 = vunpack.c.l.bf16 %v681_v8  ;;  %v648_v18 = vunpack.c.h.bf16 %v681_v8  ;;  %v651_v19 = vunpack.c.l.bf16 %v682_v9  ;;  %v652_v20 = vunpack.c.h.bf16 %v682_v9  ;;  %s369_s0 = smov 3  ;;  %s487_s3 = smov 192 }
   0x5   :  { %85 = vst [vmem:[#allocation1 + $0x68] sm:$0xff] %v636_v6  ;;  %101 = vst [vmem:[#allocation1 + $0x60] sm:$0xff] %v635_v5  ;;  %v655_v21 = vunpack.c.l.bf16 %v683_v14  ;;  %v656_v22 = vunpack.c.h.bf16 %v683_v14  ;;  %v659_v23 = vunpack.c.l.bf16 %v658_v15  ;;  %v660_v24 = vunpack.c.h.bf16 %v658_v15  ;;  %s499_s4 = smov 3  ;;  %s706_s5 = smov 32  }
   0x6   :  { %117 = vst [vmem:[#allocation1 + $0x58] sm:$0xff] %v640_v11  ;;  %133 = vst [vmem:[#allocation1 + $0x50] sm:$0xff] %v639_v10  ;;  %v627_v25 = vunpack.c.l.bf16 %v676_v16  ;;  %v628_v26 = vunpack.c.h.bf16 %v676_v16  ;;  %vm291_vm5 = vcmask 261120   ;;  %vm347_vm6 = vcmask 1048320  }
   0x7   :  { %149 = vst [vmem:[#allocation1 + $0x48] sm:$0xff] %v644_v13  ;;  %165 = vst [vmem:[#allocation1 + $0x40] sm:$0xff] %v643_v12  ;;  %vm412_vm7 = vcmask 785920   ;;  %vm477_vm8 = vcmask 523520  }
   0x8   :  { %181 = vst [vmem:[#allocation1 + $0x38] sm:$0xff] %v648_v18  ;;  %197 = vst [vmem:[#allocation1 + $0x30] sm:$0xff] %v647_v17 }
   0x9   :  { %213 = vst [vmem:[#allocation1 + $0x28] sm:$0xff] %v652_v20  ;;  %229 = vst [vmem:[#allocation1 + $0x20] sm:$0xff] %v651_v19 }
   0xa   :  { %245 = vst [vmem:[#allocation1 + $0x18] sm:$0xff] %v656_v22  ;;  %261 = vst [vmem:[#allocation1 + $0x10] sm:$0xff] %v655_v21 }
   0xb   :  { %276 = vst [vmem:[#allocation1 + $0x8] sm:$0xff] %v660_v24  ;;  %289 = vst [vmem:[#allocation1] sm:$0xff] %v659_v23 }
   0xc   :  { %21 = vst [vmem:[#allocation1 + $0x88] sm:$0xff] %v628_v26  ;;  %37 = vst [vmem:[#allocation1 + $0x80] sm:$0xff] %v627_v25  ;;  %v398_v27 = vld [vmem:[#allocation1 + $0x67] ss:$8 sm:$0xf]  }
   0xd   :  { %v387_v28 = vld [vmem:[#allocation1 + $0x63] ss:$8 sm:$0xf]   ;;  %399 = vrot.lane.b32.xlu1 %v398_v27, %s704_s28  ;;  %v463_v30 = vld [vmem:[#allocation1 + $0x66] ss:$8 sm:$0xf]  }
   0xe   :  { %v389_v29 = vld [vmem:[#allocation1 + $0x27] ss:$8 sm:$0xf0]   ;;  %v452_v38 = vld [vmem:[#allocation1 + $0x62] ss:$8 sm:$0xf]  }
   0xf   :  { %v391_v32 = vsel %vm343_vm0, %v389_v29, %v387_v28  ;;  %v454_v39 = vld [vmem:[#allocation1 + $0x26] ss:$8 sm:$0xf0]   ;;  %v372_v43 = vld.sshfl [vmem:[#allocation1 + $0x37] sm:$0xff pattern:$0xcccc8000]  }
  0x10   :  { %v342_v31 = vld [vmem:[#allocation1 + $0x3] ss:$8 sm:$0xf0]   ;;  %v407_v33 = vld [vmem:[#allocation1 + $0x2] ss:$8 sm:$0xf0]   ;;  %v456_v41 = vsel %vm343_vm0, %v454_v39, %v452_v38 }
  0x11   :  { %464 = vrot.lane.b32.xlu1 %v463_v30, %s705_s29  ;;  %v376_v45 = vld [vmem:[#allocation1 + $0x23] ss:$8 sm:$0xe0]   ;;  %v437_v59 = vld.sshfl [vmem:[#allocation1 + $0x36] sm:$0xff pattern:$0xcccc8000]  }
  0x12   :  { %v340_v34 = vld [vmem:[#allocation1 + $0x3] ss:$8 sm:$0xf]   ;;  %v405_v35 = vld [vmem:[#allocation1 + $0x2] ss:$8 sm:$0xf]  }
  0x13   :  { %v344_v36 = vsel %vm343_vm0, %v342_v31, %v340_v34  ;;  %v409_v37 = vsel %vm343_vm0, %v407_v33, %v405_v35  ;;  %v370_v42 = vld [vmem:[#allocation1 + $0x87] ss:$8 sm:%s369_s0]   ;;  %v351_v46 = vld [vmem:[#allocation1 + $0x83] ss:$8 sm:%s744_s24]   ;;  %v416_v50 = vld [vmem:[#allocation1 + $0x82] ss:$8 sm:%s748_s26]  }
  0x14   :  { %v689_v40 = vpack.i.bf16 %v391_v32, %v344_v36  ;;  %v374_v44 = vsel %vm373_vm1, %v372_v43, %v370_v42  ;;  %v694_v47 = vpack.i.bf16 %v456_v41, %v409_v37  ;;  %v353_v49 = vld [vmem:[#allocation1 - $0x9] ss:$8 sm:$0x3c]   ;;  %v418_v51 = vld [vmem:[#allocation1 - $0xa] ss:$8 sm:$0x3c]  }
  0x15   :  { %v378_v48 = vsel %vm377_vm2, %v376_v45, %v374_v44  ;;  %v355_v52 = vsel %vm354_vm3, %v353_v49, %v351_v46  ;;  %v358_v53 = vld [vmem:[#allocation1 - $0x9] ss:$8 sm:%s746_s25]   ;;  %v420_v54 = vsel %vm354_vm3, %v418_v51, %v416_v50  ;;  %v423_v55 = vld [vmem:[#allocation1 - $0xa] ss:$8 sm:%s750_s27]   ;;  %v481_v56 = vld [vmem:[#allocation1 + $0x81] ss:$8 sm:%s480_s30]  }
  0x16   :  { %690 = vrot.lane.b32.xlu0 %v689_v40, %s704_s28  ;;  %379 = vrot.lane.b32.xlu1 %v378_v48, %s704_s28  ;;  %v425_v57 = vsel %vm359_vm4, %v423_v55, %v420_v54  ;;  %v435_v58 = vld [vmem:[#allocation1 + $0x86] ss:$8 sm:%s434_s2]   ;;  %v441_v60 = vld [vmem:[#allocation1 + $0x22] ss:$8 sm:$0xe0]   ;;  %v360_v63 = vsel %vm359_vm4, %v358_v53, %v355_v52 }
  0x17   :  { %v483_v61 = vld [vmem:[#allocation1 - $0xb] ss:$8 sm:$0x3c]   ;;  %v470_v1 = vld [vmem:[#allocation1 + $0x1] ss:$8 sm:$0xf]   ;;  %v439_v3 = vsel %vm373_vm1, %v437_v59, %v435_v58 }
  0x18   :  { %v488_v62 = vld [vmem:[#allocation1 - $0xb] ss:$8 sm:%s487_s3]   ;;  %v485_v0 = vsel %vm354_vm3, %v483_v61, %v481_v56  ;;  %v472_v2 = vld [vmem:[#allocation1 + $0x1] ss:$8 sm:$0xf0]   ;;  %v443_v7 = vsel %vm377_vm2, %v441_v60, %v439_v3 }
  0x19   :  { %v517_v4 = vld [vmem:[#allocation1 + $0x61] ss:$8 sm:$0xf]   ;;  %v519_v5 = vld [vmem:[#allocation1 + $0x25] ss:$8 sm:$0xf0]   ;;  %v490_v6 = vsel %vm359_vm4, %v488_v62, %v485_v0  ;;  %v474_v8 = vsel %vm343_vm0, %v472_v2, %v470_v1 }
  0x1a   :  { %695 = vrot.lane.b32.xlu0 %v694_v47, %s705_s29  ;;  %426 = vrot.lane.b32.xlu1 %v425_v57, %s705_s29  ;;  %v521_v9 = vsel %vm343_vm0, %v519_v5, %v517_v4  ;;  %v528_v10 = vld [vmem:[#allocation1 + $0x65] ss:$8 sm:$0xf]   ;;  %v322_v11 = vld [vmem:[#allocation1 + $0x60] ss:$4 sm:$0xff]  }
  0x1b   :  { %v290_v12 = vld [vmem:[#allocation1] ss:$4 sm:$0xff]   ;;  %325 = vst.msk [vmem:[#allocation0 + $0x14] ss:$8 sm:$0x3] %vm291_vm5, %v322_v11   ;;  %v699_v18 = vpack.i.bf16 %v521_v9, %v474_v8 }
  0x1c   :  { %v300_v13 = vld [vmem:[#allocation1 + $0x20] ss:$4 sm:$0xff]   ;;  %327 = vst.msk [vmem:[#allocation0 + $0x5] ss:$8 sm:$0xc] %vm291_vm5, %v322_v11  }
  0x1d   :  { %329 = vst.msk [vmem:[#allocation0 - $0xa] ss:$8 sm:$0x30] %vm291_vm5, %v322_v11   ;;  %331 = vst.msk [vmem:[#allocation0 - $0x19] ss:$8 sm:$0xc0] %vm291_vm5, %v322_v11  }
  0x1e   :  { %361 = vrot.lane.b32.xlu0 %v360_v63, %s704_s28  ;;  %491 = vrot.lane.b32.xlu1 %v490_v6, %s706_s5  ;;  %292 = vst.msk [vmem:[#allocation0] ss:$8 sm:$0x3] %vm291_vm5, %v290_v12   ;;  %294 = vst.msk [vmem:[#allocation0 - $0xf] ss:$8 sm:$0xc] %vm291_vm5, %v290_v12  }
  0x1f   :  { %296 = vst.msk [vmem:[#allocation0 - $0x1e] ss:$8 sm:$0x30] %vm291_vm5, %v290_v12   ;;  %298 = vst.msk [vmem:[#allocation0 - $0x2d] ss:$8 sm:$0xc0] %vm291_vm5, %v290_v12  }
  0x20   :  { %303 = vst.msk [vmem:[#allocation0 + $0x4] ss:$8 sm:$0x3] %vm291_vm5, %v300_v13   ;;  %305 = vst.msk [vmem:[#allocation0 - $0xb] ss:$8 sm:$0xc] %vm291_vm5, %v300_v13  }
  0x21   :  { %307 = vst.msk [vmem:[#allocation0 - $0x1a] ss:$8 sm:$0x30] %vm291_vm5, %v300_v13   ;;  %309 = vst.msk [vmem:[#allocation0 - $0x29] ss:$8 sm:$0xc0] %vm291_vm5, %v300_v13  }
  0x22   :  { %v311_v14 = vld [vmem:[#allocation1 + $0x40] ss:$4 sm:$0xff]   ;;  %v500_v16 = vld [vmem:[#allocation1 + $0x85] ss:$8 sm:%s499_s4]   ;;  %444 = vrot.lane.b32.xlu0 %v443_v7, %s705_s29  ;;  %529 = vrot.lane.b32.xlu1 %v528_v10, %s706_s5 }
  0x23   :  { %v333_v15 = vld [vmem:[#allocation1 + $0x80] ss:$4 sm:$0xf]   ;;  %v502_v17 = vld.sshfl [vmem:[#allocation1 + $0x35] sm:$0xff pattern:$0xcccc8000]  }
  0x24   :  { %314 = vst.msk [vmem:[#allocation0 + $0x10] ss:$8 sm:$0x3] %vm291_vm5, %v311_v14   ;;  %316 = vst.msk [vmem:[#allocation0 + $0x1] ss:$8 sm:$0xc] %vm291_vm5, %v311_v14   ;;  %v504_v19 = vsel %vm373_vm1, %v502_v17, %v500_v16 }
  0x25   :  { %318 = vst.msk [vmem:[#allocation0 - $0xe] ss:$8 sm:$0x30] %vm291_vm5, %v311_v14   ;;  %320 = vst.msk [vmem:[#allocation0 - $0x1d] ss:$8 sm:$0xc0] %vm291_vm5, %v311_v14  }
  0x26   :  { %336 = vst.msk [vmem:[#allocation0 + $0x20] ss:$8 sm:$0x3] %vm291_vm5, %v333_v15   ;;  %338 = vst.msk [vmem:[#allocation0 + $0x11] ss:$8 sm:$0xc] %vm291_vm5, %v333_v15   ;;  %700 = vrot.lane.b32.xlu0 %v699_v18, %s706_s5 }
  0x27   :  { %v506_v20 = vld [vmem:[#allocation1 + $0x21] ss:$8 sm:$0xe0]  }
  0x28   :  { %v508_v21 = vsel %vm377_vm2, %v506_v20, %v504_v19 }
  0x2a   :  { %509 = vrot.lane.b32.xlu0 %v508_v21, %s706_s5 }
  0x7f   :  { %v400_v22 = vpop.permute.xlu1 %399  }
  0x80   :  { %403 = vst.msk [vmem:[#allocation0 + $0x1c] sm:$0xf] %vm347_vm6, %v400_v22  }
  0x83   :  { %v465_v23 = vpop.permute.xlu1 %464  }
  0x84   :  { %468 = vst.msk [vmem:[#allocation0 + $0x1c] sm:$0xf] %vm412_vm7, %v465_v23  }
  0x88   :  { %v691_v24 = vpop.permute.xlu0 %690  ;;  %v380_v27 = vpop.permute.xlu1 %379  }
  0x89   :  { %v693_v25 = vunpack.i.h.bf16 %v691_v24  ;;  %v692_v26 = vunpack.i.l.bf16 %v691_v24  ;;  %383 = vst.msk [vmem:[#allocation0 + $0x28] sm:$0x3] %vm347_vm6, %v380_v27   ;;  %385 = vst.msk [vmem:[#allocation0 + $0xc] sm:$0xfc] %vm347_vm6, %v380_v27  }
  0x8b   :  { %348 = vst.msk [vmem:[#allocation0] sm:$0xff] %vm347_vm6, %v692_v26   ;;  %396 = vst.msk [vmem:[#allocation0 + $0x14] sm:$0xff] %vm347_vm6, %v693_v25  }
  0x8c   :  { %v696_v28 = vpop.permute.xlu0 %695  ;;  %v427_v31 = vpop.permute.xlu1 %426  }
  0x8d   :  { %v698_v29 = vunpack.i.h.bf16 %v696_v28  ;;  %v697_v30 = vunpack.i.l.bf16 %v696_v28 }
  0x8f   :  { %413 = vst.msk [vmem:[#allocation0] sm:$0xff] %vm412_vm7, %v697_v30   ;;  %461 = vst.msk [vmem:[#allocation0 + $0x14] sm:$0xff] %vm412_vm7, %v698_v29  }
  0x90   :  { %v362_v32 = vpop.permute.xlu0 %361   ;;  %v492_v33 = vpop.permute.xlu1 %491  }
  0x91   :  { %365 = vst.msk [vmem:[#allocation0 + $0x20] sm:$0x3] %vm347_vm6, %v362_v32   ;;  %367 = vst.msk [vmem:[#allocation0 + $0x6] sm:$0xfc] %vm347_vm6, %v362_v32  }
  0x92   :  { %430 = vst.msk [vmem:[#allocation0 + $0x20] sm:$0x3] %vm412_vm7, %v427_v31   ;;  %432 = vst.msk [vmem:[#allocation0 + $0x6] sm:$0xfc] %vm412_vm7, %v427_v31  }
  0x93   :  { %495 = vst.msk [vmem:[#allocation0 + $0x20] sm:$0x3] %vm477_vm8, %v492_v33   ;;  %497 = vst.msk [vmem:[#allocation0 + $0x6] sm:$0xfc] %vm477_vm8, %v492_v33  }
  0x94   :  { %v445_v34 = vpop.permute.xlu0 %444   ;;  %v530_v35 = vpop.permute.xlu1 %529  }
  0x95   :  { %448 = vst.msk [vmem:[#allocation0 + $0x28] sm:$0x3] %vm412_vm7, %v445_v34   ;;  %450 = vst.msk [vmem:[#allocation0 + $0xc] sm:$0xfc] %vm412_vm7, %v445_v34  }
  0x96   :  { %533 = vst.msk [vmem:[#allocation0 + $0x1c] sm:$0xf] %vm477_vm8, %v530_v35  }
  0x98   :  { %v701_v36 = vpop.permute.xlu0 %700 }
  0x99   :  { %v703_v37 = vunpack.i.h.bf16 %v701_v36  ;;  %v702_v38 = vunpack.i.l.bf16 %v701_v36 }
  0x9a   :  { %v568_v40 = vld [vmem:[#allocation0 + $0x20] sm:$0xff] }
  0x9b   :  { %526 = vst.msk [vmem:[#allocation0 + $0x14] sm:$0xff] %vm477_vm8, %v703_v37   ;;  %478 = vst.msk [vmem:[#allocation0] sm:$0xff] %vm477_vm8, %v702_v38  }
  0x9c   :  { %v510_v39 = vpop.permute.xlu0 %509  }
  0x9d   :  { %513 = vst.msk [vmem:[#allocation0 + $0x28] sm:$0x3] %vm477_vm8, %v510_v39   ;;  %515 = vst.msk [vmem:[#allocation0 + $0xc] sm:$0xfc] %vm477_vm8, %v510_v39  }
  0xa2   :  { %v539_v41 = vld [vmem:[#allocation0] sm:$0xff]  ;;  %v560_v42 = vld [vmem:[#allocation0 + $0x18] sm:$0xff] }
  0xa4   :  { %v552_v43 = vld [vmem:[#allocation0 + $0x10] sm:$0xff]  ;;  %v576_v44 = vld [vmem:[#allocation0 + $0x28] sm:$0xff] }
  0xa5   :  { %v545_v45 = vld [vmem:[#allocation0 + $0x8] sm:$0xff]  ;;  %v669_v46 = vpack.c.bf16 %v560_v42, %v552_v43  ;;  %v674_v48 = vpack.c.bf16 %v576_v44, %v568_v40 }
  0xa6   :  { %v664_v47 = vpack.c.bf16 %v545_v45, %v539_v41 }
  0xa7   :  { %684 = vst [vmem:[%s835_s1 + $0x8] sm:$0xff] %v669_v46   ;;  %685 = vst [vmem:[%s835_s1 + $0x10] sm:$0xff] %v674_v48  }
  0xa8   :  { %665 = vst [vmem:[%s835_s1] sm:$0xff] %v664_v47  }

// kernel: tile.13
= control target key start
LH: loop header
LB: loop body
LE: loop exit
PB: predicated region body
PF: predicated region fallthrough
CT: control target
= control target key end

     0   :  { %s22_s0 = inlined_call_operand.vmem [shape: f32[32], index: 0, kind: input, shape index: {}]   ;;  %s23_s1 = inlined_call_operand.vmem [shape: f32[8,32], index: 1, kind: output, shape index: {}]  }
   0x1   :  { %v4_v0 = vld [vmem:[%s22_s0] ss:$0 sm:$0xff] }
   0x2   :  { %5 = vst [vmem:[%s23_s1] sm:$0xff] %v4_v0 }

// kernel: tile.14
= control target key start
LH: loop header
LB: loop body
LE: loop exit
PB: predicated region body
PF: predicated region fallthrough
CT: control target
= control target key end

     0   :  { %s7_s6 = smov 3  ;;  %s14_s9 = smov 3  ;;  %vm4_vm0 = vcmask 261120   ;;  %vm11_vm1 = vcmask 1048320   ;;  %vm18_vm2 = vcmask 785920   ;;  %vm25_vm3 = vcmask 523520   ;;  %s79_s0 = inlined_call_operand.vmem [shape: f32[8,32], index: 0, kind: input, shape index: {}]   ;;  %s80_s1 = inlined_call_operand.vmem [shape: f32[1,256], index: 1, kind: output, shape index: {}]  }
   0x1   :  { %v41_v0 = vld [vmem:[%s79_s0 + $0x3] ss:$4 sm:%s7_s6]   ;;  %s48_s10 = smov 96   ;;  %s21_s11 = smov 3  ;;  %v42_v1 = vld [vmem:[%s79_s0 + $0x2] ss:$4 sm:%s14_s9]  }
   0x2   :  { %9 = vrot.lane.b32.xlu0 %v41_v0, %s48_s10  ;;  %v43_v2 = vld [vmem:[%s79_s0 + $0x1] ss:$4 sm:%s21_s11]   ;;  %s2_s16 = smov 3  ;;  %s49_s17 = smov 32  }
   0x3   :  { %23 = vrot.lane.b32.xlu1 %v43_v2, %s49_s17  ;;  %v3_v3 = vld [vmem:[%s79_s0] ss:$4 sm:%s2_s16]   ;;  %s50_s0 = smov 64  }
   0x4   :  { %5 = vst.msk [vmem:[#allocation0] ss:$8 sm:$0x3] %vm4_vm0, %v3_v3  }
   0x6   :  { %16 = vrot.lane.b32.xlu0 %v42_v1, %s50_s0 }
  0x74   :  { %v10_v4 = vpop.permute.xlu0 %9  }
  0x75   :  { %12 = vst.msk [vmem:[#allocation0] ss:$8 sm:$0x3] %vm11_vm1, %v10_v4   ;;  %v24_v5 = vpop.permute.xlu1 %23  }
  0x78   :  { %v17_v6 = vpop.permute.xlu0 %16  }
  0x79   :  { %19 = vst.msk [vmem:[#allocation0] ss:$8 sm:$0x3] %vm18_vm2, %v17_v6  }
  0x7a   :  { %26 = vst.msk [vmem:[#allocation0] ss:$8 sm:$0x3] %vm25_vm3, %v24_v5  }
  0x81   :  { %v31_v7 = vld [vmem:[#allocation0] sm:$0x1]  ;;  %v36_v8 = vld [vmem:[#allocation0 + $0x8] sm:$0x1] }
  0x82   :  { %34 = vst [vmem:[%s80_s1] sm:$0x1] %v31_v7  ;;  %44 = vst [vmem:[%s80_s1 + $0x1] sm:$0x1] %v36_v8 }

// kernel: squeeze.9
= control target key start
LH: loop header
LB: loop body
LE: loop exit
PB: predicated region body
PF: predicated region fallthrough
CT: control target
= control target key end

     0   :  { %s7854_s12 = smov 3  ;;  %vm4100_vm0 = vcmask 523264   ;;  %s7862_s17 = smov 3  ;;  %vm5636_vm1 = vcmask 1047556   ;;  %vm5640_vm2 = vcmask 1048064   ;;  %s8790_s0 = inlined_call_operand.vmem [shape: bf16[1,8,32,4,64], index: 0, kind: input, shape index: {}]   ;;  %s8791_s1 = inlined_call_operand.vmem [shape: bf16[256,256], index: 1, kind: output, shape index: {}]  }
   0x1   :  { %v7396_v0 = vld [vmem:[%s8790_s0 + $0x2a] sm:$0xff]   ;;  %v7399_v1 = vld [vmem:[%s8790_s0 + $0x22] sm:$0xff]   ;;  %v7403_v2 = vld [vmem:[%s8790_s0 + $0x1e] sm:$0xf]   ;;  %s7864_s18 = smov 3  ;;  %s7869_s21 = smov 3 }
   0x2   :  { %v3730_v3 = vunpack.c.h.bf16 %v7396_v0  ;;  %v3746_v4 = vunpack.c.l.bf16 %v7396_v0  ;;  %v3778_v5 = vunpack.c.h.bf16 %v7399_v1  ;;  %v7411_v6 = vld [vmem:[%s8790_s0 + $0xa] sm:$0xff]   ;;  %v7415_v7 = vld [vmem:[%s8790_s0 + $0x2] sm:$0xff]   ;;  %v3810_v8 = vunpack.c.l.bf16 %v7399_v1  ;;  %v4094_v10 = vld [vmem:[%s8790_s0] sm:$0x3]  ;;  %s7871_s22 = smov 3  ;;  %s7873_s23 = smov 3 }
   0x3   :  { %v3842_v9 = vunpack.c.l.bf16 %v7403_v2  ;;  %v3970_v11 = vunpack.c.h.bf16 %v7411_v6  ;;  %v4002_v12 = vunpack.c.l.bf16 %v7411_v6  ;;  %s7875_s24 = smov 3  ;;  %v7332_v13 = vld [vmem:[%s8790_s0 + $0xaa] sm:$0xff]   ;;  %v7335_v14 = vld [vmem:[%s8790_s0 + $0xa2] sm:$0xff]   ;;  %v4034_v15 = vunpack.c.h.bf16 %v7415_v7  ;;  %s7883_s29 = smov 3  ;;  %v7339_v17 = vld [vmem:[%s8790_s0 + $0x9e] sm:$0xf]  }
   0x4   :  { %3733 = vst [vmem:[#allocation1 + $0xb8] ss:$8 sps:$4 sm:$0xff] %v3730_v3   ;;  %3749 = vst [vmem:[#allocation1 + $0xa8] ss:$8 sps:$4 sm:$0xff] %v3746_v4   ;;  %v4066_v16 = vunpack.c.l.bf16 %v7415_v7  ;;  %s7885_s30 = smov 3  ;;  %v4095_v18 = vunpack.c.l.bf16 %v4094_v10  ;;  %s7890_s4 = smov 3  ;;  %v2706_v20 = vunpack.c.h.bf16 %v7332_v13  ;;  %v2722_v21 = vunpack.c.l.bf16 %v7332_v13 }
   0x5   :  { %3781 = vst [vmem:[#allocation1 + $0x98] ss:$8 sps:$4 sm:$0xff] %v3778_v5   ;;  %3813 = vst [vmem:[#allocation1 + $0x88] ss:$8 sps:$4 sm:$0xff] %v3810_v8   ;;  %s7892_s5 = smov 3  ;;  %v7347_v19 = vld [vmem:[%s8790_s0 + $0x8a] sm:$0xff]   ;;  %v2754_v22 = vunpack.c.h.bf16 %v7335_v14  ;;  %v2786_v24 = vunpack.c.l.bf16 %v7335_v14  ;;  %v2818_v25 = vunpack.c.l.bf16 %v7339_v17 }
   0x6   :  { %3845 = vst [vmem:[#allocation1 + $0x78] ss:$8 sps:$4 sm:$0xff] %v3842_v9   ;;  %3973 = vst [vmem:[#allocation1 + $0x38] ss:$8 sps:$4 sm:$0xff] %v3970_v11   ;;  %s7897_s8 = smov 3  ;;  %s4211_s9 = smov 3  ;;  %v2946_v27 = vunpack.c.h.bf16 %v7347_v19  ;;  %v2978_v28 = vunpack.c.l.bf16 %v7347_v19 }
   0x7   :  { %4005 = vst [vmem:[#allocation1 + $0x28] ss:$8 sps:$4 sm:$0xff] %v4002_v12   ;;  %4037 = vst [vmem:[#allocation1 + $0x18] ss:$8 sps:$4 sm:$0xff] %v4034_v15   ;;  %v7351_v23 = vld [vmem:[%s8790_s0 + $0x82] sm:$0xff]   ;;  %s4217_s13 = smov 3 }
   0x8   :  { %4069 = vst [vmem:[#allocation1 + $0x8] ss:$8 sps:$4 sm:$0xff] %v4066_v16   ;;  %4097 = vst [vmem:[#allocation1] sm:$0xf] %v4095_v18  ;;  %s4223_s14 = smov 3  ;;  %s7905_s19 = smov 3  ;;  %v3010_v30 = vunpack.c.h.bf16 %v7351_v23  ;;  %v3042_v31 = vunpack.c.l.bf16 %v7351_v23 }
   0x9   :  { %v7355_v26 = vld [vmem:[%s8790_s0 + $0x7e] sm:$0xf]   ;;  %s7907_s20 = smov 3  ;;  %2709 = vst [vmem:[#allocation1 + $0x2b8] ss:$8 sps:$4 sm:$0xff] %v2706_v20   ;;  %v7364_v29 = vld [vmem:[%s8790_s0 + $0x68] sm:$0xff]  }
   0xa   :  { %2725 = vst [vmem:[#allocation1 + $0x2a8] ss:$8 sps:$4 sm:$0xff] %v2722_v21   ;;  %2757 = vst [vmem:[#allocation1 + $0x298] ss:$8 sps:$4 sm:$0xff] %v2754_v22   ;;  %s7912_s27 = smov 3  ;;  %v7368_v32 = vld [vmem:[%s8790_s0 + $0x60] sm:$0xff]   ;;  %v3074_v38 = vunpack.c.l.bf16 %v7355_v26  ;;  %v3218_v44 = vunpack.c.h.bf16 %v7364_v29  ;;  %v3250_v45 = vunpack.c.l.bf16 %v7364_v29 }
   0xb   :  { %2789 = vst [vmem:[#allocation1 + $0x288] ss:$8 sps:$4 sm:$0xff] %v2786_v24   ;;  %2821 = vst [vmem:[#allocation1 + $0x278] ss:$8 sps:$4 sm:$0xff] %v2818_v25   ;;  %v7379_v33 = vld [vmem:[%s8790_s0 + $0x4a] sm:$0xff]   ;;  %v7923_v34 = vld [vmem:[%s8790_s0 + $0x42] sm:$0xff]   ;;  %v3282_v50 = vunpack.c.h.bf16 %v7368_v32  ;;  %v3314_v51 = vunpack.c.l.bf16 %v7368_v32 }
   0xc   :  { %v4212_v35 = vld [vmem:[#allocation1 + $0x98] ss:$2 sm:%s4211_s9]   ;;  %v4224_v37 = vld [vmem:[#allocation1 + $0xa8] ss:$2 sm:%s4223_s14]   ;;  %2949 = vst [vmem:[#allocation1 + $0x238] ss:$8 sps:$4 sm:$0xff] %v2946_v27   ;;  %v3458_v55 = vunpack.c.h.bf16 %v7379_v33  ;;  %v3490_v56 = vunpack.c.l.bf16 %v7379_v33  ;;  %v3522_v61 = vunpack.c.h.bf16 %v7923_v34  ;;  %v3554_v62 = vunpack.c.l.bf16 %v7923_v34 }
   0xd   :  { %v4218_v36 = vld [vmem:[#allocation1 + $0xa0] ss:$2 sm:%s4217_s13]   ;;  %2981 = vst [vmem:[#allocation1 + $0x228] ss:$8 sps:$4 sm:$0xff] %v2978_v28   ;;  %3013 = vst [vmem:[#allocation1 + $0x218] ss:$8 sps:$4 sm:$0xff] %v3010_v30  }
   0xe   :  { %v7928_v39 = vld [vmem:[%s8790_s0 + $0x3e] sm:$0xf]   ;;  %v7933_v40 = vld [vmem:[%s8790_s0 + $0xe8] sm:$0xff]   ;;  %4215 = vst.msk [vmem:[#allocation0 + $0x23] ss:$8 sm:$0x3] %vm4100_vm0, %v4212_v35  }
   0xf   :  { %v4188_v41 = vld [vmem:[#allocation1 + $0x78] ss:$2 sm:%s7885_s30]   ;;  %v4200_v43 = vld [vmem:[#allocation1 + $0x88] ss:$2 sm:%s7892_s5]   ;;  %3045 = vst [vmem:[#allocation1 + $0x208] ss:$8 sps:$4 sm:$0xff] %v3042_v31   ;;  %v3586_v2 = vunpack.c.l.bf16 %v7928_v39  ;;  %v2194_v3 = vunpack.c.h.bf16 %v7933_v40  ;;  %v2226_v8 = vunpack.c.l.bf16 %v7933_v40 }
  0x10   :  { %v4194_v42 = vld [vmem:[#allocation1 + $0x80] ss:$2 sm:%s7890_s4]   ;;  %4221 = vst.msk [vmem:[#allocation0 + $0x24] ss:$8 sm:$0x3] %vm4100_vm0, %v4218_v36   ;;  %s4481_s5 = smov 3 }
  0x11   :  { %4227 = vst.msk [vmem:[#allocation0 + $0x25] ss:$8 sm:$0x3] %vm4100_vm0, %v4224_v37   ;;  %v7944_v46 = vld [vmem:[%s8790_s0 + $0xe0] sm:$0xff]   ;;  %v4128_v47 = vld [vmem:[#allocation1 + $0x28] ss:$2 sm:%s7873_s23]  }
  0x12   :  { %v4134_v48 = vld [vmem:[#allocation1 + $0x30] ss:$2 sm:%s7875_s24]   ;;  %4191 = vst.msk [vmem:[#allocation0 + $0x17] ss:$8 sm:$0x3] %vm4100_vm0, %v4188_v41   ;;  %v7961_v57 = vld [vmem:[%s8790_s0 + $0xc8] sm:$0xff]   ;;  %v2258_v9 = vunpack.c.h.bf16 %v7944_v46  ;;  %v2290_v14 = vunpack.c.l.bf16 %v7944_v46 }
  0x13   :  { %v4140_v49 = vld [vmem:[#allocation1 + $0x38] ss:$2 sm:%s7883_s29]   ;;  %4197 = vst.msk [vmem:[#allocation0 + $0x20] ss:$8 sm:$0x3] %vm4100_vm0, %v4194_v42   ;;  %v7984_v4 = vld [vmem:[%s8790_s0 + $0x128] sm:$0xff]   ;;  %v2450_v17 = vunpack.c.h.bf16 %v7961_v57  ;;  %v2482_v18 = vunpack.c.l.bf16 %v7961_v57 }
  0x14   :  { %4203 = vst.msk [vmem:[#allocation0 + $0x21] ss:$8 sm:$0x3] %vm4100_vm0, %v4200_v43   ;;  %3077 = vst [vmem:[#allocation1 + $0x1f8] ss:$8 sps:$4 sm:$0xff] %v3074_v38   ;;  %v7974_v63 = vld [vmem:[%s8790_s0 + $0xc0] sm:$0xff]   ;;  %v1682_v27 = vunpack.c.h.bf16 %v7984_v4  ;;  %v1714_v28 = vunpack.c.l.bf16 %v7984_v4 }
  0x15   :  { %v4104_v52 = vld [vmem:[#allocation1 + $0x8] ss:$2 sm:%s7862_s17]   ;;  %v4116_v54 = vld [vmem:[#allocation1 + $0x18] ss:$2 sm:%s7869_s21]   ;;  %3221 = vst [vmem:[#allocation1 + $0x1b0] ss:$8 sps:$4 sm:$0xff] %v3218_v44   ;;  %v2514_v24 = vunpack.c.h.bf16 %v7974_v63  ;;  %v2546_v25 = vunpack.c.l.bf16 %v7974_v63 }
  0x16   :  { %v4110_v53 = vld [vmem:[#allocation1 + $0x10] ss:$2 sm:%s7864_s18]   ;;  %4131 = vst.msk [vmem:[#allocation0 + $0x5] ss:$8 sm:$0x3] %vm4100_vm0, %v4128_v47   ;;  %v7992_v10 = vld [vmem:[%s8790_s0 + $0x120] sm:$0xff]  }
  0x17   :  { %4137 = vst.msk [vmem:[#allocation0 + $0x6] ss:$8 sm:$0x3] %vm4100_vm0, %v4134_v48   ;;  %4143 = vst.msk [vmem:[#allocation0 + $0x7] ss:$8 sm:$0x3] %vm4100_vm0, %v4140_v49   ;;  %v1746_v33 = vunpack.c.h.bf16 %v7992_v10  ;;  %v1778_v34 = vunpack.c.l.bf16 %v7992_v10 }
  0x18   :  { %3253 = vst [vmem:[#allocation1 + $0x1a0] ss:$8 sps:$4 sm:$0xff] %v3250_v45   ;;  %v4099_v58 = vld [vmem:[#allocation1] ss:$2 sm:%s7854_s12]   ;;  %v4206_v60 = vld [vmem:[#allocation1 + $0x90] ss:$2 sm:%s7897_s8]  }
  0x19   :  { %4107 = vst.msk [vmem:[#allocation0 + $0x1] ss:$8 sm:$0x3] %vm4100_vm0, %v4104_v52   ;;  %4113 = vst.msk [vmem:[#allocation0 + $0x2] ss:$8 sm:$0x3] %vm4100_vm0, %v4110_v53  }
  0x1a   :  { %4119 = vst.msk [vmem:[#allocation0 + $0x3] ss:$8 sm:$0x3] %vm4100_vm0, %v4116_v54   ;;  %v4122_v59 = vld [vmem:[#allocation1 + $0x20] ss:$2 sm:%s7871_s22]   ;;  %s4487_s8 = smov 3 }
  0x1b   :  { %3285 = vst [vmem:[#allocation1 + $0x190] ss:$8 sps:$4 sm:$0xff] %v3282_v50   ;;  %3317 = vst [vmem:[#allocation1 + $0x180] ss:$8 sps:$4 sm:$0xff] %v3314_v51   ;;  %v4230_v12 = vld [vmem:[#allocation1 + $0xb0] ss:$2 sm:%s7905_s19]  }
  0x1c   :  { %4101 = vst.msk [vmem:[#allocation0] ss:$8 sm:$0x3] %vm4100_vm0, %v4099_v58   ;;  %4125 = vst.msk [vmem:[#allocation0 + $0x4] ss:$8 sm:$0x3] %vm4100_vm0, %v4122_v59  }
  0x1d   :  { %4209 = vst.msk [vmem:[#allocation0 + $0x22] ss:$8 sm:$0x3] %vm4100_vm0, %v4206_v60   ;;  %v5633_v0 = vld [vmem:[#allocation1 + $0x1] ss:$8 sm:$0xf]  }
  0x1e   :  { %v5635_v1 = vld [vmem:[#allocation1 + $0x1] ss:$8 sm:$0xf0]   ;;  %3461 = vst [vmem:[#allocation1 + $0x138] ss:$8 sps:$4 sm:$0xff] %v3458_v55   ;;  %s4493_s15 = smov 3 }
  0x1f   :  { %3493 = vst [vmem:[#allocation1 + $0x128] ss:$8 sps:$4 sm:$0xff] %v3490_v56   ;;  %v5637_v5 = vsel %vm5636_vm1, %v5635_v1, %v5633_v0  ;;  %v5643_v6 = vld [vmem:[#allocation1 + $0x81] ss:$8 sm:$0xf]   ;;  %s4499_s16 = smov 3 }
  0x20   :  { %v5645_v7 = vld [vmem:[#allocation1 + $0x81] ss:$8 sm:$0xf0]   ;;  %3525 = vst [vmem:[#allocation1 + $0x118] ss:$8 sps:$4 sm:$0xff] %v3522_v61   ;;  %s4505_s28 = smov 3 }
  0x21   :  { %3557 = vst [vmem:[#allocation1 + $0x108] ss:$8 sps:$4 sm:$0xff] %v3554_v62   ;;  %v5647_v11 = vsel %vm5636_vm1, %v5645_v7, %v5643_v6  ;;  %v4236_v13 = vld [vmem:[#allocation1 + $0xb8] ss:$2 sm:%s7907_s20]   ;;  %3589 = vst [vmem:[#allocation1 + $0xf8] ss:$8 sps:$4 sm:$0xff] %v3586_v2  }
  0x22   :  { %2197 = vst [vmem:[#allocation1 + $0x3b0] ss:$8 sps:$4 sm:$0xff] %v2194_v3   ;;  %v7674_v15 = vpack.i.bf16 %v5647_v11, %v5637_v5  ;;  %4233 = vst.msk [vmem:[#allocation0 + $0x26] ss:$8 sm:$0x3] %vm4100_vm0, %v4230_v12   ;;  %v7284_v19 = vld [vmem:[%s8790_s0 + $0x108] sm:$0xff]  }
  0x23   :  { %4239 = vst.msk [vmem:[#allocation0 + $0x27] ss:$8 sm:$0x3] %vm4100_vm0, %v4236_v13   ;;  %v4488_v16 = vld [vmem:[#allocation1 + $0x208] ss:$2 sm:%s4487_s8]   ;;  %v8008_v20 = vld [vmem:[%s8790_s0 + $0x100] sm:$0xff]   ;;  %v1938_v38 = vunpack.c.h.bf16 %v7284_v19  ;;  %v1970_v39 = vunpack.c.l.bf16 %v7284_v19 }
  0x24   :  { %2229 = vst [vmem:[#allocation1 + $0x3a0] ss:$8 sps:$4 sm:$0xff] %v2226_v8   ;;  %2261 = vst [vmem:[#allocation1 + $0x390] ss:$8 sps:$4 sm:$0xff] %v2258_v9   ;;  %v4476_v21 = vld [vmem:[#allocation1 + $0x1f8] ss:$2 sm:%s7912_s27]   ;;  %v2002_v43 = vunpack.c.h.bf16 %v8008_v20  ;;  %v2034_v44 = vunpack.c.l.bf16 %v8008_v20 }
  0x25   :  { %v4482_v22 = vld [vmem:[#allocation1 + $0x200] ss:$2 sm:%s4481_s5]   ;;  %4491 = vst.msk [vmem:[#allocation0 + $0x81] ss:$8 sm:$0x3] %vm4100_vm0, %v4488_v16   ;;  %s7834_s27 = smov 64  }
  0x26   :  { %v4494_v23 = vld [vmem:[#allocation1 + $0x210] ss:$2 sm:%s4493_s15]   ;;  %2293 = vst [vmem:[#allocation1 + $0x380] ss:$8 sps:$4 sm:$0xff] %v2290_v14   ;;  %7675 = vrot.lane.b32.xlu0 %v7674_v15, %s7834_s27  ;;  %s4511_s2 = smov 3  ;;  %v7236_v29 = vld [vmem:[%s8790_s0 + $0x168] sm:$0xff]  }
  0x27   :  { %4479 = vst.msk [vmem:[#allocation0 + $0x77] ss:$8 sm:$0x3] %vm4100_vm0, %v4476_v21   ;;  %4485 = vst.msk [vmem:[#allocation0 + $0x80] ss:$8 sm:$0x3] %vm4100_vm0, %v4482_v22   ;;  %v1170_v48 = vunpack.c.h.bf16 %v7236_v29  ;;  %v1202_v49 = vunpack.c.l.bf16 %v7236_v29 }
  0x28   :  { %4497 = vst.msk [vmem:[#allocation0 + $0x82] ss:$8 sm:$0x3] %vm4100_vm0, %v4494_v23   ;;  %v4500_v26 = vld [vmem:[#allocation1 + $0x218] ss:$2 sm:%s4499_s16]   ;;  %s4517_s9 = smov 3 }
  0x29   :  { %2453 = vst [vmem:[#allocation1 + $0x330] ss:$8 sps:$4 sm:$0xff] %v2450_v17   ;;  %2485 = vst [vmem:[#allocation1 + $0x320] ss:$8 sps:$4 sm:$0xff] %v2482_v18   ;;  %v8026_v30 = vld [vmem:[%s8790_s0 + $0x160] sm:$0xff]   ;;  %s4523_s11 = smov 3 }
  0x2a   :  { %4503 = vst.msk [vmem:[#allocation0 + $0x83] ss:$8 sm:$0x3] %vm4100_vm0, %v4500_v26   ;;  %v4506_v31 = vld [vmem:[#allocation1 + $0x220] ss:$2 sm:%s4505_s28]   ;;  %s4571_s30 = smov 3  ;;  %v1234_v53 = vunpack.c.h.bf16 %v8026_v30  ;;  %v1266_v54 = vunpack.c.l.bf16 %v8026_v30 }
  0x2b   :  { %v4512_v32 = vld [vmem:[#allocation1 + $0x228] ss:$2 sm:%s4511_s2]   ;;  %2517 = vst [vmem:[#allocation1 + $0x310] ss:$8 sps:$4 sm:$0xff] %v2514_v24   ;;  %2549 = vst [vmem:[#allocation1 + $0x300] ss:$8 sps:$4 sm:$0xff] %v2546_v25  }
  0x2c   :  { %v8034_v35 = vld [vmem:[%s8790_s0 + $0x148] sm:$0xff]   ;;  %4509 = vst.msk [vmem:[#allocation0 + $0x84] ss:$8 sm:$0x3] %vm4100_vm0, %v4506_v31   ;;  %v4518_v36 = vld [vmem:[#allocation1 + $0x230] ss:$2 sm:%s4517_s9]  }
  0x2d   :  { %4515 = vst.msk [vmem:[#allocation0 + $0x85] ss:$8 sm:$0x3] %vm4100_vm0, %v4512_v32   ;;  %v4524_v37 = vld [vmem:[#allocation1 + $0x238] ss:$2 sm:%s4523_s11]   ;;  %s4577_s4 = smov 3  ;;  %v1426_v58 = vunpack.c.h.bf16 %v8034_v35  ;;  %v1458_v59 = vunpack.c.l.bf16 %v8034_v35 }
  0x2e   :  { %1685 = vst [vmem:[#allocation1 + $0x4b0] ss:$8 sps:$4 sm:$0xff] %v1682_v27   ;;  %1717 = vst [vmem:[#allocation1 + $0x4a0] ss:$8 sps:$4 sm:$0xff] %v1714_v28   ;;  %v8041_v40 = vld [vmem:[%s8790_s0 + $0x140] sm:$0xff]   ;;  %s4583_s12 = smov 3 }
  0x2f   :  { %4521 = vst.msk [vmem:[#allocation0 + $0x86] ss:$8 sm:$0x3] %vm4100_vm0, %v4518_v36   ;;  %4527 = vst.msk [vmem:[#allocation0 + $0x87] ss:$8 sm:$0x3] %vm4100_vm0, %v4524_v37   ;;  %v1490_v63 = vunpack.c.h.bf16 %v8041_v40  ;;  %v1522_v0 = vunpack.c.l.bf16 %v8041_v40 }
  0x30   :  { %v4572_v41 = vld [vmem:[#allocation1 + $0x278] ss:$2 sm:%s4571_s30]   ;;  %s4589_s21 = smov 3  ;;  %1749 = vst [vmem:[#allocation1 + $0x490] ss:$8 sps:$4 sm:$0xff] %v1746_v33   ;;  %v8050_v45 = vld [vmem:[%s8790_s0 + $0x1aa] sm:$0xff]  }
  0x31   :  { %v4578_v42 = vld [vmem:[#allocation1 + $0x280] ss:$2 sm:%s4577_s4]   ;;  %1781 = vst [vmem:[#allocation1 + $0x480] ss:$8 sps:$4 sm:$0xff] %v1778_v34   ;;  %v4590_v47 = vld [vmem:[#allocation1 + $0x290] ss:$2 sm:%s4589_s21]   ;;  %v658_v4 = vunpack.c.h.bf16 %v8050_v45  ;;  %v674_v5 = vunpack.c.l.bf16 %v8050_v45 }
  0x32   :  { %4575 = vst.msk [vmem:[#allocation0 + $0x97] ss:$8 sm:$0x3] %vm4100_vm0, %v4572_v41   ;;  %4581 = vst.msk [vmem:[#allocation0 + $0xa0] ss:$8 sm:$0x3] %vm4100_vm0, %v4578_v42  }
  0x33   :  { %v4584_v46 = vld [vmem:[#allocation1 + $0x288] ss:$2 sm:%s4583_s12]   ;;  %s4595_s24 = smov 3  ;;  %s4601_s29 = smov 3  ;;  %1941 = vst [vmem:[#allocation1 + $0x430] ss:$8 sps:$4 sm:$0xff] %v1938_v38  }
  0x34   :  { %1973 = vst [vmem:[#allocation1 + $0x420] ss:$8 sps:$4 sm:$0xff] %v1970_v39   ;;  %v8057_v50 = vld [vmem:[%s8790_s0 + $0x1a2] sm:$0xff]   ;;  %4587 = vst.msk [vmem:[#allocation0 + $0xa1] ss:$8 sm:$0x3] %vm4100_vm0, %v4584_v46  }
  0x35   :  { %4593 = vst.msk [vmem:[#allocation0 + $0xa2] ss:$8 sm:$0x3] %vm4100_vm0, %v4590_v47   ;;  %v4596_v51 = vld [vmem:[#allocation1 + $0x298] ss:$2 sm:%s4595_s24]   ;;  %s4607_s15 = smov 3  ;;  %v706_v9 = vunpack.c.h.bf16 %v8057_v50  ;;  %v738_v13 = vunpack.c.l.bf16 %v8057_v50 }
  0x36   :  { %v4602_v52 = vld [vmem:[#allocation1 + $0x2a0] ss:$2 sm:%s4601_s29]   ;;  %s4613_s16 = smov 3  ;;  %2005 = vst [vmem:[#allocation1 + $0x410] ss:$8 sps:$4 sm:$0xff] %v2002_v43   ;;  %s4619_s25 = smov 3 }
  0x37   :  { %2037 = vst [vmem:[#allocation1 + $0x400] ss:$8 sps:$4 sm:$0xff] %v2034_v44   ;;  %v8066_v55 = vld [vmem:[%s8790_s0 + $0x18a] sm:$0xff]   ;;  %4599 = vst.msk [vmem:[#allocation0 + $0xa3] ss:$8 sm:$0x3] %vm4100_vm0, %v4596_v51  }
  0x38   :  { %4605 = vst.msk [vmem:[#allocation0 + $0xa4] ss:$8 sm:$0x3] %vm4100_vm0, %v4602_v52   ;;  %v4608_v56 = vld [vmem:[#allocation1 + $0x2a8] ss:$2 sm:%s4607_s15]   ;;  %s4283_s2 = smov 3  ;;  %v914_v14 = vunpack.c.h.bf16 %v8066_v55  ;;  %v930_v17 = vunpack.c.l.bf16 %v8066_v55 }
  0x39   :  { %v5676_v57 = vld [vmem:[#allocation1 + $0x201] ss:$8 sm:$0xf]   ;;  %1173 = vst [vmem:[#allocation1 + $0x5b0] ss:$8 sps:$4 sm:$0xff] %v1170_v48   ;;  %s4289_s3 = smov 3 }
  0x3a   :  { %1205 = vst [vmem:[#allocation1 + $0x5a0] ss:$8 sps:$4 sm:$0xff] %v1202_v49   ;;  %v8075_v60 = vld [vmem:[%s8790_s0 + $0x182] sm:$0xff]   ;;  %4611 = vst.msk [vmem:[#allocation0 + $0xa5] ss:$8 sm:$0x3] %vm4100_vm0, %v4608_v56  }
  0x3b   :  { %v5678_v61 = vld [vmem:[#allocation1 + $0x201] ss:$8 sm:$0xf0]   ;;  %1237 = vst [vmem:[#allocation1 + $0x590] ss:$8 sps:$4 sm:$0xff] %v1234_v53   ;;  %s4295_s6 = smov 3  ;;  %v962_v18 = vunpack.c.h.bf16 %v8075_v60  ;;  %v994_v21 = vunpack.c.l.bf16 %v8075_v60 }
  0x3c   :  { %v5687_v62 = vld [vmem:[#allocation1 + $0x281] ss:$8 sm:$0xf]   ;;  %1269 = vst [vmem:[#allocation1 + $0x580] ss:$8 sps:$4 sm:$0xff] %v1266_v54   ;;  %v5680_v1 = vsel %vm5636_vm1, %v5678_v61, %v5676_v57  ;;  %s4301_s7 = smov 3 }
  0x3d   :  { %v5689_v2 = vld [vmem:[#allocation1 + $0x281] ss:$8 sm:$0xf0]   ;;  %v4614_v3 = vld [vmem:[#allocation1 + $0x2b0] ss:$2 sm:%s4613_s16]   ;;  %s4307_s10 = smov 3 }
  0x3e   :  { %1429 = vst [vmem:[#allocation1 + $0x530] ss:$8 sps:$4 sm:$0xff] %v1426_v58   ;;  %1461 = vst [vmem:[#allocation1 + $0x520] ss:$8 sps:$4 sm:$0xff] %v1458_v59   ;;  %v5691_v6 = vsel %vm5636_vm1, %v5689_v2, %v5687_v62  ;;  %v4620_v7 = vld [vmem:[#allocation1 + $0x2b8] ss:$2 sm:%s4619_s25]  }
  0x3f   :  { %4617 = vst.msk [vmem:[#allocation0 + $0xa6] ss:$8 sm:$0x3] %vm4100_vm0, %v4614_v3   ;;  %v4284_v8 = vld [vmem:[#allocation1 + $0xf8] ss:$2 sm:%s4283_s2]   ;;  %v7684_v10 = vpack.i.bf16 %v5691_v6, %v5680_v1  ;;  %s4313_s9 = smov 3 }
  0x40   :  { %1493 = vst [vmem:[#allocation1 + $0x510] ss:$8 sps:$4 sm:$0xff] %v1490_v63   ;;  %1525 = vst [vmem:[#allocation1 + $0x500] ss:$8 sps:$4 sm:$0xff] %v1522_v0   ;;  %v4290_v11 = vld [vmem:[#allocation1 + $0x100] ss:$2 sm:%s4289_s3]  }
  0x41   :  { %4623 = vst.msk [vmem:[#allocation0 + $0xa7] ss:$8 sm:$0x3] %vm4100_vm0, %v4620_v7   ;;  %4287 = vst.msk [vmem:[#allocation0 + $0x37] ss:$8 sm:$0x3] %vm4100_vm0, %v4284_v8   ;;  %7685 = vrot.lane.b32.xlu1 %v7684_v10, %s7834_s27 }
  0x42   :  { %v4296_v12 = vld [vmem:[#allocation1 + $0x108] ss:$2 sm:%s4295_s6]   ;;  %661 = vst [vmem:[#allocation1 + $0x6b8] ss:$8 sps:$4 sm:$0xff] %v658_v4   ;;  %677 = vst [vmem:[#allocation1 + $0x6a8] ss:$8 sps:$4 sm:$0xff] %v674_v5  }
  0x43   :  { %4293 = vst.msk [vmem:[#allocation0 + $0x40] ss:$8 sm:$0x3] %vm4100_vm0, %v4290_v11   ;;  %4299 = vst.msk [vmem:[#allocation0 + $0x41] ss:$8 sm:$0x3] %vm4100_vm0, %v4296_v12  }
  0x44   :  { %v4302_v15 = vld [vmem:[#allocation1 + $0x110] ss:$2 sm:%s4301_s7]   ;;  %s4319_s11 = smov 3  ;;  %709 = vst [vmem:[#allocation1 + $0x698] ss:$8 sps:$4 sm:$0xff] %v706_v9   ;;  %s4325_s13 = smov 3 }
  0x45   :  { %v4308_v16 = vld [vmem:[#allocation1 + $0x118] ss:$2 sm:%s4307_s10]   ;;  %4305 = vst.msk [vmem:[#allocation0 + $0x42] ss:$8 sm:$0x3] %vm4100_vm0, %v4302_v15   ;;  %s4331_s14 = smov 3 }
  0x46   :  { %4311 = vst.msk [vmem:[#allocation0 + $0x43] ss:$8 sm:$0x3] %vm4100_vm0, %v4308_v16   ;;  %v4314_v19 = vld [vmem:[#allocation1 + $0x120] ss:$2 sm:%s4313_s9]   ;;  %s4385_s30 = smov 3 }
  0x47   :  { %v4320_v20 = vld [vmem:[#allocation1 + $0x128] ss:$2 sm:%s4319_s11]   ;;  %741 = vst [vmem:[#allocation1 + $0x688] ss:$8 sps:$4 sm:$0xff] %v738_v13   ;;  %917 = vst [vmem:[#allocation1 + $0x638] ss:$8 sps:$4 sm:$0xff] %v914_v14  }
  0x48   :  { %4317 = vst.msk [vmem:[#allocation0 + $0x44] ss:$8 sm:$0x3] %vm4100_vm0, %v4314_v19   ;;  %4323 = vst.msk [vmem:[#allocation0 + $0x45] ss:$8 sm:$0x3] %vm4100_vm0, %v4320_v20  }
  0x49   :  { %v4326_v22 = vld [vmem:[#allocation1 + $0x130] ss:$2 sm:%s4325_s13]   ;;  %s4391_s4 = smov 3  ;;  %933 = vst [vmem:[#allocation1 + $0x628] ss:$8 sps:$4 sm:$0xff] %v930_v17   ;;  %s4397_s17 = smov 3 }
  0x4a   :  { %v4332_v23 = vld [vmem:[#allocation1 + $0x138] ss:$2 sm:%s4331_s14]   ;;  %965 = vst [vmem:[#allocation1 + $0x618] ss:$8 sps:$4 sm:$0xff] %v962_v18   ;;  %v4392_v25 = vld [vmem:[#allocation1 + $0x188] ss:$2 sm:%s4391_s4]  }
  0x4b   :  { %4329 = vst.msk [vmem:[#allocation0 + $0x46] ss:$8 sm:$0x3] %vm4100_vm0, %v4326_v22   ;;  %4335 = vst.msk [vmem:[#allocation0 + $0x47] ss:$8 sm:$0x3] %vm4100_vm0, %v4332_v23  }
  0x4c   :  { %v4386_v24 = vld [vmem:[#allocation1 + $0x180] ss:$2 sm:%s4385_s30]   ;;  %s4403_s18 = smov 3  ;;  %997 = vst [vmem:[#allocation1 + $0x608] ss:$8 sps:$4 sm:$0xff] %v994_v21   ;;  %s4409_s12 = smov 3 }
  0x4d   :  { %4389 = vst.msk [vmem:[#allocation0 + $0x60] ss:$8 sm:$0x3] %vm4100_vm0, %v4386_v24   ;;  %4395 = vst.msk [vmem:[#allocation0 + $0x61] ss:$8 sm:$0x3] %vm4100_vm0, %v4392_v25  }
  0x4e   :  { %v4398_v26 = vld [vmem:[#allocation1 + $0x190] ss:$2 sm:%s4397_s17]   ;;  %s4415_s21 = smov 3  ;;  %v4410_v28 = vld [vmem:[#allocation1 + $0x1a0] ss:$2 sm:%s4409_s12]   ;;  %s4421_s22 = smov 3 }
  0x4f   :  { %v4404_v27 = vld [vmem:[#allocation1 + $0x198] ss:$2 sm:%s4403_s18]   ;;  %4401 = vst.msk [vmem:[#allocation0 + $0x62] ss:$8 sm:$0x3] %vm4100_vm0, %v4398_v26   ;;  %s4697_s23 = smov 3 }
  0x50   :  { %4407 = vst.msk [vmem:[#allocation0 + $0x63] ss:$8 sm:$0x3] %vm4100_vm0, %v4404_v27   ;;  %v4416_v29 = vld [vmem:[#allocation1 + $0x1a8] ss:$2 sm:%s4415_s21]   ;;  %s4703_s24 = smov 3 }
  0x51   :  { %4413 = vst.msk [vmem:[#allocation0 + $0x64] ss:$8 sm:$0x3] %vm4100_vm0, %v4410_v28   ;;  %4419 = vst.msk [vmem:[#allocation0 + $0x65] ss:$8 sm:$0x3] %vm4100_vm0, %v4416_v29  }
  0x52   :  { %v5654_v30 = vld [vmem:[#allocation1 + $0x101] ss:$8 sm:$0xf]   ;;  %v4422_v36 = vld [vmem:[#allocation1 + $0x1b0] ss:$2 sm:%s4421_s22]   ;;  %s4709_s29 = smov 3 }
  0x53   :  { %v5656_v31 = vld [vmem:[#allocation1 + $0x101] ss:$8 sm:$0xf0]   ;;  %v4698_v37 = vld [vmem:[#allocation1 + $0x320] ss:$2 sm:%s4697_s23]   ;;  %s4769_s5 = smov 3 }
  0x54   :  { %v5658_v32 = vsel %vm5636_vm1, %v5656_v31, %v5654_v30  ;;  %v5665_v33 = vld [vmem:[#allocation1 + $0x181] ss:$8 sm:$0xf]   ;;  %4425 = vst.msk [vmem:[#allocation0 + $0x66] ss:$8 sm:$0x3] %vm4100_vm0, %v4422_v36  }
  0x55   :  { %v5667_v34 = vld [vmem:[#allocation1 + $0x181] ss:$8 sm:$0xf0]   ;;  %4701 = vst.msk [vmem:[#allocation0 + $0xc4] ss:$8 sm:$0x3] %vm4100_vm0, %v4698_v37  }
  0x56   :  { %v5669_v35 = vsel %vm5636_vm1, %v5667_v34, %v5665_v33  ;;  %v4704_v39 = vld [vmem:[#allocation1 + $0x328] ss:$2 sm:%s4703_s24]   ;;  %s4775_s8 = smov 3  ;;  %s4781_s15 = smov 3  ;;  %v7227_v15 = vld [vmem:[%s8790_s0 + $0x180] sm:$0x3] }
  0x57   :  { %v7679_v38 = vpack.i.bf16 %v5669_v35, %v5658_v32  ;;  %v4710_v40 = vld [vmem:[#allocation1 + $0x330] ss:$2 sm:%s4709_s29]   ;;  %4707 = vst.msk [vmem:[#allocation0 + $0xc5] ss:$8 sm:$0x3] %vm4100_vm0, %v4704_v39   ;;  %s4865_s16 = smov 3  ;;  %v1026_v18 = vunpack.c.l.bf16 %v7227_v15 }
  0x58   :  { %4713 = vst.msk [vmem:[#allocation0 + $0xc6] ss:$8 sm:$0x3] %vm4100_vm0, %v4710_v40   ;;  %v4770_v41 = vld [vmem:[#allocation1 + $0x380] ss:$2 sm:%s4769_s5]   ;;  %s4871_s19 = smov 3 }
  0x59   :  { %v4776_v42 = vld [vmem:[#allocation1 + $0x388] ss:$2 sm:%s4775_s8]   ;;  %7680 = vrot.lane.b32.xlu0 %v7679_v38, %s7834_s27  ;;  %4773 = vst.msk [vmem:[#allocation0 + $0xe0] ss:$8 sm:$0x3] %vm4100_vm0, %v4770_v41   ;;  %s4877_s20 = smov 3 }
  0x5a   :  { %4779 = vst.msk [vmem:[#allocation0 + $0xe1] ss:$8 sm:$0x3] %vm4100_vm0, %v4776_v42   ;;  %v4782_v43 = vld [vmem:[#allocation1 + $0x390] ss:$2 sm:%s4781_s15]   ;;  %s4883_s25 = smov 3 }
  0x5b   :  { %v5698_v44 = vld [vmem:[#allocation1 + $0x301] ss:$8 sm:$0xf]   ;;  %4785 = vst.msk [vmem:[#allocation0 + $0xe2] ss:$8 sm:$0x3] %vm4100_vm0, %v4782_v43  }
  0x5c   :  { %v5700_v45 = vld [vmem:[#allocation1 + $0x301] ss:$8 sm:$0xf0]   ;;  %v4866_v49 = vld [vmem:[#allocation1 + $0x400] ss:$2 sm:%s4865_s16]   ;;  %s4889_s26 = smov 3 }
  0x5d   :  { %v5709_v46 = vld [vmem:[#allocation1 + $0x381] ss:$8 sm:$0xf]   ;;  %v5702_v47 = vsel %vm5636_vm1, %v5700_v45, %v5698_v44  ;;  %4869 = vst.msk [vmem:[#allocation0 + $0x100] ss:$8 sm:$0x3] %vm4100_vm0, %v4866_v49  }
  0x5e   :  { %v5711_v48 = vld [vmem:[#allocation1 + $0x381] ss:$8 sm:$0xf0]   ;;  %v4872_v51 = vld [vmem:[#allocation1 + $0x408] ss:$2 sm:%s4871_s19]   ;;  %s4895_s28 = smov 3 }
  0x5f   :  { %v5713_v50 = vsel %vm5636_vm1, %v5711_v48, %v5709_v46  ;;  %v4878_v52 = vld [vmem:[#allocation1 + $0x410] ss:$2 sm:%s4877_s20]   ;;  %4875 = vst.msk [vmem:[#allocation0 + $0x101] ss:$8 sm:$0x3] %vm4100_vm0, %v4872_v51   ;;  %s4901_s2 = smov 3 }
  0x60   :  { %v7689_v53 = vpack.i.bf16 %v5713_v50, %v5702_v47  ;;  %4881 = vst.msk [vmem:[#allocation0 + $0x102] ss:$8 sm:$0x3] %vm4100_vm0, %v4878_v52   ;;  %v4884_v54 = vld [vmem:[#allocation1 + $0x418] ss:$2 sm:%s4883_s25]   ;;  %s4961_s3 = smov 3 }
  0x61   :  { %v4890_v55 = vld [vmem:[#allocation1 + $0x420] ss:$2 sm:%s4889_s26]   ;;  %4887 = vst.msk [vmem:[#allocation0 + $0x103] ss:$8 sm:$0x3] %vm4100_vm0, %v4884_v54   ;;  %s4967_s6 = smov 3 }
  0x62   :  { %4893 = vst.msk [vmem:[#allocation0 + $0x104] ss:$8 sm:$0x3] %vm4100_vm0, %v4890_v55   ;;  %v4896_v56 = vld [vmem:[#allocation1 + $0x428] ss:$2 sm:%s4895_s28]   ;;  %7690 = vrot.lane.b32.xlu1 %v7689_v53, %s7834_s27  ;;  %s4973_s7 = smov 3 }
  0x63   :  { %v4902_v57 = vld [vmem:[#allocation1 + $0x430] ss:$2 sm:%s4901_s2]   ;;  %4899 = vst.msk [vmem:[#allocation0 + $0x105] ss:$8 sm:$0x3] %vm4100_vm0, %v4896_v56   ;;  %s4979_s10 = smov 3 }
  0x64   :  { %4905 = vst.msk [vmem:[#allocation0 + $0x106] ss:$8 sm:$0x3] %vm4100_vm0, %v4902_v57   ;;  %v4962_v58 = vld [vmem:[#allocation1 + $0x480] ss:$2 sm:%s4961_s3]   ;;  %s4985_s9 = smov 3 }
  0x65   :  { %v4968_v59 = vld [vmem:[#allocation1 + $0x488] ss:$2 sm:%s4967_s6]   ;;  %4965 = vst.msk [vmem:[#allocation0 + $0x120] ss:$8 sm:$0x3] %vm4100_vm0, %v4962_v58   ;;  %s4991_s11 = smov 3 }
  0x66   :  { %4971 = vst.msk [vmem:[#allocation0 + $0x121] ss:$8 sm:$0x3] %vm4100_vm0, %v4968_v59   ;;  %v4974_v60 = vld [vmem:[#allocation1 + $0x490] ss:$2 sm:%s4973_s7]   ;;  %s4997_s13 = smov 3 }
  0x67   :  { %v4980_v61 = vld [vmem:[#allocation1 + $0x498] ss:$2 sm:%s4979_s10]   ;;  %4977 = vst.msk [vmem:[#allocation0 + $0x122] ss:$8 sm:$0x3] %vm4100_vm0, %v4974_v60   ;;  %s5057_s14 = smov 3 }
  0x68   :  { %4983 = vst.msk [vmem:[#allocation0 + $0x123] ss:$8 sm:$0x3] %vm4100_vm0, %v4980_v61   ;;  %v4986_v62 = vld [vmem:[#allocation1 + $0x4a0] ss:$2 sm:%s4985_s9]   ;;  %s5063_s30 = smov 3 }
  0x69   :  { %v4992_v63 = vld [vmem:[#allocation1 + $0x4a8] ss:$2 sm:%s4991_s11]   ;;  %4989 = vst.msk [vmem:[#allocation0 + $0x124] ss:$8 sm:$0x3] %vm4100_vm0, %v4986_v62   ;;  %s5069_s4 = smov 3 }
  0x6a   :  { %4995 = vst.msk [vmem:[#allocation0 + $0x125] ss:$8 sm:$0x3] %vm4100_vm0, %v4992_v63   ;;  %v5720_v0 = vld [vmem:[#allocation1 + $0x401] ss:$8 sm:$0xf]  }
  0x6b   :  { %v5722_v1 = vld [vmem:[#allocation1 + $0x401] ss:$8 sm:$0xf0]   ;;  %v4998_v6 = vld [vmem:[#allocation1 + $0x4b0] ss:$2 sm:%s4997_s13]   ;;  %s5075_s17 = smov 3 }
  0x6c   :  { %v5724_v2 = vsel %vm5636_vm1, %v5722_v1, %v5720_v0  ;;  %v5731_v3 = vld [vmem:[#allocation1 + $0x481] ss:$8 sm:$0xf]   ;;  %v5058_v7 = vld [vmem:[#allocation1 + $0x500] ss:$2 sm:%s5057_s14]   ;;  %s5081_s18 = smov 3 }
  0x6d   :  { %v5733_v4 = vld [vmem:[#allocation1 + $0x481] ss:$8 sm:$0xf0]   ;;  %5001 = vst.msk [vmem:[#allocation0 + $0x126] ss:$8 sm:$0x3] %vm4100_vm0, %v4998_v6  }
  0x6e   :  { %v5735_v5 = vsel %vm5636_vm1, %v5733_v4, %v5731_v3  ;;  %5061 = vst.msk [vmem:[#allocation0 + $0x140] ss:$8 sm:$0x3] %vm4100_vm0, %v5058_v7   ;;  %v5064_v9 = vld [vmem:[#allocation1 + $0x508] ss:$2 sm:%s5063_s30]   ;;  %s5087_s12 = smov 3 }
  0x6f   :  { %v7694_v8 = vpack.i.bf16 %v5735_v5, %v5724_v2  ;;  %v5070_v10 = vld [vmem:[#allocation1 + $0x510] ss:$2 sm:%s5069_s4]   ;;  %5067 = vst.msk [vmem:[#allocation0 + $0x141] ss:$8 sm:$0x3] %vm4100_vm0, %v5064_v9   ;;  %s5093_s21 = smov 3 }
  0x70   :  { %5073 = vst.msk [vmem:[#allocation0 + $0x142] ss:$8 sm:$0x3] %vm4100_vm0, %v5070_v10   ;;  %v5076_v11 = vld [vmem:[#allocation1 + $0x518] ss:$2 sm:%s5075_s17]   ;;  %s5363_s5 = smov 3 }
  0x71   :  { %v5082_v12 = vld [vmem:[#allocation1 + $0x520] ss:$2 sm:%s5081_s18]   ;;  %7695 = vrot.lane.b32.xlu0 %v7694_v8, %s7834_s27  ;;  %5079 = vst.msk [vmem:[#allocation0 + $0x143] ss:$8 sm:$0x3] %vm4100_vm0, %v5076_v11   ;;  %s5369_s8 = smov 3 }
  0x72   :  { %5085 = vst.msk [vmem:[#allocation0 + $0x144] ss:$8 sm:$0x3] %vm4100_vm0, %v5082_v12   ;;  %v5088_v13 = vld [vmem:[#allocation1 + $0x528] ss:$2 sm:%s5087_s12]   ;;  %s5375_s19 = smov 3 }
  0x73   :  { %v5094_v14 = vld [vmem:[#allocation1 + $0x530] ss:$2 sm:%s5093_s21]   ;;  %5091 = vst.msk [vmem:[#allocation0 + $0x145] ss:$8 sm:$0x3] %vm4100_vm0, %v5088_v13   ;;  %s5381_s20 = smov 3 }
  0x74   :  { %5097 = vst.msk [vmem:[#allocation0 + $0x146] ss:$8 sm:$0x3] %vm4100_vm0, %v5094_v14   ;;  %v5742_v16 = vld [vmem:[#allocation1 + $0x501] ss:$8 sm:$0xf]  }
  0x75   :  { %v5744_v17 = vld [vmem:[#allocation1 + $0x501] ss:$8 sm:$0xf0]   ;;  %1029 = vst [vmem:[#allocation1 + $0x600] sm:$0xf] %v1026_v18  ;;  %s5387_s25 = smov 3 }
  0x76   :  { %v5746_v19 = vsel %vm5636_vm1, %v5744_v17, %v5742_v16  ;;  %v5753_v20 = vld [vmem:[#allocation1 + $0x581] ss:$8 sm:$0xf]   ;;  %v5364_v27 = vld [vmem:[#allocation1 + $0x698] ss:$2 sm:%s5363_s5]   ;;  %s8170_s10 = smov 3 }
  0x77   :  { %v5755_v21 = vld [vmem:[#allocation1 + $0x581] ss:$8 sm:$0xf0]   ;;  %v5370_v28 = vld [vmem:[#allocation1 + $0x6a0] ss:$2 sm:%s5369_s8]   ;;  %s8179_s30 = smov 3 }
  0x78   :  { %v5757_v22 = vsel %vm5636_vm1, %v5755_v21, %v5753_v20  ;;  %v7211_v23 = vld [vmem:[%s8790_s0 + $0xf0] ss:$176 sps:$2 sm:$0xf]   ;;  %5367 = vst.msk [vmem:[#allocation0 + $0x1a3] ss:$8 sm:$0x3] %vm4100_vm0, %v5364_v27  }
  0x79   :  { %v7172_v24 = vld [vmem:[%s8790_s0 + $0x1ea] sm:$0xff]   ;;  %v7699_v25 = vpack.i.bf16 %v5757_v22, %v5746_v19  ;;  %v770_v26 = vunpack.c.l.bf16 %v7211_v23  ;;  %5373 = vst.msk [vmem:[#allocation0 + $0x1a4] ss:$8 sm:$0x3] %vm4100_vm0, %v5370_v28   ;;  %v7175_v33 = vld [vmem:[%s8790_s0 + $0x1e2] sm:$0xff]   ;;  %s8181_s4 = smov 3 }
  0x7a   :  { %v146_v29 = vunpack.c.h.bf16 %v7172_v24  ;;  %v162_v30 = vunpack.c.l.bf16 %v7172_v24  ;;  %v5376_v31 = vld [vmem:[#allocation1 + $0x6a8] ss:$2 sm:%s5375_s19]   ;;  %v5766_v34 = vld [vmem:[#allocation1 + $0x601] ss:$8 sm:$0xf0]   ;;  %v194_v36 = vunpack.c.h.bf16 %v7175_v33  ;;  %v226_v37 = vunpack.c.l.bf16 %v7175_v33  ;;  %s8186_s12 = smov 3 }
  0x7b   :  { %7700 = vrot.lane.b32.xlu1 %v7699_v25, %s7834_s27  ;;  %773 = vst [vmem:[#allocation1 + $0x67c] sm:$0xf0] %v770_v26  ;;  %5379 = vst.msk [vmem:[#allocation0 + $0x1a5] ss:$8 sm:$0x3] %vm4100_vm0, %v5376_v31   ;;  %v7188_v39 = vld [vmem:[%s8790_s0 + $0x1ca] sm:$0xff]  }
  0x7c   :  { %v5382_v32 = vld [vmem:[#allocation1 + $0x6b0] ss:$2 sm:%s5381_s20]   ;;  %149 = vst [vmem:[#allocation1 + $0x7b8] ss:$8 sps:$4 sm:$0xff] %v146_v29   ;;  %165 = vst [vmem:[#allocation1 + $0x7a8] ss:$8 sps:$4 sm:$0xff] %v162_v30   ;;  %v402_v41 = vunpack.c.h.bf16 %v7188_v39  ;;  %v418_v42 = vunpack.c.l.bf16 %v7188_v39 }
  0x7d   :  { %5385 = vst.msk [vmem:[#allocation0 + $0x1a6] ss:$8 sm:$0x3] %vm4100_vm0, %v5382_v32   ;;  %v5388_v35 = vld [vmem:[#allocation1 + $0x6b8] ss:$2 sm:%s5387_s25]   ;;  %s8188_s21 = smov 3 }
  0x7e   :  { %v7179_v38 = vld [vmem:[%s8790_s0 + $0x1e0] sm:$0x3]  ;;  %2181 = vst [vmem:[#allocation1 + $0x3c0] sm:$0xf] %v770_v26  ;;  %v7191_v43 = vld [vmem:[%s8790_s0 + $0x1c2] sm:$0xff]   ;;  %v7389_v45 = vld [vmem:[%s8790_s0 + $0x36] sm:$0xff]  }
  0x7f   :  { %5391 = vst.msk [vmem:[#allocation0 + $0x1a7] ss:$8 sm:$0x3] %vm4100_vm0, %v5388_v35   ;;  %v258_v40 = vunpack.c.l.bf16 %v7179_v38  ;;  %v7195_v44 = vld [vmem:[%s8790_s0 + $0x32] ss:$396 sps:$4 sm:$0xff]   ;;  %v450_v47 = vunpack.c.h.bf16 %v7191_v43  ;;  %v482_v48 = vunpack.c.l.bf16 %v7191_v43  ;;  %v7405_v50 = vld [vmem:[%s8790_s0 + $0x16] sm:$0xff]   ;;  %v3618_v53 = vunpack.c.h.bf16 %v7389_v45 }
  0x80   :  { %v5777_v46 = vld [vmem:[#allocation1 + $0x681] ss:$8 sm:$0xf0]   ;;  %197 = vst [vmem:[#allocation1 + $0x798] ss:$8 sps:$4 sm:$0xff] %v194_v36   ;;  %v514_v52 = vunpack.c.h.bf16 %v7195_v44  ;;  %s5567_s24 = smov 3  ;;  %v3650_v56 = vunpack.c.l.bf16 %v7389_v45  ;;  %v3682_v61 = vunpack.c.l.bf16 %v7195_v44  ;;  %v3874_v62 = vunpack.c.h.bf16 %v7405_v50 }
  0x81   :  { %229 = vst [vmem:[#allocation1 + $0x788] ss:$8 sps:$4 sm:$0xff] %v226_v37   ;;  %v5808_v49 = vld [vmem:[#allocation1 + $0x3] ss:$8 sm:$0xf]   ;;  %s5573_s29 = smov 3  ;;  %v3906_v2 = vunpack.c.l.bf16 %v7405_v50 }
  0x82   :  { %v5764_v51 = vld [vmem:[#allocation1 + $0x601] ss:$8 sm:$0xf]   ;;  %261 = vst [vmem:[#allocation1 + $0x780] sm:$0xf] %v258_v40  ;;  %s5579_s15 = smov 3 }
  0x83   :  { %405 = vst [vmem:[#allocation1 + $0x738] ss:$8 sps:$4 sm:$0xff] %v402_v41   ;;  %421 = vst [vmem:[#allocation1 + $0x728] ss:$8 sps:$4 sm:$0xff] %v418_v42   ;;  %v7357_v54 = vld [vmem:[%s8790_s0 + $0x76] sm:$0xff]   ;;  %s4673_s16 = smov 3  ;;  %v5768_v58 = vsel %vm5636_vm1, %v5766_v34, %v5764_v51 }
  0x84   :  { %453 = vst [vmem:[#allocation1 + $0x718] ss:$8 sps:$4 sm:$0xff] %v450_v47   ;;  %485 = vst [vmem:[#allocation1 + $0x708] ss:$8 sps:$4 sm:$0xff] %v482_v48   ;;  %v7372_v57 = vld [vmem:[%s8790_s0 + $0x58] sm:$0xff]   ;;  %s8201_s25 = smov 3  ;;  %v3106_v8 = vunpack.c.h.bf16 %v7357_v54  ;;  %v3138_v12 = vunpack.c.l.bf16 %v7357_v54 }
  0x85   :  { %v5810_v55 = vld [vmem:[#allocation1 + $0x3] ss:$8 sm:$0xf0]   ;;  %517 = vst [vmem:[#allocation1 + $0x6f8] ss:$8 sps:$4 sm:$0xff] %v514_v52   ;;  %v3346_v13 = vunpack.c.h.bf16 %v7372_v57  ;;  %v3378_v17 = vunpack.c.l.bf16 %v7372_v57  ;;  %s4685_s26 = smov 3 }
  0x86   :  { %v5819_v59 = vld [vmem:[#allocation1 + $0x83] ss:$8 sm:$0xf]   ;;  %3621 = vst [vmem:[#allocation1 + $0xe8] ss:$8 sps:$4 sm:$0xff] %v3618_v53   ;;  %v5812_v1 = vsel %vm5636_vm1, %v5810_v55, %v5808_v49  ;;  %s4691_s28 = smov 3 }
  0x87   :  { %v5821_v60 = vld [vmem:[#allocation1 + $0x83] ss:$8 sm:$0xf0]   ;;  %v5775_v63 = vld [vmem:[#allocation1 + $0x681] ss:$8 sm:$0xf]  }
  0x88   :  { %v5568_v0 = vld [vmem:[#allocation1 + $0x7a8] ss:$2 sm:%s5567_s24]   ;;  %3653 = vst [vmem:[#allocation1 + $0xd8] ss:$8 sps:$4 sm:$0xff] %v3650_v56   ;;  %v5779_v3 = vsel %vm5636_vm1, %v5777_v46, %v5775_v63  ;;  %v5580_v5 = vld [vmem:[#allocation1 + $0x7b8] ss:$2 sm:%s5579_s15]   ;;  %v5823_v6 = vsel %vm5636_vm1, %v5821_v60, %v5819_v59 }
  0x89   :  { %5571 = vst.msk [vmem:[#allocation0 + $0x1e5] ss:$8 sm:$0x3] %vm4100_vm0, %v5568_v0   ;;  %v5574_v4 = vld [vmem:[#allocation1 + $0x7b0] ss:$2 sm:%s5573_s29]   ;;  %v7704_v9 = vpack.i.bf16 %v5779_v3, %v5768_v58  ;;  %v7714_v20 = vpack.i.bf16 %v5823_v6, %v5812_v1  ;;  %s4787_s6 = smov 3 }
  0x8a   :  { %v4674_v7 = vld [vmem:[#allocation1 + $0x300] ss:$2 sm:%s4673_s16]   ;;  %3685 = vst [vmem:[#allocation1 + $0xc8] ss:$8 sps:$4 sm:$0xff] %v3682_v61   ;;  %3877 = vst [vmem:[#allocation1 + $0x68] ss:$8 sps:$4 sm:$0xff] %v3874_v62  }
  0x8b   :  { %5577 = vst.msk [vmem:[#allocation0 + $0x1e6] ss:$8 sm:$0x3] %vm4100_vm0, %v5574_v4   ;;  %5583 = vst.msk [vmem:[#allocation0 + $0x1e7] ss:$8 sm:$0x3] %vm4100_vm0, %v5580_v5   ;;  %7705 = vrot.lane.b32.xlu0 %v7704_v9, %s7834_s27 }
  0x8c   :  { %v5830_v10 = vld [vmem:[#allocation1 + $0x103] ss:$8 sm:$0xf]   ;;  %4677 = vst.msk [vmem:[#allocation0 + $0xc0] ss:$8 sm:$0x3] %vm4100_vm0, %v4674_v7  }
  0x8d   :  { %v5832_v11 = vld [vmem:[#allocation1 + $0x103] ss:$8 sm:$0xf0]   ;;  %3909 = vst [vmem:[#allocation1 + $0x58] ss:$8 sps:$4 sm:$0xff] %v3906_v2   ;;  %s4793_s7 = smov 3 }
  0x8e   :  { %v5544_v14 = vld [vmem:[#allocation1 + $0x788] ss:$2 sm:%s8179_s30]   ;;  %v5556_v16 = vld [vmem:[#allocation1 + $0x798] ss:$2 sm:%s8186_s12]   ;;  %3109 = vst [vmem:[#allocation1 + $0x1e8] ss:$8 sps:$4 sm:$0xff] %v3106_v8   ;;  %v5834_v28 = vsel %vm5636_vm1, %v5832_v11, %v5830_v10 }
  0x8f   :  { %v5550_v15 = vld [vmem:[#allocation1 + $0x790] ss:$2 sm:%s8181_s4]   ;;  %v5538_v18 = vld [vmem:[#allocation1 + $0x780] ss:$2 sm:%s8170_s10]   ;;  %3141 = vst [vmem:[#allocation1 + $0x1d8] ss:$8 sps:$4 sm:$0xff] %v3138_v12   ;;  %7715 = vrot.lane.b32.xlu0 %v7714_v20, %s7834_s27 }
  0x90   :  { %5547 = vst.msk [vmem:[#allocation0 + $0x1e1] ss:$8 sm:$0x3] %vm4100_vm0, %v5544_v14   ;;  %5553 = vst.msk [vmem:[#allocation0 + $0x1e2] ss:$8 sm:$0x3] %vm4100_vm0, %v5550_v15  }
  0x91   :  { %5559 = vst.msk [vmem:[#allocation0 + $0x1e3] ss:$8 sm:$0x3] %vm4100_vm0, %v5556_v16   ;;  %v5562_v19 = vld [vmem:[#allocation1 + $0x7a0] ss:$2 sm:%s8188_s21]   ;;  %v7324_v41 = vld [vmem:[%s8790_s0 + $0xb8] sm:$0xff]  }
  0x92   :  { %v4680_v21 = vld [vmem:[#allocation1 + $0x308] ss:$2 sm:%s8201_s25]   ;;  %3349 = vst [vmem:[#allocation1 + $0x170] ss:$8 sps:$4 sm:$0xff] %v3346_v13   ;;  %3381 = vst [vmem:[#allocation1 + $0x160] ss:$8 sps:$4 sm:$0xff] %v3378_v17   ;;  %v2578_v45 = vunpack.c.h.bf16 %v7324_v41  ;;  %v2610_v46 = vunpack.c.l.bf16 %v7324_v41 }
  0x93   :  { %5541 = vst.msk [vmem:[#allocation0 + $0x1e0] ss:$8 sm:$0x3] %vm4100_vm0, %v5538_v18   ;;  %5565 = vst.msk [vmem:[#allocation0 + $0x1e4] ss:$8 sm:$0x3] %vm4100_vm0, %v5562_v19  }
  0x94   :  { %v5788_v22 = vld [vmem:[#allocation1 + $0x701] ss:$8 sm:$0xf0]   ;;  %4683 = vst.msk [vmem:[#allocation0 + $0xc1] ss:$8 sm:$0x3] %vm4100_vm0, %v4680_v21  }
  0x95   :  { %v5797_v23 = vld [vmem:[#allocation1 + $0x781] ss:$8 sm:$0xf]   ;;  %v5841_v29 = vld [vmem:[#allocation1 + $0x183] ss:$8 sm:$0xf]  }
  0x96   :  { %v5786_v24 = vld [vmem:[#allocation1 + $0x701] ss:$8 sm:$0xf]   ;;  %v5843_v30 = vld [vmem:[#allocation1 + $0x183] ss:$8 sm:$0xf0]  }
  0x97   :  { %v5799_v25 = vld [vmem:[#allocation1 + $0x781] ss:$8 sm:$0xf0]   ;;  %v5790_v26 = vsel %vm5636_vm1, %v5788_v22, %v5786_v24  ;;  %v5845_v32 = vsel %vm5636_vm1, %v5843_v30, %v5841_v29  ;;  %v5852_v33 = vld [vmem:[#allocation1 + $0x203] ss:$8 sm:$0xf]  }
  0x98   :  { %v5801_v27 = vsel %vm5636_vm1, %v5799_v25, %v5797_v23  ;;  %v5854_v34 = vld [vmem:[#allocation1 + $0x203] ss:$8 sm:$0xf0]   ;;  %v7719_v38 = vpack.i.bf16 %v5845_v32, %v5834_v28  ;;  %v4686_v43 = vld [vmem:[#allocation1 + $0x310] ss:$2 sm:%s4685_s26]   ;;  %s4799_s10 = smov 3 }
  0x99   :  { %v7709_v31 = vpack.i.bf16 %v5801_v27, %v5790_v26  ;;  %v5856_v35 = vsel %vm5636_vm1, %v5854_v34, %v5852_v33  ;;  %v5863_v36 = vld [vmem:[#allocation1 + $0x283] ss:$8 sm:$0xf]   ;;  %v4692_v44 = vld [vmem:[#allocation1 + $0x318] ss:$2 sm:%s4691_s28]   ;;  %s4805_s9 = smov 3 }
  0x9a   :  { %v5865_v37 = vld [vmem:[#allocation1 + $0x283] ss:$8 sm:$0xf0]   ;;  %4689 = vst.msk [vmem:[#allocation0 + $0xc2] ss:$8 sm:$0x3] %vm4100_vm0, %v4686_v43  }
  0x9b   :  { %7710 = vrot.lane.b32.xlu1 %v7709_v31, %s7834_s27  ;;  %v5867_v39 = vsel %vm5636_vm1, %v5865_v37, %v5863_v36  ;;  %v5874_v40 = vld [vmem:[#allocation1 + $0x303] ss:$8 sm:$0xf]   ;;  %4695 = vst.msk [vmem:[#allocation0 + $0xc3] ss:$8 sm:$0x3] %vm4100_vm0, %v4692_v44  }
  0x9c   :  { %v7724_v42 = vpack.i.bf16 %v5867_v39, %v5856_v35  ;;  %v4788_v47 = vld [vmem:[#allocation1 + $0x398] ss:$2 sm:%s4787_s6]   ;;  %v4800_v49 = vld [vmem:[#allocation1 + $0x3a8] ss:$2 sm:%s4799_s10]   ;;  %s4811_s11 = smov 3  ;;  %s5153_s13 = smov 3 }
  0x9d   :  { %v4794_v48 = vld [vmem:[#allocation1 + $0x3a0] ss:$2 sm:%s4793_s7]   ;;  %4791 = vst.msk [vmem:[#allocation0 + $0xe3] ss:$8 sm:$0x3] %vm4100_vm0, %v4788_v47   ;;  %s5159_s14 = smov 3 }
  0x9e   :  { %7725 = vrot.lane.b32.xlu0 %v7724_v42, %s7834_s27  ;;  %4797 = vst.msk [vmem:[#allocation0 + $0xe4] ss:$8 sm:$0x3] %vm4100_vm0, %v4794_v48   ;;  %v5876_v50 = vld [vmem:[#allocation1 + $0x303] ss:$8 sm:$0xf0]  }
  0x9f   :  { %2581 = vst [vmem:[#allocation1 + $0x2f0] ss:$8 sps:$4 sm:$0xff] %v2578_v45   ;;  %2613 = vst [vmem:[#allocation1 + $0x2e0] ss:$8 sps:$4 sm:$0xff] %v2610_v46   ;;  %7720 = vrot.lane.b32.xlu1 %v7719_v38, %s7834_s27  ;;  %v5878_v51 = vsel %vm5636_vm1, %v5876_v50, %v5874_v40  ;;  %v4806_v55 = vld [vmem:[#allocation1 + $0x3b0] ss:$2 sm:%s4805_s9]  }
  0xa0   :  { %4803 = vst.msk [vmem:[#allocation0 + $0xe5] ss:$8 sm:$0x3] %vm4100_vm0, %v4800_v49   ;;  %v5885_v52 = vld [vmem:[#allocation1 + $0x383] ss:$8 sm:$0xf]  }
  0xa1   :  { %v5887_v53 = vld [vmem:[#allocation1 + $0x383] ss:$8 sm:$0xf0]   ;;  %v4812_v56 = vld [vmem:[#allocation1 + $0x3b8] ss:$2 sm:%s4811_s11]   ;;  %s5165_s30 = smov 3 }
  0xa2   :  { %v5889_v54 = vsel %vm5636_vm1, %v5887_v53, %v5885_v52  ;;  %4809 = vst.msk [vmem:[#allocation0 + $0xe6] ss:$8 sm:$0x3] %vm4100_vm0, %v4806_v55   ;;  %4815 = vst.msk [vmem:[#allocation0 + $0xe7] ss:$8 sm:$0x3] %vm4100_vm0, %v4812_v56  }
  0xa3   :  { %v7729_v57 = vpack.i.bf16 %v5889_v54, %v5878_v51  ;;  %v5896_v58 = vld [vmem:[#allocation1 + $0x403] ss:$8 sm:$0xf]   ;;  %v5154_v0 = vld [vmem:[#allocation1 + $0x580] ss:$2 sm:%s5153_s13]   ;;  %s5171_s4 = smov 3 }
  0xa4   :  { %v5898_v59 = vld [vmem:[#allocation1 + $0x403] ss:$8 sm:$0xf0]   ;;  %v5160_v1 = vld [vmem:[#allocation1 + $0x588] ss:$2 sm:%s5159_s14]   ;;  %s5177_s17 = smov 3 }
  0xa5   :  { %v5900_v60 = vsel %vm5636_vm1, %v5898_v59, %v5896_v58  ;;  %v5907_v61 = vld [vmem:[#allocation1 + $0x483] ss:$8 sm:$0xf]   ;;  %7730 = vrot.lane.b32.xlu1 %v7729_v57, %s7834_s27  ;;  %5157 = vst.msk [vmem:[#allocation0 + $0x160] ss:$8 sm:$0x3] %vm4100_vm0, %v5154_v0  }
  0xa6   :  { %v5909_v62 = vld [vmem:[#allocation1 + $0x483] ss:$8 sm:$0xf0]   ;;  %5163 = vst.msk [vmem:[#allocation0 + $0x161] ss:$8 sm:$0x3] %vm4100_vm0, %v5160_v1  }
  0xa7   :  { %v5911_v63 = vsel %vm5636_vm1, %v5909_v62, %v5907_v61  ;;  %v5166_v3 = vld [vmem:[#allocation1 + $0x590] ss:$2 sm:%s5165_s30]   ;;  %s5183_s18 = smov 3  ;;  %v5178_v5 = vld [vmem:[#allocation1 + $0x5a0] ss:$2 sm:%s5177_s17]   ;;  %s5189_s12 = smov 3 }
  0xa8   :  { %v7734_v2 = vpack.i.bf16 %v5911_v63, %v5900_v60  ;;  %v5172_v4 = vld [vmem:[#allocation1 + $0x598] ss:$2 sm:%s5171_s4]   ;;  %5169 = vst.msk [vmem:[#allocation0 + $0x162] ss:$8 sm:$0x3] %vm4100_vm0, %v5166_v3   ;;  %s5249_s21 = smov 3 }
  0xa9   :  { %5175 = vst.msk [vmem:[#allocation0 + $0x163] ss:$8 sm:$0x3] %vm4100_vm0, %v5172_v4   ;;  %v5184_v6 = vld [vmem:[#allocation1 + $0x5a8] ss:$2 sm:%s5183_s18]   ;;  %s5255_s22 = smov 3 }
  0xaa   :  { %7735 = vrot.lane.b32.xlu0 %v7734_v2, %s7834_s27  ;;  %5181 = vst.msk [vmem:[#allocation0 + $0x164] ss:$8 sm:$0x3] %vm4100_vm0, %v5178_v5   ;;  %5187 = vst.msk [vmem:[#allocation0 + $0x165] ss:$8 sm:$0x3] %vm4100_vm0, %v5184_v6  }
  0xab   :  { %v5918_v7 = vld [vmem:[#allocation1 + $0x503] ss:$8 sm:$0xf]   ;;  %v5190_v13 = vld [vmem:[#allocation1 + $0x5b0] ss:$2 sm:%s5189_s12]   ;;  %s5261_s23 = smov 3 }
  0xac   :  { %v5920_v8 = vld [vmem:[#allocation1 + $0x503] ss:$8 sm:$0xf0]   ;;  %v5250_v14 = vld [vmem:[#allocation1 + $0x600] ss:$2 sm:%s5249_s21]   ;;  %s5267_s24 = smov 3 }
  0xad   :  { %v5922_v9 = vsel %vm5636_vm1, %v5920_v8, %v5918_v7  ;;  %v5929_v10 = vld [vmem:[#allocation1 + $0x583] ss:$8 sm:$0xf]   ;;  %5193 = vst.msk [vmem:[#allocation0 + $0x166] ss:$8 sm:$0x3] %vm4100_vm0, %v5190_v13  }
  0xae   :  { %v5931_v11 = vld [vmem:[#allocation1 + $0x583] ss:$8 sm:$0xf0]   ;;  %5253 = vst.msk [vmem:[#allocation0 + $0x180] ss:$8 sm:$0x3] %vm4100_vm0, %v5250_v14  }
  0xaf   :  { %v5933_v12 = vsel %vm5636_vm1, %v5931_v11, %v5929_v10  ;;  %v5256_v16 = vld [vmem:[#allocation1 + $0x608] ss:$2 sm:%s5255_s22]   ;;  %s5273_s29 = smov 3  ;;  %v5268_v18 = vld [vmem:[#allocation1 + $0x618] ss:$2 sm:%s5267_s24]   ;;  %s5279_s5 = smov 3 }
  0xb0   :  { %v7739_v15 = vpack.i.bf16 %v5933_v12, %v5922_v9  ;;  %v5262_v17 = vld [vmem:[#allocation1 + $0x610] ss:$2 sm:%s5261_s23]   ;;  %5259 = vst.msk [vmem:[#allocation0 + $0x181] ss:$8 sm:$0x3] %vm4100_vm0, %v5256_v16   ;;  %s5285_s8 = smov 3 }
  0xb1   :  { %5265 = vst.msk [vmem:[#allocation0 + $0x182] ss:$8 sm:$0x3] %vm4100_vm0, %v5262_v17   ;;  %v5274_v19 = vld [vmem:[#allocation1 + $0x620] ss:$2 sm:%s5273_s29]   ;;  %s5291_s15 = smov 3 }
  0xb2   :  { %7740 = vrot.lane.b32.xlu1 %v7739_v15, %s7834_s27  ;;  %5271 = vst.msk [vmem:[#allocation0 + $0x183] ss:$8 sm:$0x3] %vm4100_vm0, %v5268_v18   ;;  %5277 = vst.msk [vmem:[#allocation0 + $0x184] ss:$8 sm:$0x3] %vm4100_vm0, %v5274_v19  }
  0xb3   :  { %v5280_v20 = vld [vmem:[#allocation1 + $0x628] ss:$2 sm:%s5279_s5]   ;;  %s5345_s16 = smov 3  ;;  %v5292_v22 = vld [vmem:[#allocation1 + $0x638] ss:$2 sm:%s5291_s15]   ;;  %s5351_s19 = smov 3 }
  0xb4   :  { %v5286_v21 = vld [vmem:[#allocation1 + $0x630] ss:$2 sm:%s5285_s8]   ;;  %5283 = vst.msk [vmem:[#allocation0 + $0x185] ss:$8 sm:$0x3] %vm4100_vm0, %v5280_v20   ;;  %s5357_s20 = smov 3 }
  0xb5   :  { %5289 = vst.msk [vmem:[#allocation0 + $0x186] ss:$8 sm:$0x3] %vm4100_vm0, %v5286_v21   ;;  %v5346_v23 = vld [vmem:[#allocation1 + $0x680] ss:$2 sm:%s5345_s16]   ;;  %s5435_s25 = smov 3 }
  0xb6   :  { %5295 = vst.msk [vmem:[#allocation0 + $0x187] ss:$8 sm:$0x3] %vm4100_vm0, %v5292_v22   ;;  %5349 = vst.msk [vmem:[#allocation0 + $0x1a0] ss:$8 sm:$0x3] %vm4100_vm0, %v5346_v23  }
  0xb7   :  { %v5352_v24 = vld [vmem:[#allocation1 + $0x688] ss:$2 sm:%s5351_s19]   ;;  %s5441_s26 = smov 3  ;;  %v5940_v26 = vld [vmem:[#allocation1 + $0x603] ss:$8 sm:$0xf]  }
  0xb8   :  { %v5358_v25 = vld [vmem:[#allocation1 + $0x690] ss:$2 sm:%s5357_s20]   ;;  %5355 = vst.msk [vmem:[#allocation0 + $0x1a1] ss:$8 sm:$0x3] %vm4100_vm0, %v5352_v24   ;;  %s5447_s28 = smov 3 }
  0xb9   :  { %5361 = vst.msk [vmem:[#allocation0 + $0x1a2] ss:$8 sm:$0x3] %vm4100_vm0, %v5358_v25   ;;  %v5942_v27 = vld [vmem:[#allocation1 + $0x603] ss:$8 sm:$0xf0]  }
  0xba   :  { %v5944_v28 = vsel %vm5636_vm1, %v5942_v27, %v5940_v26  ;;  %v5951_v29 = vld [vmem:[#allocation1 + $0x683] ss:$8 sm:$0xf]   ;;  %v5436_v32 = vld [vmem:[#allocation1 + $0x6f8] ss:$2 sm:%s5435_s25]   ;;  %s5453_s2 = smov 3 }
  0xbb   :  { %v5953_v30 = vld [vmem:[#allocation1 + $0x683] ss:$8 sm:$0xf0]   ;;  %v5442_v33 = vld [vmem:[#allocation1 + $0x700] ss:$2 sm:%s5441_s26]   ;;  %s5459_s3 = smov 3 }
  0xbc   :  { %v5955_v31 = vsel %vm5636_vm1, %v5953_v30, %v5951_v29  ;;  %5439 = vst.msk [vmem:[#allocation0 + $0x1b7] ss:$8 sm:$0x3] %vm4100_vm0, %v5436_v32   ;;  %5445 = vst.msk [vmem:[#allocation0 + $0x1c0] ss:$8 sm:$0x3] %vm4100_vm0, %v5442_v33  }
  0xbd   :  { %v7744_v34 = vpack.i.bf16 %v5955_v31, %v5944_v28  ;;  %v5448_v35 = vld [vmem:[#allocation1 + $0x708] ss:$2 sm:%s5447_s28]   ;;  %s5465_s6 = smov 3  ;;  %v5460_v37 = vld [vmem:[#allocation1 + $0x718] ss:$2 sm:%s5459_s3]   ;;  %s5471_s7 = smov 3 }
  0xbe   :  { %v5454_v36 = vld [vmem:[#allocation1 + $0x710] ss:$2 sm:%s5453_s2]   ;;  %5451 = vst.msk [vmem:[#allocation0 + $0x1c1] ss:$8 sm:$0x3] %vm4100_vm0, %v5448_v35   ;;  %s5477_s10 = smov 3 }
  0xbf   :  { %5457 = vst.msk [vmem:[#allocation0 + $0x1c2] ss:$8 sm:$0x3] %vm4100_vm0, %v5454_v36   ;;  %v5466_v38 = vld [vmem:[#allocation1 + $0x720] ss:$2 sm:%s5465_s6]   ;;  %7745 = vrot.lane.b32.xlu0 %v7744_v34, %s7834_s27  ;;  %s5483_s9 = smov 3 }
  0xc0   :  { %5463 = vst.msk [vmem:[#allocation0 + $0x1c3] ss:$8 sm:$0x3] %vm4100_vm0, %v5460_v37   ;;  %5469 = vst.msk [vmem:[#allocation0 + $0x1c4] ss:$8 sm:$0x3] %vm4100_vm0, %v5466_v38  }
  0xc1   :  { %v5472_v39 = vld [vmem:[#allocation1 + $0x728] ss:$2 sm:%s5471_s7]   ;;  %s4163_s11 = smov 3  ;;  %v5484_v41 = vld [vmem:[#allocation1 + $0x738] ss:$2 sm:%s5483_s9]   ;;  %s4169_s13 = smov 3 }
  0xc2   :  { %v5478_v40 = vld [vmem:[#allocation1 + $0x730] ss:$2 sm:%s5477_s10]   ;;  %5475 = vst.msk [vmem:[#allocation0 + $0x1c5] ss:$8 sm:$0x3] %vm4100_vm0, %v5472_v39   ;;  %s4175_s4 = smov 3 }
  0xc3   :  { %5481 = vst.msk [vmem:[#allocation0 + $0x1c6] ss:$8 sm:$0x3] %vm4100_vm0, %v5478_v40   ;;  %v5962_v42 = vld [vmem:[#allocation1 + $0x703] ss:$8 sm:$0xf]  }
  0xc4   :  { %5487 = vst.msk [vmem:[#allocation0 + $0x1c7] ss:$8 sm:$0x3] %vm4100_vm0, %v5484_v41   ;;  %v5964_v43 = vld [vmem:[#allocation1 + $0x703] ss:$8 sm:$0xf0]  }
  0xc5   :  { %v5973_v44 = vld [vmem:[#allocation1 + $0x783] ss:$8 sm:$0xf]   ;;  %v5966_v45 = vsel %vm5636_vm1, %v5964_v43, %v5962_v42  ;;  %v4164_v50 = vld [vmem:[#allocation1 + $0x58] ss:$2 sm:%s4163_s11]   ;;  %s4181_s17 = smov 3 }
  0xc6   :  { %v5975_v46 = vld [vmem:[#allocation1 + $0x783] ss:$8 sm:$0xf0]   ;;  %v4170_v51 = vld [vmem:[#allocation1 + $0x60] ss:$2 sm:%s4169_s13]   ;;  %s4241_s18 = smov 3 }
  0xc7   :  { %v7409_v47 = vld [vmem:[%s8790_s0 + $0x12] sm:$0xf]   ;;  %v5977_v48 = vsel %vm5636_vm1, %v5975_v46, %v5973_v44  ;;  %4167 = vst.msk [vmem:[#allocation0 + $0x13] ss:$8 sm:$0x3] %vm4100_vm0, %v4164_v50   ;;  %v7341_v54 = vld [vmem:[%s8790_s0 + $0x96] sm:$0xff]  }
  0xc8   :  { %v3938_v49 = vunpack.c.l.bf16 %v7409_v47  ;;  %v4176_v52 = vld [vmem:[#allocation1 + $0x68] ss:$2 sm:%s4175_s4]   ;;  %v7749_v53 = vpack.i.bf16 %v5977_v48, %v5966_v45  ;;  %4173 = vst.msk [vmem:[#allocation0 + $0x14] ss:$8 sm:$0x3] %vm4100_vm0, %v4170_v51   ;;  %s4247_s22 = smov 3  ;;  %v2850_v57 = vunpack.c.h.bf16 %v7341_v54  ;;  %v2882_v58 = vunpack.c.l.bf16 %v7341_v54 }
  0xc9   :  { %4179 = vst.msk [vmem:[#allocation0 + $0x15] ss:$8 sm:$0x3] %vm4100_vm0, %v4176_v52   ;;  %v4182_v55 = vld [vmem:[#allocation1 + $0x70] ss:$2 sm:%s4181_s17]   ;;  %s4253_s23 = smov 3 }
  0xca   :  { %3941 = vst [vmem:[#allocation1 + $0x48] ss:$8 sps:$4 sm:$0xff] %v3938_v49   ;;  %v4242_v56 = vld [vmem:[#allocation1 + $0xc0] ss:$2 sm:%s4241_s18]   ;;  %7750 = vrot.lane.b32.xlu1 %v7749_v53, %s7834_s27  ;;  %v4254_v60 = vld [vmem:[#allocation1 + $0xd0] ss:$2 sm:%s4253_s23]  }
  0xcb   :  { %4185 = vst.msk [vmem:[#allocation0 + $0x16] ss:$8 sm:$0x3] %vm4100_vm0, %v4182_v55   ;;  %4245 = vst.msk [vmem:[#allocation0 + $0x30] ss:$8 sm:$0x3] %vm4100_vm0, %v4242_v56  }
  0xcc   :  { %v4248_v59 = vld [vmem:[#allocation1 + $0xc8] ss:$2 sm:%s4247_s22]   ;;  %4257 = vst.msk [vmem:[#allocation0 + $0x32] ss:$8 sm:$0x3] %vm4100_vm0, %v4254_v60   ;;  %s8307_s19 = smov 3 }
  0xcd   :  { %v7361_v61 = vld [vmem:[%s8790_s0 + $0x72] sm:$0xf]   ;;  %4251 = vst.msk [vmem:[#allocation0 + $0x31] ss:$8 sm:$0x3] %vm4100_vm0, %v4248_v59   ;;  %s8309_s20 = smov 3 }
  0xce   :  { %v5995_v62 = vld [vmem:[#allocation1 + $0xc1] ss:$8 sm:$0xf]   ;;  %v3170_v0 = vunpack.c.l.bf16 %v7361_v61  ;;  %2853 = vst [vmem:[#allocation1 + $0x268] ss:$8 sps:$4 sm:$0xff] %v2850_v57   ;;  %s8311_s25 = smov 3 }
  0xcf   :  { %v5997_v63 = vld [vmem:[#allocation1 + $0xc1] ss:$8 sm:$0xf0]   ;;  %2885 = vst [vmem:[#allocation1 + $0x258] ss:$8 sps:$4 sm:$0xff] %v2882_v58   ;;  %s8316_s2 = smov 3 }
  0xd0   :  { %v5999_v1 = vsel %vm5636_vm1, %v5997_v63, %v5995_v62  ;;  %v7363_v2 = vld [vmem:[%s8790_s0 + $0x52] ss:$30 sps:$2 sm:$0xf]   ;;  %v7376_v3 = vld [vmem:[%s8790_s0 + $0x54] sm:$0xf]   ;;  %v7292_v6 = vld [vmem:[%s8790_s0 + $0xf8] sm:$0xff]  }
  0xd1   :  { %3173 = vst [vmem:[#allocation1 + $0x1c8] ss:$8 sps:$4 sm:$0xff] %v3170_v0   ;;  %v3202_v4 = vunpack.c.l.bf16 %v7363_v2  ;;  %v3410_v5 = vunpack.c.l.bf16 %v7376_v3  ;;  %v5986_v7 = vld [vmem:[#allocation1 + $0x41] ss:$8 sm:$0xf0]   ;;  %s4361_s3 = smov 3  ;;  %v2066_v8 = vunpack.c.h.bf16 %v7292_v6  ;;  %v2098_v9 = vunpack.c.l.bf16 %v7292_v6 }
  0xd2   :  { %v7308_v10 = vld [vmem:[%s8790_s0 + $0xd8] sm:$0xff]   ;;  %v4362_v11 = vld [vmem:[#allocation1 + $0x160] ss:$2 sm:%s4361_s3]   ;;  %s4367_s10 = smov 3  ;;  %s4373_s9 = smov 3  ;;  %v7312_v26 = vld [vmem:[%s8790_s0 + $0xd0] sm:$0xff]  }
  0xd3   :  { %3205 = vst [vmem:[#allocation1 + $0x148] ss:$120 sps:$4 sm:$0xff] %v3202_v4   ;;  %3413 = vst [vmem:[#allocation1 + $0x150] ss:$8 sps:$4 sm:$0xff] %v3410_v5   ;;  %v7328_v12 = vld [vmem:[%s8790_s0 + $0xb4] sm:$0xf]   ;;  %v2322_v13 = vunpack.c.h.bf16 %v7308_v10  ;;  %v2354_v14 = vunpack.c.l.bf16 %v7308_v10  ;;  %v2386_v32 = vunpack.c.h.bf16 %v7312_v26  ;;  %v2418_v33 = vunpack.c.l.bf16 %v7312_v26 }
  0xd4   :  { %v5984_v15 = vld [vmem:[#allocation1 + $0x41] ss:$8 sm:$0xf]   ;;  %4365 = vst.msk [vmem:[#allocation0 + $0x54] ss:$8 sm:$0x3] %vm4100_vm0, %v4362_v11   ;;  %v2642_v17 = vunpack.c.l.bf16 %v7328_v12 }
  0xd5   :  { %v4368_v16 = vld [vmem:[#allocation1 + $0x168] ss:$2 sm:%s4367_s10]   ;;  %s4379_s14 = smov 3  ;;  %2069 = vst [vmem:[#allocation1 + $0x3f0] ss:$8 sps:$4 sm:$0xff] %v2066_v8   ;;  %v5988_v18 = vsel %vm5636_vm1, %v5986_v7, %v5984_v15  ;;  %s8327_s30 = smov 3 }
  0xd6   :  { %2101 = vst [vmem:[#allocation1 + $0x3e0] ss:$8 sps:$4 sm:$0xff] %v2098_v9   ;;  %4371 = vst.msk [vmem:[#allocation0 + $0x55] ss:$8 sm:$0x3] %vm4100_vm0, %v4368_v16   ;;  %s8329_s4 = smov 3  ;;  %v7754_v21 = vpack.i.bf16 %v5999_v1, %v5988_v18 }
  0xd7   :  { %v4374_v19 = vld [vmem:[#allocation1 + $0x170] ss:$2 sm:%s4373_s9]   ;;  %2325 = vst [vmem:[#allocation1 + $0x370] ss:$8 sps:$4 sm:$0xff] %v2322_v13   ;;  %2357 = vst [vmem:[#allocation1 + $0x360] ss:$8 sps:$4 sm:$0xff] %v2354_v14  }
  0xd8   :  { %v4380_v20 = vld [vmem:[#allocation1 + $0x178] ss:$2 sm:%s4379_s14]   ;;  %4377 = vst.msk [vmem:[#allocation0 + $0x56] ss:$8 sm:$0x3] %vm4100_vm0, %v4374_v19   ;;  %s4439_s17 = smov 3  ;;  %7755 = vrot.lane.b32.xlu0 %v7754_v21, %s7834_s27 }
  0xd9   :  { %4383 = vst.msk [vmem:[#allocation0 + $0x57] ss:$8 sm:$0x3] %vm4100_vm0, %v4380_v20   ;;  %s4445_s18 = smov 3  ;;  %2645 = vst [vmem:[#allocation1 + $0x2d0] ss:$8 sps:$4 sm:$0xff] %v2642_v17  }
  0xda   :  { %v7330_v22 = vld [vmem:[%s8790_s0 + $0xb2] sm:$0x3]  ;;  %s4553_s24 = smov 3  ;;  %s4559_s29 = smov 3  ;;  %v7296_v35 = vld [vmem:[%s8790_s0 + $0xf4] sm:$0xf]  }
  0xdb   :  { %v7345_v23 = vld [vmem:[%s8790_s0 + $0x92] sm:$0xf]   ;;  %v2674_v24 = vunpack.c.l.bf16 %v7330_v22  ;;  %v6008_v29 = vld [vmem:[#allocation1 + $0x141] ss:$8 sm:$0xf0]   ;;  %s4565_s15 = smov 3  ;;  %v2130_v39 = vunpack.c.l.bf16 %v7296_v35  ;;  %v8414_v22 = vpop.permute.xlu0 %7675 }
  0xdc   :  { %v2914_v25 = vunpack.c.l.bf16 %v7345_v23  ;;  %v4440_v27 = vld [vmem:[#allocation1 + $0x1c8] ss:$2 sm:%s4439_s17]   ;;  %v6019_v30 = vld [vmem:[#allocation1 + $0x1c1] ss:$8 sm:$0xf0]   ;;  %s8346_s16 = smov 3 }
  0xdd   :  { %v4446_v28 = vld [vmem:[#allocation1 + $0x1d0] ss:$2 sm:%s4445_s18]   ;;  %v4554_v31 = vld [vmem:[#allocation1 + $0x260] ss:$2 sm:%s4553_s24]   ;;  %2677 = vst [vmem:[#allocation1 + $0x2c8] sm:$0xf] %v2674_v24 }
  0xde   :  { %4443 = vst.msk [vmem:[#allocation0 + $0x71] ss:$8 sm:$0x3] %vm4100_vm0, %v4440_v27   ;;  %4449 = vst.msk [vmem:[#allocation0 + $0x72] ss:$8 sm:$0x3] %vm4100_vm0, %v4446_v28  }
  0xdf   :  { %2917 = vst [vmem:[#allocation1 + $0x248] ss:$8 sps:$4 sm:$0xff] %v2914_v25   ;;  %4557 = vst.msk [vmem:[#allocation0 + $0x94] ss:$8 sm:$0x3] %vm4100_vm0, %v4554_v31   ;;  %s4643_s3 = smov 3 }
  0xe0   :  { %v4560_v34 = vld [vmem:[#allocation1 + $0x268] ss:$2 sm:%s4559_s29]   ;;  %2389 = vst [vmem:[#allocation1 + $0x350] ss:$8 sps:$4 sm:$0xff] %v2386_v32   ;;  %2421 = vst [vmem:[#allocation1 + $0x340] ss:$8 sps:$4 sm:$0xff] %v2418_v33  }
  0xe1   :  { %v4338_v36 = vld [vmem:[#allocation1 + $0x140] ss:$2 sm:%s8307_s19]   ;;  %v4350_v38 = vld [vmem:[#allocation1 + $0x150] ss:$2 sm:%s8311_s25]   ;;  %2133 = vst [vmem:[#allocation1 + $0x3d0] ss:$8 sps:$4 sm:$0xff] %v2130_v39  }
  0xe2   :  { %v4344_v37 = vld [vmem:[#allocation1 + $0x148] ss:$2 sm:%s8309_s20]   ;;  %4563 = vst.msk [vmem:[#allocation0 + $0x95] ss:$8 sm:$0x3] %vm4100_vm0, %v4560_v34   ;;  %s4631_s19 = smov 3 }
  0xe3   :  { %4341 = vst.msk [vmem:[#allocation0 + $0x50] ss:$8 sm:$0x3] %vm4100_vm0, %v4338_v36   ;;  %4347 = vst.msk [vmem:[#allocation0 + $0x51] ss:$8 sm:$0x3] %vm4100_vm0, %v4344_v37  }
  0xe4   :  { %4353 = vst.msk [vmem:[#allocation0 + $0x52] ss:$8 sm:$0x3] %vm4100_vm0, %v4350_v38   ;;  %v4356_v40 = vld [vmem:[#allocation1 + $0x158] ss:$2 sm:%s8316_s2]   ;;  %s4637_s20 = smov 3 }
  0xe5   :  { %v4428_v41 = vld [vmem:[#allocation1 + $0x1b8] ss:$2 sm:%s8327_s30]   ;;  %4359 = vst.msk [vmem:[#allocation0 + $0x53] ss:$8 sm:$0x3] %vm4100_vm0, %v4356_v40   ;;  %s4715_s6 = smov 3 }
  0xe6   :  { %v4434_v42 = vld [vmem:[#allocation1 + $0x1c0] ss:$2 sm:%s8329_s4]   ;;  %4431 = vst.msk [vmem:[#allocation0 + $0x67] ss:$8 sm:$0x3] %vm4100_vm0, %v4428_v41   ;;  %s4721_s7 = smov 3 }
  0xe7   :  { %4437 = vst.msk [vmem:[#allocation0 + $0x70] ss:$8 sm:$0x3] %vm4100_vm0, %v4434_v42   ;;  %v6006_v43 = vld [vmem:[#allocation1 + $0x141] ss:$8 sm:$0xf]  }
  0xe8   :  { %v6017_v44 = vld [vmem:[#allocation1 + $0x1c1] ss:$8 sm:$0xf]   ;;  %v6010_v45 = vsel %vm5636_vm1, %v6008_v29, %v6006_v43  ;;  %v4566_v47 = vld [vmem:[#allocation1 + $0x270] ss:$2 sm:%s4565_s15]   ;;  %s4727_s14 = smov 3 }
  0xe9   :  { %v6021_v46 = vsel %vm5636_vm1, %v6019_v30, %v6017_v44  ;;  %v6030_v48 = vld [vmem:[#allocation1 + $0x241] ss:$8 sm:$0xf0]   ;;  %v7298_v49 = vld [vmem:[%s8790_s0 + $0xf2] sm:$0x3]  ;;  %s4733_s30 = smov 3 }
  0xea   :  { %v7759_v50 = vpack.i.bf16 %v6021_v46, %v6010_v45  ;;  %4569 = vst.msk [vmem:[#allocation0 + $0x96] ss:$8 sm:$0x3] %vm4100_vm0, %v4566_v47   ;;  %v4638_v51 = vld [vmem:[#allocation1 + $0x2d0] ss:$2 sm:%s4637_s20]   ;;  %v2162_v53 = vunpack.c.l.bf16 %v7298_v49  ;;  %s4739_s4 = smov 3 }
  0xeb   :  { %v6041_v52 = vld [vmem:[#allocation1 + $0x2c1] ss:$8 sm:$0xf0]   ;;  %4641 = vst.msk [vmem:[#allocation0 + $0xb2] ss:$8 sm:$0x3] %vm4100_vm0, %v4638_v51  }
  0xec   :  { %v4644_v54 = vld [vmem:[#allocation1 + $0x2d8] ss:$2 sm:%s4643_s3]   ;;  %v7264_v56 = vld [vmem:[%s8790_s0 + $0x130] sm:$0xff]   ;;  %7760 = vrot.lane.b32.xlu1 %v7759_v50, %s7834_s27  ;;  %2165 = vst [vmem:[#allocation1 + $0x3c8] sm:$0xf] %v2162_v53  ;;  %s8397_s22 = smov 3 }
  0xed   :  { %v7260_v55 = vld [vmem:[%s8790_s0 + $0x138] sm:$0xff]   ;;  %v4626_v57 = vld [vmem:[#allocation1 + $0x2c0] ss:$2 sm:%s8346_s16]   ;;  %4647 = vst.msk [vmem:[#allocation0 + $0xb3] ss:$8 sm:$0x3] %vm4100_vm0, %v4644_v54   ;;  %v1618_v63 = vunpack.c.h.bf16 %v7264_v56  ;;  %v1650_v0 = vunpack.c.l.bf16 %v7264_v56 }
  0xee   :  { %v4632_v58 = vld [vmem:[#allocation1 + $0x2c8] ss:$2 sm:%s4631_s19]   ;;  %v1554_v59 = vunpack.c.h.bf16 %v7260_v55  ;;  %v1586_v60 = vunpack.c.l.bf16 %v7260_v55  ;;  %4629 = vst.msk [vmem:[#allocation0 + $0xb0] ss:$8 sm:$0x3] %vm4100_vm0, %v4626_v57   ;;  %v7276_v11 = vld [vmem:[%s8790_s0 + $0x118] sm:$0xff]  }
  0xef   :  { %4635 = vst.msk [vmem:[#allocation0 + $0xb1] ss:$8 sm:$0x3] %vm4100_vm0, %v4632_v58   ;;  %v6028_v61 = vld [vmem:[#allocation1 + $0x241] ss:$8 sm:$0xf]   ;;  %v1810_v14 = vunpack.c.h.bf16 %v7276_v11  ;;  %v1842_v15 = vunpack.c.l.bf16 %v7276_v11 }
  0xf0   :  { %v6039_v62 = vld [vmem:[#allocation1 + $0x2c1] ss:$8 sm:$0xf]   ;;  %v6032_v1 = vsel %vm5636_vm1, %v6030_v48, %v6028_v61  ;;  %v4716_v3 = vld [vmem:[#allocation1 + $0x338] ss:$2 sm:%s4715_s6]   ;;  %s8399_s23 = smov 3 }
  0xf1   :  { %v6043_v2 = vsel %vm5636_vm1, %v6041_v52, %v6039_v62  ;;  %v4722_v4 = vld [vmem:[#allocation1 + $0x340] ss:$2 sm:%s4721_s7]   ;;  %1557 = vst [vmem:[#allocation1 + $0x4f0] ss:$8 sps:$4 sm:$0xff] %v1554_v59   ;;  %1589 = vst [vmem:[#allocation1 + $0x4e0] ss:$8 sps:$4 sm:$0xff] %v1586_v60  }
  0xf2   :  { %v4728_v5 = vld [vmem:[#allocation1 + $0x348] ss:$2 sm:%s4727_s14]   ;;  %v7764_v6 = vpack.i.bf16 %v6043_v2, %v6032_v1  ;;  %4719 = vst.msk [vmem:[#allocation0 + $0xc7] ss:$8 sm:$0x3] %vm4100_vm0, %v4716_v3   ;;  %s8401_s24 = smov 3 }
  0xf3   :  { %4725 = vst.msk [vmem:[#allocation0 + $0xd0] ss:$8 sm:$0x3] %vm4100_vm0, %v4722_v4   ;;  %4731 = vst.msk [vmem:[#allocation0 + $0xd1] ss:$8 sm:$0x3] %vm4100_vm0, %v4728_v5  }
  0xf4   :  { %v4734_v7 = vld [vmem:[#allocation1 + $0x350] ss:$2 sm:%s4733_s30]   ;;  %v6050_v8 = vld [vmem:[#allocation1 + $0x341] ss:$8 sm:$0xf]   ;;  %7765 = vrot.lane.b32.xlu0 %v7764_v6, %s7834_s27  ;;  %s8403_s29 = smov 3  ;;  %v8481_v6 = vpop.permute.xlu1 %7685 }
  0xf5   :  { %1621 = vst [vmem:[#allocation1 + $0x4d0] ss:$8 sps:$4 sm:$0xff] %v1618_v63   ;;  %1653 = vst [vmem:[#allocation1 + $0x4c0] ss:$8 sps:$4 sm:$0xff] %v1650_v0   ;;  %v4740_v9 = vld [vmem:[#allocation1 + $0x358] ss:$2 sm:%s4739_s4]  }
  0xf6   :  { %4737 = vst.msk [vmem:[#allocation0 + $0xd2] ss:$8 sm:$0x3] %vm4100_vm0, %v4734_v7   ;;  %v6052_v10 = vld [vmem:[#allocation1 + $0x341] ss:$8 sm:$0xf0]  }
  0xf7   :  { %4743 = vst.msk [vmem:[#allocation0 + $0xd3] ss:$8 sm:$0x3] %vm4100_vm0, %v4740_v9   ;;  %v6054_v12 = vsel %vm5636_vm1, %v6052_v10, %v6050_v8  ;;  %v6063_v13 = vld [vmem:[#allocation1 + $0x3c1] ss:$8 sm:$0xf0]  }
  0xf8   :  { %v7280_v16 = vld [vmem:[%s8790_s0 + $0x110] sm:$0xff]   ;;  %v7228_v19 = vld [vmem:[%s8790_s0 + $0x178] sm:$0xff]   ;;  %1813 = vst [vmem:[#allocation1 + $0x470] ss:$8 sps:$4 sm:$0xff] %v1810_v14   ;;  %1845 = vst [vmem:[#allocation1 + $0x460] ss:$8 sps:$4 sm:$0xff] %v1842_v15  }
  0xf9   :  { %v1874_v17 = vunpack.c.h.bf16 %v7280_v16  ;;  %v1906_v18 = vunpack.c.l.bf16 %v7280_v16  ;;  %v7232_v20 = vld [vmem:[%s8790_s0 + $0x170] sm:$0xff]   ;;  %v7244_v21 = vld [vmem:[%s8790_s0 + $0x158] sm:$0xff]   ;;  %s8416_s19 = smov 3  ;;  %s8418_s20 = smov 3  ;;  %v1042_v24 = vunpack.c.h.bf16 %v7228_v19  ;;  %v1074_v25 = vunpack.c.l.bf16 %v7228_v19 }
  0xfa   :  { %v6061_v23 = vld [vmem:[#allocation1 + $0x3c1] ss:$8 sm:$0xf]   ;;  %s8424_s3 = smov 3  ;;  %s8426_s6 = smov 3  ;;  %v1106_v28 = vunpack.c.h.bf16 %v7232_v20  ;;  %v1138_v31 = vunpack.c.l.bf16 %v7232_v20  ;;  %v1298_v32 = vunpack.c.h.bf16 %v7244_v21  ;;  %v1330_v37 = vunpack.c.l.bf16 %v7244_v21 }
  0xfb   :  { %v7248_v26 = vld [vmem:[%s8790_s0 + $0x150] sm:$0xff]   ;;  %v6065_v27 = vsel %vm5636_vm1, %v6063_v13, %v6061_v23  ;;  %1877 = vst [vmem:[#allocation1 + $0x450] ss:$8 sps:$4 sm:$0xff] %v1874_v17   ;;  %1909 = vst [vmem:[#allocation1 + $0x440] ss:$8 sps:$4 sm:$0xff] %v1906_v18   ;;  %s8431_s9 = smov 3 }
  0xfc   :  { %v7197_v29 = vld [vmem:[%s8790_s0 + $0x1b6] sm:$0xff]   ;;  %v7769_v30 = vpack.i.bf16 %v6065_v27, %v6054_v12  ;;  %s5003_s11 = smov 3  ;;  %1045 = vst [vmem:[#allocation1 + $0x5f0] ss:$8 sps:$4 sm:$0xff] %v1042_v24   ;;  %1077 = vst [vmem:[#allocation1 + $0x5e0] ss:$8 sps:$4 sm:$0xff] %v1074_v25   ;;  %v1362_v38 = vunpack.c.h.bf16 %v7248_v26  ;;  %v1394_v42 = vunpack.c.l.bf16 %v7248_v26 }
  0xfd   :  { %v7201_v33 = vld [vmem:[%s8790_s0 + $0x1b2] sm:$0xf]   ;;  %v7212_v34 = vld [vmem:[%s8790_s0 + $0x198] sm:$0xff]   ;;  %s5009_s12 = smov 3  ;;  %s5015_s21 = smov 3  ;;  %v546_v43 = vunpack.c.h.bf16 %v7197_v29  ;;  %v578_v46 = vunpack.c.l.bf16 %v7197_v29 }
  0xfe   :  { %v8442_v35 = vld [vmem:[%s8790_s0 + $0x1f8] sm:$0xff]   ;;  %1109 = vst [vmem:[#allocation1 + $0x5d0] ss:$8 sps:$4 sm:$0xff] %v1106_v28   ;;  %v7216_v39 = vld [vmem:[%s8790_s0 + $0x194] sm:$0xf]   ;;  %7770 = vrot.lane.b32.xlu1 %v7769_v30, %s7834_s27  ;;  %s5021_s15 = smov 3  ;;  %v610_v47 = vunpack.c.l.bf16 %v7201_v33  ;;  %v786_v50 = vunpack.c.h.bf16 %v7212_v34  ;;  %v818_v51 = vunpack.c.l.bf16 %v7212_v34  ;;  %v8509_v34 = vpop.permute.xlu0 %7680 }
  0xff   :  { %v5004_v36 = vld [vmem:[#allocation1 + $0x4b8] ss:$2 sm:%s5003_s11]   ;;  %v5016_v41 = vld [vmem:[#allocation1 + $0x4c8] ss:$2 sm:%s5015_s21]   ;;  %s5027_s16 = smov 3  ;;  %s5033_s26 = smov 3  ;;  %v850_v56 = vunpack.c.l.bf16 %v7216_v39  ;;  %v18_v57 = vunpack.c.h.bf16 %v8442_v35  ;;  %v50_v61 = vunpack.c.l.bf16 %v8442_v35 }
 0x100   :  { %5007 = vst.msk [vmem:[#allocation0 + $0x127] ss:$8 sm:$0x3] %vm4100_vm0, %v5004_v36   ;;  %v5010_v40 = vld [vmem:[#allocation1 + $0x4c0] ss:$2 sm:%s5009_s12]   ;;  %s5039_s28 = smov 3 }
 0x101   :  { %1141 = vst [vmem:[#allocation1 + $0x5c0] ss:$8 sps:$4 sm:$0xff] %v1138_v31   ;;  %1301 = vst [vmem:[#allocation1 + $0x570] ss:$8 sps:$4 sm:$0xff] %v1298_v32   ;;  %v5022_v44 = vld [vmem:[#allocation1 + $0x4d0] ss:$2 sm:%s5021_s15]  }
 0x102   :  { %5013 = vst.msk [vmem:[#allocation0 + $0x130] ss:$8 sm:$0x3] %vm4100_vm0, %v5010_v40   ;;  %5019 = vst.msk [vmem:[#allocation0 + $0x131] ss:$8 sm:$0x3] %vm4100_vm0, %v5016_v41  }
 0x103   :  { %v5028_v45 = vld [vmem:[#allocation1 + $0x4d8] ss:$2 sm:%s5027_s16]   ;;  %1333 = vst [vmem:[#allocation1 + $0x560] ss:$8 sps:$4 sm:$0xff] %v1330_v37   ;;  %1365 = vst [vmem:[#allocation1 + $0x550] ss:$8 sps:$4 sm:$0xff] %v1362_v38  }
 0x104   :  { %5025 = vst.msk [vmem:[#allocation0 + $0x132] ss:$8 sm:$0x3] %vm4100_vm0, %v5022_v44   ;;  %5031 = vst.msk [vmem:[#allocation0 + $0x133] ss:$8 sm:$0x3] %vm4100_vm0, %v5028_v45  }
 0x105   :  { %v5034_v48 = vld [vmem:[#allocation1 + $0x4e0] ss:$2 sm:%s5033_s26]   ;;  %s8453_s25 = smov 3  ;;  %s8455_s2 = smov 3  ;;  %1397 = vst [vmem:[#allocation1 + $0x540] ss:$8 sps:$4 sm:$0xff] %v1394_v42  }
 0x106   :  { %v5040_v49 = vld [vmem:[#allocation1 + $0x4e8] ss:$2 sm:%s5039_s28]   ;;  %549 = vst [vmem:[#allocation1 + $0x6e8] ss:$8 sps:$4 sm:$0xff] %v546_v43   ;;  %581 = vst [vmem:[#allocation1 + $0x6d8] ss:$8 sps:$4 sm:$0xff] %v578_v46  }
 0x107   :  { %v4938_v52 = vld [vmem:[#allocation1 + $0x460] ss:$2 sm:%s8418_s20]   ;;  %v4950_v54 = vld [vmem:[#allocation1 + $0x470] ss:$2 sm:%s8426_s6]   ;;  %613 = vst [vmem:[#allocation1 + $0x6c8] ss:$8 sps:$4 sm:$0xff] %v610_v47   ;;  %v7678_v47 = vunpack.i.h.bf16 %v8414_v22  ;;  %v7677_v22 = vunpack.i.l.bf16 %v8414_v22 }
 0x108   :  { %v4944_v53 = vld [vmem:[#allocation1 + $0x468] ss:$2 sm:%s8424_s3]   ;;  %5037 = vst.msk [vmem:[#allocation0 + $0x134] ss:$8 sm:$0x3] %vm4100_vm0, %v5034_v48   ;;  %s5117_s20 = smov 3 }
 0x109   :  { %5043 = vst.msk [vmem:[#allocation0 + $0x135] ss:$8 sm:$0x3] %vm4100_vm0, %v5040_v49   ;;  %v6085_v55 = vld [vmem:[#allocation1 + $0x4c1] ss:$8 sm:$0xf0]  }
 0x10a   :  { %v4908_v58 = vld [vmem:[#allocation1 + $0x438] ss:$2 sm:%s8397_s22]   ;;  %v4920_v60 = vld [vmem:[#allocation1 + $0x448] ss:$2 sm:%s8401_s24]   ;;  %789 = vst [vmem:[#allocation1 + $0x670] ss:$8 sps:$4 sm:$0xff] %v786_v50  }
 0x10b   :  { %v4914_v59 = vld [vmem:[#allocation1 + $0x440] ss:$2 sm:%s8399_s23]   ;;  %4941 = vst.msk [vmem:[#allocation0 + $0x114] ss:$8 sm:$0x3] %vm4100_vm0, %v4938_v52   ;;  %s5099_s22 = smov 3 }
 0x10c   :  { %4947 = vst.msk [vmem:[#allocation0 + $0x115] ss:$8 sm:$0x3] %vm4100_vm0, %v4944_v53   ;;  %4953 = vst.msk [vmem:[#allocation0 + $0x116] ss:$8 sm:$0x3] %vm4100_vm0, %v4950_v54  }
 0x10d   :  { %821 = vst [vmem:[#allocation1 + $0x660] ss:$8 sps:$4 sm:$0xff] %v818_v51   ;;  %4911 = vst.msk [vmem:[#allocation0 + $0x107] ss:$8 sm:$0x3] %vm4100_vm0, %v4908_v58   ;;  %s5105_s23 = smov 3  ;;  %v7688_v51 = vunpack.i.h.bf16 %v8481_v6  ;;  %v7691_v58 = vpop.permute.xlu1 %7690 }
 0x10e   :  { %4917 = vst.msk [vmem:[#allocation0 + $0x110] ss:$8 sm:$0x3] %vm4100_vm0, %v4914_v59   ;;  %4923 = vst.msk [vmem:[#allocation0 + $0x111] ss:$8 sm:$0x3] %vm4100_vm0, %v4920_v60  }
 0x10f   :  { %v4926_v62 = vld [vmem:[#allocation1 + $0x450] ss:$2 sm:%s8403_s29]   ;;  %853 = vst [vmem:[#allocation1 + $0x650] ss:$8 sps:$4 sm:$0xff] %v850_v56   ;;  %21 = vst [vmem:[#allocation1 + $0x7f0] ss:$8 sps:$4 sm:$0xff] %v18_v57   ;;  %v7683_v56 = vunpack.i.h.bf16 %v8509_v34  ;;  %v7682_v57 = vunpack.i.l.bf16 %v8509_v34 }
 0x110   :  { %v4932_v63 = vld [vmem:[#allocation1 + $0x458] ss:$2 sm:%s8416_s19]   ;;  %4929 = vst.msk [vmem:[#allocation0 + $0x112] ss:$8 sm:$0x3] %vm4100_vm0, %v4926_v62   ;;  %s5111_s24 = smov 3 }
 0x111   :  { %v4956_v0 = vld [vmem:[#allocation1 + $0x478] ss:$2 sm:%s8431_s9]   ;;  %4935 = vst.msk [vmem:[#allocation0 + $0x113] ss:$8 sm:$0x3] %vm4100_vm0, %v4932_v63   ;;  %s5123_s3 = smov 3  ;;  %v7693_v63 = vunpack.i.h.bf16 %v7691_v58 }
 0x112   :  { %4959 = vst.msk [vmem:[#allocation0 + $0x117] ss:$8 sm:$0x3] %vm4100_vm0, %v4956_v0   ;;  %v6072_v1 = vld [vmem:[#allocation1 + $0x441] ss:$8 sm:$0xf]   ;;  %v7692_v0 = vunpack.i.l.bf16 %v7691_v58 }
 0x113   :  { %v6074_v2 = vld [vmem:[#allocation1 + $0x441] ss:$8 sm:$0xf0]   ;;  %53 = vst [vmem:[#allocation1 + $0x7e0] ss:$8 sps:$4 sm:$0xff] %v50_v61   ;;  %s5129_s10 = smov 3 }
 0x114   :  { %v6076_v3 = vsel %vm5636_vm1, %v6074_v2, %v6072_v1  ;;  %v6083_v4 = vld [vmem:[#allocation1 + $0x4c1] ss:$8 sm:$0xf]   ;;  %v5046_v5 = vld [vmem:[#allocation1 + $0x4f0] ss:$2 sm:%s8453_s25]   ;;  %s5135_s9 = smov 3 }
 0x115   :  { %v6087_v7 = vsel %vm5636_vm1, %v6085_v55, %v6083_v4  ;;  %5049 = vst.msk [vmem:[#allocation0 + $0x136] ss:$8 sm:$0x3] %vm4100_vm0, %v5046_v5   ;;  %v5052_v8 = vld [vmem:[#allocation1 + $0x4f8] ss:$2 sm:%s8455_s2]   ;;  %s5141_s11 = smov 3  ;;  %v7687_v55 = vunpack.i.l.bf16 %v8481_v6 }
 0x116   :  { %v7218_v9 = vld [vmem:[%s8790_s0 + $0x192] sm:$0x3]  ;;  %v7774_v10 = vpack.i.bf16 %v6087_v7, %v6076_v3  ;;  %5055 = vst.msk [vmem:[#allocation0 + $0x137] ss:$8 sm:$0x3] %vm4100_vm0, %v5052_v8   ;;  %v7180_v15 = vld [vmem:[%s8790_s0 + $0x1d8] sm:$0xff]  }
 0x117   :  { %v5100_v11 = vld [vmem:[#allocation1 + $0x538] ss:$2 sm:%s5099_s22]   ;;  %v5112_v13 = vld [vmem:[#allocation1 + $0x548] ss:$2 sm:%s5111_s24]   ;;  %v882_v14 = vunpack.c.l.bf16 %v7218_v9  ;;  %v274_v18 = vunpack.c.h.bf16 %v7180_v15  ;;  %v306_v19 = vunpack.c.l.bf16 %v7180_v15  ;;  %s5147_s13 = smov 3  ;;  %s5195_s14 = smov 3 }
 0x118   :  { %v5106_v12 = vld [vmem:[#allocation1 + $0x540] ss:$2 sm:%s5105_s23]   ;;  %5103 = vst.msk [vmem:[#allocation0 + $0x147] ss:$8 sm:$0x3] %vm4100_vm0, %v5100_v11   ;;  %7775 = vrot.lane.b32.xlu0 %v7774_v10, %s7834_s27  ;;  %s5201_s30 = smov 3 }
 0x119   :  { %5109 = vst.msk [vmem:[#allocation0 + $0x150] ss:$8 sm:$0x3] %vm4100_vm0, %v5106_v12   ;;  %5115 = vst.msk [vmem:[#allocation0 + $0x151] ss:$8 sm:$0x3] %vm4100_vm0, %v5112_v13  }
 0x11a   :  { %v5118_v16 = vld [vmem:[#allocation1 + $0x550] ss:$2 sm:%s5117_s20]   ;;  %885 = vst [vmem:[#allocation1 + $0x648] sm:$0xf] %v882_v14  ;;  %v5130_v20 = vld [vmem:[#allocation1 + $0x560] ss:$2 sm:%s5129_s10]  }
 0x11b   :  { %v5124_v17 = vld [vmem:[#allocation1 + $0x558] ss:$2 sm:%s5123_s3]   ;;  %5121 = vst.msk [vmem:[#allocation0 + $0x152] ss:$8 sm:$0x3] %vm4100_vm0, %v5118_v16   ;;  %s5207_s4 = smov 3 }
 0x11c   :  { %5127 = vst.msk [vmem:[#allocation0 + $0x153] ss:$8 sm:$0x3] %vm4100_vm0, %v5124_v17   ;;  %v5136_v21 = vld [vmem:[#allocation1 + $0x568] ss:$2 sm:%s5135_s9]   ;;  %s5213_s17 = smov 3  ;;  %v7696_v17 = vpop.permute.xlu0 %7695 }
 0x11d   :  { %5133 = vst.msk [vmem:[#allocation0 + $0x154] ss:$8 sm:$0x3] %vm4100_vm0, %v5130_v20   ;;  %5139 = vst.msk [vmem:[#allocation0 + $0x155] ss:$8 sm:$0x3] %vm4100_vm0, %v5136_v21   ;;  %v7698_v20 = vunpack.i.h.bf16 %v7696_v17  ;;  %v7697_v21 = vunpack.i.l.bf16 %v7696_v17 }
 0x11e   :  { %v5142_v23 = vld [vmem:[#allocation1 + $0x570] ss:$2 sm:%s5141_s11]   ;;  %v6094_v25 = vld [vmem:[#allocation1 + $0x541] ss:$8 sm:$0xf]   ;;  %s5219_s18 = smov 3 }
 0x11f   :  { %v5148_v24 = vld [vmem:[#allocation1 + $0x578] ss:$2 sm:%s5147_s13]   ;;  %277 = vst [vmem:[#allocation1 + $0x770] ss:$8 sps:$4 sm:$0xff] %v274_v18   ;;  %309 = vst [vmem:[#allocation1 + $0x760] ss:$8 sps:$4 sm:$0xff] %v306_v19  }
 0x120   :  { %5145 = vst.msk [vmem:[#allocation0 + $0x156] ss:$8 sm:$0x3] %vm4100_vm0, %v5142_v23   ;;  %5151 = vst.msk [vmem:[#allocation0 + $0x157] ss:$8 sm:$0x3] %vm4100_vm0, %v5148_v24  }
 0x121   :  { %v5196_v26 = vld [vmem:[#allocation1 + $0x5b8] ss:$2 sm:%s5195_s14]   ;;  %v5208_v28 = vld [vmem:[#allocation1 + $0x5c8] ss:$2 sm:%s5207_s4]   ;;  %s5225_s12 = smov 3  ;;  %s5231_s21 = smov 3 }
 0x122   :  { %v5202_v27 = vld [vmem:[#allocation1 + $0x5c0] ss:$2 sm:%s5201_s30]   ;;  %5199 = vst.msk [vmem:[#allocation0 + $0x167] ss:$8 sm:$0x3] %vm4100_vm0, %v5196_v26   ;;  %s5237_s5 = smov 3 }
 0x123   :  { %5205 = vst.msk [vmem:[#allocation0 + $0x170] ss:$8 sm:$0x3] %vm4100_vm0, %v5202_v27   ;;  %v5214_v29 = vld [vmem:[#allocation1 + $0x5d0] ss:$2 sm:%s5213_s17]   ;;  %s5243_s8 = smov 3 }
 0x124   :  { %5211 = vst.msk [vmem:[#allocation0 + $0x171] ss:$8 sm:$0x3] %vm4100_vm0, %v5208_v28   ;;  %5217 = vst.msk [vmem:[#allocation0 + $0x172] ss:$8 sm:$0x3] %vm4100_vm0, %v5214_v29  }
 0x125   :  { %v5220_v30 = vld [vmem:[#allocation1 + $0x5d8] ss:$2 sm:%s5219_s18]   ;;  %v5232_v32 = vld [vmem:[#allocation1 + $0x5e8] ss:$2 sm:%s5231_s21]   ;;  %s5393_s15 = smov 3  ;;  %s5399_s16 = smov 3 }
 0x126   :  { %v5226_v31 = vld [vmem:[#allocation1 + $0x5e0] ss:$2 sm:%s5225_s12]   ;;  %5223 = vst.msk [vmem:[#allocation0 + $0x173] ss:$8 sm:$0x3] %vm4100_vm0, %v5220_v30   ;;  %s5405_s26 = smov 3 }
 0x127   :  { %5229 = vst.msk [vmem:[#allocation0 + $0x174] ss:$8 sm:$0x3] %vm4100_vm0, %v5226_v31   ;;  %v6096_v33 = vld [vmem:[#allocation1 + $0x541] ss:$8 sm:$0xf0]  }
 0x128   :  { %5235 = vst.msk [vmem:[#allocation0 + $0x175] ss:$8 sm:$0x3] %vm4100_vm0, %v5232_v32   ;;  %v6098_v35 = vsel %vm5636_vm1, %v6096_v33, %v6094_v25  ;;  %v6105_v36 = vld [vmem:[#allocation1 + $0x5c1] ss:$8 sm:$0xf]  }
 0x129   :  { %v6107_v37 = vld [vmem:[#allocation1 + $0x5c1] ss:$8 sm:$0xf0]   ;;  %v5238_v39 = vld [vmem:[#allocation1 + $0x5f0] ss:$2 sm:%s5237_s5]   ;;  %s5411_s28 = smov 3 }
 0x12a   :  { %v6109_v38 = vsel %vm5636_vm1, %v6107_v37, %v6105_v36  ;;  %v5244_v40 = vld [vmem:[#allocation1 + $0x5f8] ss:$2 sm:%s5243_s8]   ;;  %5241 = vst.msk [vmem:[#allocation0 + $0x176] ss:$8 sm:$0x3] %vm4100_vm0, %v5238_v39   ;;  %s5519_s3 = smov 3  ;;  %v7701_v39 = vpop.permute.xlu1 %7700 }
 0x12b   :  { %v7779_v41 = vpack.i.bf16 %v6109_v38, %v6098_v35  ;;  %5247 = vst.msk [vmem:[#allocation0 + $0x177] ss:$8 sm:$0x3] %vm4100_vm0, %v5244_v40   ;;  %v5394_v42 = vld [vmem:[#allocation1 + $0x6c0] ss:$2 sm:%s5393_s15]   ;;  %s5525_s6 = smov 3 }
 0x12c   :  { %v5400_v43 = vld [vmem:[#allocation1 + $0x6c8] ss:$2 sm:%s5399_s16]   ;;  %5397 = vst.msk [vmem:[#allocation0 + $0x1b0] ss:$8 sm:$0x3] %vm4100_vm0, %v5394_v42   ;;  %s5531_s7 = smov 3  ;;  %v7703_v42 = vunpack.i.h.bf16 %v7701_v39 }
 0x12d   :  { %5403 = vst.msk [vmem:[#allocation0 + $0x1b1] ss:$8 sm:$0x3] %vm4100_vm0, %v5400_v43   ;;  %v5406_v44 = vld [vmem:[#allocation1 + $0x6d0] ss:$2 sm:%s5405_s26]   ;;  %7780 = vrot.lane.b32.xlu1 %v7779_v41, %s7834_s27  ;;  %s4145_s10 = smov 3  ;;  %v7702_v43 = vunpack.i.l.bf16 %v7701_v39 }
 0x12e   :  { %v5412_v45 = vld [vmem:[#allocation1 + $0x6d8] ss:$2 sm:%s5411_s28]   ;;  %v7168_v46 = vld [vmem:[%s8790_s0 + $0x1f4] sm:$0xf]   ;;  %v7170_v60 = vld [vmem:[%s8790_s0 + $0x1f2] sm:$0x3] }
 0x12f   :  { %5409 = vst.msk [vmem:[#allocation0 + $0x1b2] ss:$8 sm:$0x3] %vm4100_vm0, %v5406_v44   ;;  %5415 = vst.msk [vmem:[#allocation0 + $0x1b3] ss:$8 sm:$0x3] %vm4100_vm0, %v5412_v45   ;;  %v82_v50 = vunpack.c.l.bf16 %v7168_v46  ;;  %v114_v2 = vunpack.c.l.bf16 %v7170_v60 }
 0x130   :  { %v6116_v48 = vld [vmem:[#allocation1 + $0x641] ss:$8 sm:$0xf]   ;;  %v7184_v61 = vld [vmem:[%s8790_s0 + $0x1d4] sm:$0xf]   ;;  %5652 = vst.msk [vmem:[#allocation0 + $0x20] sm:$0xff] %vm5640_vm2, %v7678_v47  }
 0x131   :  { %v6118_v49 = vld [vmem:[#allocation1 + $0x641] ss:$8 sm:$0xf0]   ;;  %85 = vst [vmem:[#allocation1 + $0x7d0] ss:$8 sps:$4 sm:$0xff] %v82_v50   ;;  %v338_v3 = vunpack.c.l.bf16 %v7184_v61  ;;  %5641 = vst.msk [vmem:[#allocation0] sm:$0xff] %vm5640_vm2, %v7677_v22  }
 0x132   :  { %v6120_v52 = vsel %vm5636_vm1, %v6118_v49, %v6116_v48  ;;  %v6127_v53 = vld [vmem:[#allocation1 + $0x6c1] ss:$8 sm:$0xf]   ;;  %v7186_v62 = vld [vmem:[%s8790_s0 + $0x1d2] sm:$0x3]  ;;  %s5513_s0 = smov 3 }
 0x133   :  { %v6129_v54 = vld [vmem:[#allocation1 + $0x6c1] ss:$8 sm:$0xf0]   ;;  %v370_v4 = vunpack.c.l.bf16 %v7186_v62  ;;  %v5514_v5 = vld [vmem:[#allocation1 + $0x760] ss:$2 sm:%s5513_s0]   ;;  %5685 = vst.msk [vmem:[#allocation0 + $0x80] sm:$0xff] %vm5640_vm2, %v7687_v55  }
 0x134   :  { %v6131_v59 = vsel %vm5636_vm1, %v6129_v54, %v6127_v53  ;;  %117 = vst [vmem:[#allocation1 + $0x7c8] sm:$0xf] %v114_v2  ;;  %341 = vst [vmem:[#allocation1 + $0x750] ss:$8 sps:$4 sm:$0xff] %v338_v3   ;;  %v5520_v6 = vld [vmem:[#allocation1 + $0x768] ss:$2 sm:%s5519_s3]  }
 0x135   :  { %v7784_v1 = vpack.i.bf16 %v6131_v59, %v6120_v52  ;;  %5517 = vst.msk [vmem:[#allocation0 + $0x1d4] ss:$8 sm:$0x3] %vm4100_vm0, %v5514_v5   ;;  %v5526_v7 = vld [vmem:[#allocation1 + $0x770] ss:$2 sm:%s5525_s6]   ;;  %s8551_s9 = smov 3  ;;  %v7706_v5 = vpop.permute.xlu0 %7705 }
 0x136   :  { %5696 = vst.msk [vmem:[#allocation0 + $0xa0] sm:$0xff] %vm5640_vm2, %v7688_v51   ;;  %5663 = vst.msk [vmem:[#allocation0 + $0x40] sm:$0xff] %vm5640_vm2, %v7682_v57   ;;  %v5532_v8 = vld [vmem:[#allocation1 + $0x778] ss:$2 sm:%s5531_s7]   ;;  %s4151_s11 = smov 3  ;;  %s4157_s13 = smov 3 }
 0x137   :  { %7785 = vrot.lane.b32.xlu0 %v7784_v1, %s7834_s27  ;;  %5674 = vst.msk [vmem:[#allocation0 + $0x60] sm:$0xff] %vm5640_vm2, %v7683_v56   ;;  %5707 = vst.msk [vmem:[#allocation0 + $0xc0] sm:$0xff] %vm5640_vm2, %v7692_v0   ;;  %v4146_v9 = vld [vmem:[#allocation1 + $0x40] ss:$2 sm:%s4145_s10]   ;;  %s4259_s14 = smov 3  ;;  %s4265_s30 = smov 3 }
 0x138   :  { %5718 = vst.msk [vmem:[#allocation0 + $0xe0] sm:$0xff] %vm5640_vm2, %v7693_v63   ;;  %373 = vst [vmem:[#allocation1 + $0x748] sm:$0xf] %v370_v4  ;;  %v4152_v10 = vld [vmem:[#allocation1 + $0x48] ss:$2 sm:%s4151_s11]   ;;  %s4271_s4 = smov 3 }
 0x139   :  { %5523 = vst.msk [vmem:[#allocation0 + $0x1d5] ss:$8 sm:$0x3] %vm4100_vm0, %v5520_v6   ;;  %5529 = vst.msk [vmem:[#allocation0 + $0x1d6] ss:$8 sm:$0x3] %vm4100_vm0, %v5526_v7   ;;  %v7716_v17 = vpop.permute.xlu0 %7715 }
 0x13a   :  { %5535 = vst.msk [vmem:[#allocation0 + $0x1d7] ss:$8 sm:$0x3] %vm4100_vm0, %v5532_v8   ;;  %v6151_v11 = vld [vmem:[#allocation1 + $0x7c1] ss:$8 sm:$0xf0]   ;;  %v7708_v8 = vunpack.i.h.bf16 %v7706_v5 }
 0x13b   :  { %4149 = vst.msk [vmem:[#allocation0 + $0x10] ss:$8 sm:$0x3] %vm4100_vm0, %v4146_v9   ;;  %4155 = vst.msk [vmem:[#allocation0 + $0x11] ss:$8 sm:$0x3] %vm4100_vm0, %v4152_v10   ;;  %v7707_v9 = vunpack.i.l.bf16 %v7706_v5 }
 0x13c   :  { %v4158_v12 = vld [vmem:[#allocation1 + $0x50] ss:$2 sm:%s4157_s13]   ;;  %v6140_v14 = vld [vmem:[#allocation1 + $0x741] ss:$8 sm:$0xf0]   ;;  %s4277_s17 = smov 3 }
 0x13d   :  { %v4260_v13 = vld [vmem:[#allocation1 + $0xd8] ss:$2 sm:%s4259_s14]   ;;  %4161 = vst.msk [vmem:[#allocation0 + $0x12] ss:$8 sm:$0x3] %vm4100_vm0, %v4158_v12   ;;  %s4451_s18 = smov 3 }
 0x13e   :  { %4263 = vst.msk [vmem:[#allocation0 + $0x33] ss:$8 sm:$0x3] %vm4100_vm0, %v4260_v13   ;;  %v4266_v15 = vld [vmem:[#allocation1 + $0xe0] ss:$2 sm:%s4265_s30]   ;;  %s4457_s12 = smov 3 }
 0x13f   :  { %v4272_v16 = vld [vmem:[#allocation1 + $0xe8] ss:$2 sm:%s4271_s4]   ;;  %4269 = vst.msk [vmem:[#allocation0 + $0x34] ss:$8 sm:$0x3] %vm4100_vm0, %v4266_v15   ;;  %s4463_s21 = smov 3 }
 0x140   :  { %4275 = vst.msk [vmem:[#allocation0 + $0x35] ss:$8 sm:$0x3] %vm4100_vm0, %v4272_v16   ;;  %v6160_v18 = vld [vmem:[#allocation1 + $0x43] ss:$8 sm:$0xf]  }
 0x141   :  { %v6162_v19 = vld [vmem:[#allocation1 + $0x43] ss:$8 sm:$0xf0]   ;;  %v5508_v26 = vld [vmem:[#allocation1 + $0x758] ss:$2 sm:%s8551_s9]   ;;  %5729 = vst.msk [vmem:[#allocation0 + $0x100] sm:$0xff] %vm5640_vm2, %v7697_v21   ;;  %v7718_v21 = vunpack.i.h.bf16 %v7716_v17 }
 0x142   :  { %v6164_v23 = vsel %vm5636_vm1, %v6162_v19, %v6160_v18  ;;  %v6171_v24 = vld [vmem:[#allocation1 + $0xc3] ss:$8 sm:$0xf]   ;;  %v6149_v27 = vld [vmem:[#allocation1 + $0x7c1] ss:$8 sm:$0xf]  }
 0x143   :  { %v6173_v25 = vld [vmem:[#allocation1 + $0xc3] ss:$8 sm:$0xf0]   ;;  %5740 = vst.msk [vmem:[#allocation0 + $0x120] sm:$0xff] %vm5640_vm2, %v7698_v20   ;;  %v6153_v30 = vsel %vm5636_vm1, %v6151_v11, %v6149_v27  ;;  %v4278_v32 = vld [vmem:[#allocation1 + $0xf0] ss:$2 sm:%s4277_s17]   ;;  %v7711_v27 = vpop.permute.xlu1 %7710 }
 0x144   :  { %v6175_v28 = vsel %vm5636_vm1, %v6173_v25, %v6171_v24  ;;  %5511 = vst.msk [vmem:[#allocation0 + $0x1d3] ss:$8 sm:$0x3] %vm4100_vm0, %v5508_v26   ;;  %v6138_v29 = vld [vmem:[#allocation1 + $0x741] ss:$8 sm:$0xf]  }
 0x145   :  { %v7794_v31 = vpack.i.bf16 %v6175_v28, %v6164_v23  ;;  %v6142_v33 = vsel %vm5636_vm1, %v6140_v14, %v6138_v29  ;;  %4281 = vst.msk [vmem:[#allocation0 + $0x36] ss:$8 sm:$0x3] %vm4100_vm0, %v4278_v32   ;;  %v4452_v34 = vld [vmem:[#allocation1 + $0x1d8] ss:$2 sm:%s4451_s18]   ;;  %s4469_s5 = smov 3  ;;  %v7717_v23 = vunpack.i.l.bf16 %v7716_v17  ;;  %v7712_v32 = vunpack.i.l.bf16 %v7711_v27 }
 0x146   :  { %v4458_v35 = vld [vmem:[#allocation1 + $0x1e0] ss:$2 sm:%s4457_s12]   ;;  %v7789_v37 = vpack.i.bf16 %v6153_v30, %v6142_v33  ;;  %4455 = vst.msk [vmem:[#allocation0 + $0x73] ss:$8 sm:$0x3] %vm4100_vm0, %v4452_v34   ;;  %s4529_s8 = smov 3 }
 0x147   :  { %v4464_v36 = vld [vmem:[#allocation1 + $0x1e8] ss:$2 sm:%s4463_s21]   ;;  %7795 = vrot.lane.b32.xlu0 %v7794_v31, %s7834_s27  ;;  %4461 = vst.msk [vmem:[#allocation0 + $0x74] ss:$8 sm:$0x3] %vm4100_vm0, %v4458_v35   ;;  %s4535_s15 = smov 3  ;;  %v7713_v31 = vunpack.i.h.bf16 %v7711_v27 }
 0x148   :  { %4467 = vst.msk [vmem:[#allocation0 + $0x75] ss:$8 sm:$0x3] %vm4100_vm0, %v4464_v36   ;;  %v6182_v38 = vld [vmem:[#allocation1 + $0x143] ss:$8 sm:$0xf]   ;;  %7790 = vrot.lane.b32.xlu1 %v7789_v37, %s7834_s27 }
 0x149   :  { %v6184_v40 = vld [vmem:[#allocation1 + $0x143] ss:$8 sm:$0xf0]   ;;  %v4470_v46 = vld [vmem:[#allocation1 + $0x1f0] ss:$2 sm:%s4469_s5]   ;;  %s4541_s16 = smov 3 }
 0x14a   :  { %v6193_v41 = vld [vmem:[#allocation1 + $0x1c3] ss:$8 sm:$0xf]   ;;  %v6186_v44 = vsel %vm5636_vm1, %v6184_v40, %v6182_v38  ;;  %4473 = vst.msk [vmem:[#allocation0 + $0x76] ss:$8 sm:$0x3] %vm4100_vm0, %v4470_v46   ;;  %v7726_v40 = vpop.permute.xlu0 %7725 }
 0x14b   :  { %v6195_v45 = vld [vmem:[#allocation1 + $0x1c3] ss:$8 sm:$0xf0]   ;;  %v4530_v48 = vld [vmem:[#allocation1 + $0x240] ss:$2 sm:%s4529_s8]   ;;  %s4547_s26 = smov 3  ;;  %v7727_v46 = vunpack.i.l.bf16 %v7726_v40 }
 0x14c   :  { %v6197_v47 = vsel %vm5636_vm1, %v6195_v45, %v6193_v41  ;;  %v4536_v49 = vld [vmem:[#allocation1 + $0x248] ss:$2 sm:%s4535_s15]   ;;  %5751 = vst.msk [vmem:[#allocation0 + $0x140] sm:$0xff] %vm5640_vm2, %v7702_v43   ;;  %5762 = vst.msk [vmem:[#allocation0 + $0x160] sm:$0xff] %vm5640_vm2, %v7703_v42   ;;  %v4548_v51 = vld [vmem:[#allocation1 + $0x258] ss:$2 sm:%s4547_s26]   ;;  %v7728_v45 = vunpack.i.h.bf16 %v7726_v40 }
 0x14d   :  { %v7799_v50 = vpack.i.bf16 %v6197_v47, %v6186_v44  ;;  %4533 = vst.msk [vmem:[#allocation0 + $0x90] ss:$8 sm:$0x3] %vm4100_vm0, %v4530_v48   ;;  %4539 = vst.msk [vmem:[#allocation0 + $0x91] ss:$8 sm:$0x3] %vm4100_vm0, %v4536_v49   ;;  %v7721_v44 = vpop.permute.xlu1 %7720 }
 0x14e   :  { %v4542_v22 = vld [vmem:[#allocation1 + $0x250] ss:$2 sm:%s4541_s16]   ;;  %s4649_s28 = smov 3  ;;  %s4655_s25 = smov 3  ;;  %5773 = vst.msk [vmem:[#allocation0 + $0x180] sm:$0xff] %vm5640_vm2, %v7707_v9   ;;  %5784 = vst.msk [vmem:[#allocation0 + $0x1a0] sm:$0xff] %vm5640_vm2, %v7708_v8  }
 0x14f   :  { %4545 = vst.msk [vmem:[#allocation0 + $0x92] ss:$8 sm:$0x3] %vm4100_vm0, %v4542_v22   ;;  %4551 = vst.msk [vmem:[#allocation0 + $0x93] ss:$8 sm:$0x3] %vm4100_vm0, %v4548_v51   ;;  %7800 = vrot.lane.b32.xlu1 %v7799_v50, %s7834_s27  ;;  %v7723_v50 = vunpack.i.h.bf16 %v7721_v44  ;;  %v7722_v22 = vunpack.i.l.bf16 %v7721_v44 }
 0x150   :  { %v4650_v52 = vld [vmem:[#allocation1 + $0x2e0] ss:$2 sm:%s4649_s28]   ;;  %s4661_s2 = smov 3  ;;  %s4667_s22 = smov 3  ;;  %5828 = vst.msk [vmem:[#allocation0 + $0x28] sm:$0xff] %vm5640_vm2, %v7718_v21   ;;  %5817 = vst.msk [vmem:[#allocation0 + $0x8] sm:$0xff] %vm5640_vm2, %v7717_v23  }
 0x151   :  { %v4656_v53 = vld [vmem:[#allocation1 + $0x2e8] ss:$2 sm:%s4655_s25]   ;;  %4653 = vst.msk [vmem:[#allocation0 + $0xb4] ss:$8 sm:$0x3] %vm4100_vm0, %v4650_v52   ;;  %s4745_s23 = smov 3 }
 0x152   :  { %4659 = vst.msk [vmem:[#allocation0 + $0xb5] ss:$8 sm:$0x3] %vm4100_vm0, %v4656_v53   ;;  %v6204_v54 = vld [vmem:[#allocation1 + $0x243] ss:$8 sm:$0xf]  }
 0x153   :  { %v6206_v55 = vld [vmem:[#allocation1 + $0x243] ss:$8 sm:$0xf0]   ;;  %v4662_v60 = vld [vmem:[#allocation1 + $0x2f0] ss:$2 sm:%s4661_s2]   ;;  %s4751_s24 = smov 3 }
 0x154   :  { %v6208_v56 = vsel %vm5636_vm1, %v6206_v55, %v6204_v54  ;;  %v6215_v57 = vld [vmem:[#allocation1 + $0x2c3] ss:$8 sm:$0xf]   ;;  %v4668_v61 = vld [vmem:[#allocation1 + $0x2f8] ss:$2 sm:%s4667_s22]   ;;  %s4757_s29 = smov 3 }
 0x155   :  { %v6217_v58 = vld [vmem:[#allocation1 + $0x2c3] ss:$8 sm:$0xf0]   ;;  %4665 = vst.msk [vmem:[#allocation0 + $0xb6] ss:$8 sm:$0x3] %vm4100_vm0, %v4662_v60  }
 0x156   :  { %v6219_v59 = vsel %vm5636_vm1, %v6217_v58, %v6215_v57  ;;  %4671 = vst.msk [vmem:[#allocation0 + $0xb7] ss:$8 sm:$0x3] %vm4100_vm0, %v4668_v61   ;;  %v4746_v63 = vld [vmem:[#allocation1 + $0x360] ss:$2 sm:%s4745_s23]   ;;  %s4763_s19 = smov 3  ;;  %v7731_v57 = vpop.permute.xlu1 %7730 }
 0x157   :  { %v7804_v62 = vpack.i.bf16 %v6219_v59, %v6208_v56  ;;  %v4752_v0 = vld [vmem:[#allocation1 + $0x368] ss:$2 sm:%s4751_s24]   ;;  %4749 = vst.msk [vmem:[#allocation0 + $0xd4] ss:$8 sm:$0x3] %vm4100_vm0, %v4746_v63   ;;  %s4817_s20 = smov 3  ;;  %v7733_v60 = vunpack.i.h.bf16 %v7731_v57  ;;  %v7732_v61 = vunpack.i.l.bf16 %v7731_v57 }
 0x158   :  { %4755 = vst.msk [vmem:[#allocation0 + $0xd5] ss:$8 sm:$0x3] %vm4100_vm0, %v4752_v0   ;;  %v4758_v1 = vld [vmem:[#allocation1 + $0x370] ss:$2 sm:%s4757_s29]   ;;  %s4823_s0 = smov 3 }
 0x159   :  { %v4764_v2 = vld [vmem:[#allocation1 + $0x378] ss:$2 sm:%s4763_s19]   ;;  %7805 = vrot.lane.b32.xlu0 %v7804_v62, %s7834_s27  ;;  %4761 = vst.msk [vmem:[#allocation0 + $0xd6] ss:$8 sm:$0x3] %vm4100_vm0, %v4758_v1   ;;  %s4829_s3 = smov 3 }
 0x15a   :  { %4767 = vst.msk [vmem:[#allocation0 + $0xd7] ss:$8 sm:$0x3] %vm4100_vm0, %v4764_v2   ;;  %v4818_v3 = vld [vmem:[#allocation1 + $0x3c0] ss:$2 sm:%s4817_s20]   ;;  %s4835_s6 = smov 3 }
 0x15b   :  { %v4824_v4 = vld [vmem:[#allocation1 + $0x3c8] ss:$2 sm:%s4823_s0]   ;;  %4821 = vst.msk [vmem:[#allocation0 + $0xf0] ss:$8 sm:$0x3] %vm4100_vm0, %v4818_v3   ;;  %s4841_s7 = smov 3 }
 0x15c   :  { %4827 = vst.msk [vmem:[#allocation0 + $0xf1] ss:$8 sm:$0x3] %vm4100_vm0, %v4824_v4   ;;  %v4830_v6 = vld [vmem:[#allocation1 + $0x3d0] ss:$2 sm:%s4829_s3]   ;;  %s4847_s10 = smov 3  ;;  %v7736_v4 = vpop.permute.xlu0 %7735 }
 0x15d   :  { %v4836_v7 = vld [vmem:[#allocation1 + $0x3d8] ss:$2 sm:%s4835_s6]   ;;  %4833 = vst.msk [vmem:[#allocation0 + $0xf2] ss:$8 sm:$0x3] %vm4100_vm0, %v4830_v6   ;;  %s4853_s9 = smov 3  ;;  %v7738_v8 = vunpack.i.h.bf16 %v7736_v4  ;;  %v7737_v9 = vunpack.i.l.bf16 %v7736_v4 }
 0x15e   :  { %4839 = vst.msk [vmem:[#allocation0 + $0xf3] ss:$8 sm:$0x3] %vm4100_vm0, %v4836_v7   ;;  %v4842_v10 = vld [vmem:[#allocation1 + $0x3e0] ss:$2 sm:%s4841_s7]   ;;  %s4859_s11 = smov 3 }
 0x15f   :  { %v4848_v11 = vld [vmem:[#allocation1 + $0x3e8] ss:$2 sm:%s4847_s10]   ;;  %4845 = vst.msk [vmem:[#allocation0 + $0xf4] ss:$8 sm:$0x3] %vm4100_vm0, %v4842_v10   ;;  %s5297_s13 = smov 3 }
 0x160   :  { %4851 = vst.msk [vmem:[#allocation0 + $0xf5] ss:$8 sm:$0x3] %vm4100_vm0, %v4848_v11   ;;  %v6226_v12 = vld [vmem:[#allocation1 + $0x343] ss:$8 sm:$0xf]   ;;  %v7746_v44 = vpop.permute.xlu0 %7745 }
 0x161   :  { %v6228_v13 = vld [vmem:[#allocation1 + $0x343] ss:$8 sm:$0xf0]   ;;  %v4854_v19 = vld [vmem:[#allocation1 + $0x3f0] ss:$2 sm:%s4853_s9]   ;;  %s5303_s14 = smov 3 }
 0x162   :  { %v6230_v14 = vsel %vm5636_vm1, %v6228_v13, %v6226_v12  ;;  %v6237_v15 = vld [vmem:[#allocation1 + $0x3c3] ss:$8 sm:$0xf]   ;;  %v4860_v20 = vld [vmem:[#allocation1 + $0x3f8] ss:$2 sm:%s4859_s11]   ;;  %5795 = vst.msk [vmem:[#allocation0 + $0x1c0] sm:$0xff] %vm5640_vm2, %v7712_v32  }
 0x163   :  { %v6239_v16 = vld [vmem:[#allocation1 + $0x3c3] ss:$8 sm:$0xf0]   ;;  %4857 = vst.msk [vmem:[#allocation0 + $0xf6] ss:$8 sm:$0x3] %vm4100_vm0, %v4854_v19  }
 0x164   :  { %v6241_v18 = vsel %vm5636_vm1, %v6239_v16, %v6237_v15  ;;  %4863 = vst.msk [vmem:[#allocation0 + $0xf7] ss:$8 sm:$0x3] %vm4100_vm0, %v4860_v20   ;;  %v6248_v25 = vld [vmem:[#allocation1 + $0x443] ss:$8 sm:$0xf]  }
 0x165   :  { %v7809_v24 = vpack.i.bf16 %v6241_v18, %v6230_v14  ;;  %v6250_v26 = vld [vmem:[#allocation1 + $0x443] ss:$8 sm:$0xf0]   ;;  %5806 = vst.msk [vmem:[#allocation0 + $0x1e0] sm:$0xff] %vm5640_vm2, %v7713_v31   ;;  %v5298_v42 = vld [vmem:[#allocation1 + $0x640] ss:$2 sm:%s5297_s13]   ;;  %v7741_v18 = vpop.permute.xlu1 %7740 }
 0x166   :  { %v6252_v28 = vsel %vm5636_vm1, %v6250_v26, %v6248_v25  ;;  %v6259_v29 = vld [vmem:[#allocation1 + $0x4c3] ss:$8 sm:$0xf]   ;;  %v5304_v43 = vld [vmem:[#allocation1 + $0x648] ss:$2 sm:%s5303_s14]   ;;  %s5309_s30 = smov 3  ;;  %v7743_v23 = vunpack.i.h.bf16 %v7741_v18 }
 0x167   :  { %v6261_v30 = vld [vmem:[#allocation1 + $0x4c3] ss:$8 sm:$0xf0]   ;;  %7810 = vrot.lane.b32.xlu1 %v7809_v24, %s7834_s27  ;;  %s5315_s4 = smov 3  ;;  %v5310_v48 = vld [vmem:[#allocation1 + $0x650] ss:$2 sm:%s5309_s30]   ;;  %v7742_v24 = vunpack.i.l.bf16 %v7741_v18 }
 0x168   :  { %v6263_v33 = vsel %vm5636_vm1, %v6261_v30, %v6259_v29  ;;  %v6270_v34 = vld [vmem:[#allocation1 + $0x543] ss:$8 sm:$0xf]   ;;  %5301 = vst.msk [vmem:[#allocation0 + $0x190] ss:$8 sm:$0x3] %vm4100_vm0, %v5298_v42  }
 0x169   :  { %v6272_v35 = vld [vmem:[#allocation1 + $0x543] ss:$8 sm:$0xf0]   ;;  %v7814_v36 = vpack.i.bf16 %v6263_v33, %v6252_v28  ;;  %5307 = vst.msk [vmem:[#allocation0 + $0x191] ss:$8 sm:$0x3] %vm4100_vm0, %v5304_v43  }
 0x16a   :  { %v6274_v37 = vsel %vm5636_vm1, %v6272_v35, %v6270_v34  ;;  %v6281_v38 = vld [vmem:[#allocation1 + $0x5c3] ss:$8 sm:$0xf]   ;;  %v5316_v49 = vld [vmem:[#allocation1 + $0x658] ss:$2 sm:%s5315_s4]   ;;  %s5321_s17 = smov 3 }
 0x16b   :  { %v6283_v39 = vld [vmem:[#allocation1 + $0x5c3] ss:$8 sm:$0xf0]   ;;  %7815 = vrot.lane.b32.xlu0 %v7814_v36, %s7834_s27  ;;  %s5327_s18 = smov 3  ;;  %v5322_v51 = vld [vmem:[#allocation1 + $0x660] ss:$2 sm:%s5321_s17]  }
 0x16c   :  { %v6285_v41 = vsel %vm5636_vm1, %v6283_v39, %v6281_v38  ;;  %5313 = vst.msk [vmem:[#allocation0 + $0x192] ss:$8 sm:$0x3] %vm4100_vm0, %v5310_v48   ;;  %5319 = vst.msk [vmem:[#allocation0 + $0x193] ss:$8 sm:$0x3] %vm4100_vm0, %v5316_v49  }
 0x16d   :  { %v7819_v47 = vpack.i.bf16 %v6285_v41, %v6274_v37  ;;  %v5328_v52 = vld [vmem:[#allocation1 + $0x668] ss:$2 sm:%s5327_s18]   ;;  %s5333_s12 = smov 3  ;;  %s5339_s21 = smov 3  ;;  %5872 = vst.msk [vmem:[#allocation0 + $0xa8] sm:$0xff] %vm5640_vm2, %v7728_v45   ;;  %5861 = vst.msk [vmem:[#allocation0 + $0x88] sm:$0xff] %vm5640_vm2, %v7727_v46  }
 0x16e   :  { %5325 = vst.msk [vmem:[#allocation0 + $0x194] ss:$8 sm:$0x3] %vm4100_vm0, %v5322_v51   ;;  %5331 = vst.msk [vmem:[#allocation0 + $0x195] ss:$8 sm:$0x3] %vm4100_vm0, %v5328_v52   ;;  %v7748_v51 = vunpack.i.h.bf16 %v7746_v44 }
 0x16f   :  { %7820 = vrot.lane.b32.xlu1 %v7819_v47, %s7834_s27  ;;  %v5334_v53 = vld [vmem:[#allocation1 + $0x670] ss:$2 sm:%s5333_s12]   ;;  %s5417_s5 = smov 3  ;;  %s5423_s8 = smov 3  ;;  %5850 = vst.msk [vmem:[#allocation0 + $0x68] sm:$0xff] %vm5640_vm2, %v7723_v50   ;;  %5839 = vst.msk [vmem:[#allocation0 + $0x48] sm:$0xff] %vm5640_vm2, %v7722_v22  }
 0x170   :  { %v5340_v54 = vld [vmem:[#allocation1 + $0x678] ss:$2 sm:%s5339_s21]   ;;  %5337 = vst.msk [vmem:[#allocation0 + $0x196] ss:$8 sm:$0x3] %vm4100_vm0, %v5334_v53   ;;  %s5429_s15 = smov 3 }
 0x171   :  { %5343 = vst.msk [vmem:[#allocation0 + $0x197] ss:$8 sm:$0x3] %vm4100_vm0, %v5340_v54   ;;  %v5418_v55 = vld [vmem:[#allocation1 + $0x6e0] ss:$2 sm:%s5417_s5]   ;;  %s5489_s16 = smov 3 }
 0x172   :  { %v5424_v56 = vld [vmem:[#allocation1 + $0x6e8] ss:$2 sm:%s5423_s8]   ;;  %5421 = vst.msk [vmem:[#allocation0 + $0x1b4] ss:$8 sm:$0x3] %vm4100_vm0, %v5418_v55   ;;  %s5495_s26 = smov 3 }
 0x173   :  { %5427 = vst.msk [vmem:[#allocation0 + $0x1b5] ss:$8 sm:$0x3] %vm4100_vm0, %v5424_v56   ;;  %v6292_v58 = vld [vmem:[#allocation1 + $0x643] ss:$8 sm:$0xf]  }
 0x174   :  { %v6294_v59 = vld [vmem:[#allocation1 + $0x643] ss:$8 sm:$0xf0]   ;;  %v5430_v2 = vld [vmem:[#allocation1 + $0x6f0] ss:$2 sm:%s5429_s15]   ;;  %s5501_s28 = smov 3 }
 0x175   :  { %v6296_v62 = vsel %vm5636_vm1, %v6294_v59, %v6292_v58  ;;  %v6303_v63 = vld [vmem:[#allocation1 + $0x6c3] ss:$8 sm:$0xf]   ;;  %v5490_v3 = vld [vmem:[#allocation1 + $0x740] ss:$2 sm:%s5489_s16]   ;;  %5894 = vst.msk [vmem:[#allocation0 + $0xe8] sm:$0xff] %vm5640_vm2, %v7733_v60   ;;  %v7747_v58 = vunpack.i.l.bf16 %v7746_v44 }
 0x176   :  { %v6305_v0 = vld [vmem:[#allocation1 + $0x6c3] ss:$8 sm:$0xf0]   ;;  %5883 = vst.msk [vmem:[#allocation0 + $0xc8] sm:$0xff] %vm5640_vm2, %v7732_v61   ;;  %v5496_v6 = vld [vmem:[#allocation1 + $0x748] ss:$2 sm:%s5495_s26]  }
 0x177   :  { %v6307_v1 = vsel %vm5636_vm1, %v6305_v0, %v6303_v63  ;;  %5433 = vst.msk [vmem:[#allocation0 + $0x1b6] ss:$8 sm:$0x3] %vm4100_vm0, %v5430_v2   ;;  %5493 = vst.msk [vmem:[#allocation0 + $0x1d0] ss:$8 sm:$0x3] %vm4100_vm0, %v5490_v3   ;;  %v7751_v3 = vpop.permute.xlu1 %7750 }
 0x178   :  { %v7824_v5 = vpack.i.bf16 %v6307_v1, %v6296_v62  ;;  %v5502_v7 = vld [vmem:[#allocation1 + $0x750] ss:$2 sm:%s5501_s28]   ;;  %s5585_s25 = smov 3  ;;  %s5591_s2 = smov 3  ;;  %5916 = vst.msk [vmem:[#allocation0 + $0x128] sm:$0xff] %vm5640_vm2, %v7738_v8   ;;  %5905 = vst.msk [vmem:[#allocation0 + $0x108] sm:$0xff] %vm5640_vm2, %v7737_v9   ;;  %v7753_v4 = vunpack.i.h.bf16 %v7751_v3 }
 0x179   :  { %5499 = vst.msk [vmem:[#allocation0 + $0x1d1] ss:$8 sm:$0x3] %vm4100_vm0, %v5496_v6   ;;  %5505 = vst.msk [vmem:[#allocation0 + $0x1d2] ss:$8 sm:$0x3] %vm4100_vm0, %v5502_v7  }
 0x17a   :  { %v5586_v10 = vld [vmem:[#allocation1 + $0x7c0] ss:$2 sm:%s5585_s25]   ;;  %s5597_s22 = smov 3  ;;  %s5603_s23 = smov 3  ;;  %7825 = vrot.lane.b32.xlu0 %v7824_v5, %s7834_s27  ;;  %5938 = vst.msk [vmem:[#allocation0 + $0x168] sm:$0xff] %vm5640_vm2, %v7743_v23   ;;  %5927 = vst.msk [vmem:[#allocation0 + $0x148] sm:$0xff] %vm5640_vm2, %v7742_v24   ;;  %v7752_v5 = vunpack.i.l.bf16 %v7751_v3 }
 0x17b   :  { %v5592_v11 = vld [vmem:[#allocation1 + $0x7c8] ss:$2 sm:%s5591_s2]   ;;  %5589 = vst.msk [vmem:[#allocation0 + $0x1f0] ss:$8 sm:$0x3] %vm4100_vm0, %v5586_v10   ;;  %s5609_s24 = smov 3 }
 0x17c   :  { %5595 = vst.msk [vmem:[#allocation0 + $0x1f1] ss:$8 sm:$0x3] %vm4100_vm0, %v5592_v11   ;;  %v5598_v12 = vld [vmem:[#allocation1 + $0x7d0] ss:$2 sm:%s5597_s22]   ;;  %s5615_s29 = smov 3 }
 0x17d   :  { %v5604_v13 = vld [vmem:[#allocation1 + $0x7d8] ss:$2 sm:%s5603_s23]   ;;  %5601 = vst.msk [vmem:[#allocation0 + $0x1f2] ss:$8 sm:$0x3] %vm4100_vm0, %v5598_v12   ;;  %s5621_s19 = smov 3 }
 0x17e   :  { %5607 = vst.msk [vmem:[#allocation0 + $0x1f3] ss:$8 sm:$0x3] %vm4100_vm0, %v5604_v13   ;;  %v5610_v14 = vld [vmem:[#allocation1 + $0x7e0] ss:$2 sm:%s5609_s24]   ;;  %s5627_s20 = smov 3 }
 0x17f   :  { %v5616_v15 = vld [vmem:[#allocation1 + $0x7e8] ss:$2 sm:%s5615_s29]   ;;  %5613 = vst.msk [vmem:[#allocation0 + $0x1f4] ss:$8 sm:$0x3] %vm4100_vm0, %v5610_v14   ;;  %v6369_v29 = vld [vmem:[#allocation0 + $0x20] sm:$0xff] }
 0x180   :  { %5619 = vst.msk [vmem:[#allocation0 + $0x1f5] ss:$8 sm:$0x3] %vm4100_vm0, %v5616_v15   ;;  %v6314_v16 = vld [vmem:[#allocation1 + $0x743] ss:$8 sm:$0xf]  }
 0x181   :  { %v6316_v17 = vld [vmem:[#allocation1 + $0x743] ss:$8 sm:$0xf0]   ;;  %v5622_v26 = vld [vmem:[#allocation1 + $0x7f0] ss:$2 sm:%s5621_s19]   ;;  %5960 = vst.msk [vmem:[#allocation0 + $0x1a8] sm:$0xff] %vm5640_vm2, %v7748_v51  }
 0x182   :  { %v6318_v19 = vsel %vm5636_vm1, %v6316_v17, %v6314_v16  ;;  %v6325_v20 = vld [vmem:[#allocation1 + $0x7c3] ss:$8 sm:$0xf]   ;;  %v5628_v27 = vld [vmem:[#allocation1 + $0x7f8] ss:$2 sm:%s5627_s20]   ;;  %5949 = vst.msk [vmem:[#allocation0 + $0x188] sm:$0xff] %vm5640_vm2, %v7747_v58   ;;  %v7756_v16 = vpop.permute.xlu0 %7755 }
 0x183   :  { %v6327_v21 = vld [vmem:[#allocation1 + $0x7c3] ss:$8 sm:$0xf0]   ;;  %5625 = vst.msk [vmem:[#allocation0 + $0x1f6] ss:$8 sm:$0x3] %vm4100_vm0, %v5622_v26  }
 0x184   :  { %v6329_v25 = vsel %vm5636_vm1, %v6327_v21, %v6325_v20  ;;  %5631 = vst.msk [vmem:[#allocation0 + $0x1f7] ss:$8 sm:$0x3] %vm4100_vm0, %v5628_v27   ;;  %v6340_v30 = vld [vmem:[#allocation0] sm:$0xff]  ;;  %v6377_v36 = vld [vmem:[#allocation0 + $0x28] sm:$0xff]  ;;  %v7757_v20 = vunpack.i.l.bf16 %v7756_v16  ;;  %v7761_v21 = vpop.permute.xlu1 %7760 }
 0x185   :  { %v7829_v28 = vpack.i.bf16 %v6329_v25, %v6318_v19  ;;  %v6401_v31 = vld [vmem:[#allocation0 + $0x40] sm:$0xff]  ;;  %v7495_v40 = vpack.c.bf16 %v6377_v36, %v6369_v29  ;;  %v6441_v41 = vld [vmem:[#allocation0 + $0x68] sm:$0xff]  ;;  %5971 = vst.msk [vmem:[#allocation0 + $0x1c8] sm:$0xff] %vm5640_vm2, %v7752_v5   ;;  %5982 = vst.msk [vmem:[#allocation0 + $0x1e8] sm:$0xff] %vm5640_vm2, %v7753_v4   ;;  %v7758_v19 = vunpack.i.h.bf16 %v7756_v16  ;;  %v7763_v23 = vunpack.i.h.bf16 %v7761_v21 }
 0x186   :  { %v6465_v32 = vld [vmem:[#allocation0 + $0x80] sm:$0xff]  ;;  %v6409_v42 = vld [vmem:[#allocation0 + $0x48] sm:$0xff]  ;;  %5993 = vst.msk [vmem:[#allocation0 + $0x10] sm:$0xff] %vm5640_vm2, %v7757_v20   ;;  %v7762_v24 = vunpack.i.l.bf16 %v7761_v21  ;;  %v7766_v25 = vpop.permute.xlu0 %7765 }
 0x187   :  { %7830 = vrot.lane.b32.xlu1 %v7829_v28, %s7834_s27  ;;  %v6497_v33 = vld [vmem:[#allocation0 + $0xa0] sm:$0xff]  ;;  %v6346_v43 = vld [vmem:[#allocation0 + $0x8] sm:$0xff]  ;;  %v7505_v46 = vpack.c.bf16 %v6409_v42, %v6401_v31  ;;  %7643 = vst [vmem:[%s8791_s1 + $0x10] sm:$0xff] %v7495_v40   ;;  %6004 = vst.msk [vmem:[#allocation0 + $0x30] sm:$0xff] %vm5640_vm2, %v7758_v19   ;;  %v7768_v26 = vunpack.i.h.bf16 %v7766_v25  ;;  %v7767_v27 = vunpack.i.l.bf16 %v7766_v25 }
 0x188   :  { %v6433_v34 = vld [vmem:[#allocation0 + $0x60] sm:$0xff]  ;;  %v6505_v48 = vld [vmem:[#allocation0 + $0xa8] sm:$0xff]  ;;  %v7485_v50 = vpack.c.bf16 %v6346_v43, %v6340_v30  ;;  %6026 = vst.msk [vmem:[#allocation0 + $0x70] sm:$0xff] %vm5640_vm2, %v7763_v23   ;;  %6015 = vst.msk [vmem:[#allocation0 + $0x50] sm:$0xff] %vm5640_vm2, %v7762_v24   ;;  %v7771_v28 = vpop.permute.xlu1 %7770 }
 0x189   :  { %v6561_v35 = vld [vmem:[#allocation0 + $0xe0] sm:$0xff]  ;;  %v7515_v47 = vpack.c.bf16 %v6441_v41, %v6433_v34  ;;  %v6473_v49 = vld [vmem:[#allocation0 + $0x88] sm:$0xff]  ;;  %v7535_v53 = vpack.c.bf16 %v6505_v48, %v6497_v33  ;;  %7645 = vst [vmem:[%s8791_s1 + $0x20] sm:$0xff] %v7505_v46   ;;  %6048 = vst.msk [vmem:[#allocation0 + $0xb0] sm:$0xff] %vm5640_vm2, %v7768_v26   ;;  %v7773_v29 = vunpack.i.h.bf16 %v7771_v28  ;;  %v7772_v30 = vunpack.i.l.bf16 %v7771_v28 }
 0x18a   :  { %v6529_v37 = vld [vmem:[#allocation0 + $0xc0] sm:$0xff]  ;;  %v6569_v22 = vld [vmem:[#allocation0 + $0xe8] sm:$0xff]  ;;  %v7525_v52 = vpack.c.bf16 %v6473_v49, %v6465_v32  ;;  %7486 = vst [vmem:[%s8791_s1] sm:$0xff] %v7485_v50   ;;  %6037 = vst.msk [vmem:[#allocation0 + $0x90] sm:$0xff] %vm5640_vm2, %v7767_v27   ;;  %v7776_v31 = vpop.permute.xlu0 %7775 }
 0x18b   :  { %v6593_v38 = vld [vmem:[#allocation0 + $0x100] sm:$0xff]  ;;  %v6537_v54 = vld [vmem:[#allocation0 + $0xc8] sm:$0xff]  ;;  %v7555_v55 = vpack.c.bf16 %v6569_v22, %v6561_v35  ;;  %7647 = vst [vmem:[%s8791_s1 + $0x30] sm:$0xff] %v7515_v47   ;;  %7651 = vst [vmem:[%s8791_s1 + $0x50] sm:$0xff] %v7535_v53   ;;  %v7778_v32 = vunpack.i.h.bf16 %v7776_v31  ;;  %v7777_v33 = vunpack.i.l.bf16 %v7776_v31 }
 0x18c   :  { %v6625_v39 = vld [vmem:[#allocation0 + $0x120] sm:$0xff]  ;;  %v6633_v56 = vld [vmem:[#allocation0 + $0x128] sm:$0xff]  ;;  %v7545_v60 = vpack.c.bf16 %v6537_v54, %v6529_v37  ;;  %7649 = vst [vmem:[%s8791_s1 + $0x40] sm:$0xff] %v7525_v52   ;;  %6070 = vst.msk [vmem:[#allocation0 + $0xf0] sm:$0xff] %vm5640_vm2, %v7773_v29  }
 0x18d   :  { %v6657_v45 = vld [vmem:[#allocation0 + $0x140] sm:$0xff]  ;;  %v6601_v57 = vld [vmem:[#allocation0 + $0x108] sm:$0xff]  ;;  %v7575_v61 = vpack.c.bf16 %v6633_v56, %v6625_v39  ;;  %7655 = vst [vmem:[%s8791_s1 + $0x70] sm:$0xff] %v7555_v55   ;;  %6059 = vst.msk [vmem:[#allocation0 + $0xd0] sm:$0xff] %vm5640_vm2, %v7772_v30  }
 0x18e   :  { %v6689_v59 = vld [vmem:[#allocation0 + $0x160] sm:$0xff]  ;;  %v7565_v62 = vpack.c.bf16 %v6601_v57, %v6593_v38  ;;  %v6697_v63 = vld [vmem:[#allocation0 + $0x168] sm:$0xff]  ;;  %7653 = vst [vmem:[%s8791_s1 + $0x60] sm:$0xff] %v7545_v60   ;;  %6092 = vst.msk [vmem:[#allocation0 + $0x130] sm:$0xff] %vm5640_vm2, %v7778_v32  }
 0x18f   :  { %v6665_v0 = vld [vmem:[#allocation0 + $0x148] sm:$0xff]  ;;  %v7595_v2 = vpack.c.bf16 %v6697_v63, %v6689_v59  ;;  %7659 = vst [vmem:[%s8791_s1 + $0x90] sm:$0xff] %v7575_v61   ;;  %v6753_v6 = vld [vmem:[#allocation0 + $0x1a0] sm:$0xff]  ;;  %6081 = vst.msk [vmem:[#allocation0 + $0x110] sm:$0xff] %vm5640_vm2, %v7777_v33  }
 0x190   :  { %v7585_v1 = vpack.c.bf16 %v6665_v0, %v6657_v45  ;;  %7657 = vst [vmem:[%s8791_s1 + $0x80] sm:$0xff] %v7565_v62   ;;  %v6761_v7 = vld [vmem:[#allocation0 + $0x1a8] sm:$0xff]  ;;  %v6721_v8 = vld [vmem:[#allocation0 + $0x180] sm:$0xff]  ;;  %v6385_v49 = vld [vmem:[#allocation0 + $0x30] sm:$0xff] }
 0x191   :  { %7663 = vst [vmem:[%s8791_s1 + $0xb0] sm:$0xff] %v7595_v2   ;;  %v6729_v9 = vld [vmem:[#allocation0 + $0x188] sm:$0xff]  ;;  %v7615_v10 = vpack.c.bf16 %v6761_v7, %v6753_v6  ;;  %v6785_v12 = vld [vmem:[#allocation0 + $0x1c0] sm:$0xff]  ;;  %v6353_v50 = vld [vmem:[#allocation0 + $0x10] sm:$0xff] }
 0x192   :  { %7661 = vst [vmem:[%s8791_s1 + $0xa0] sm:$0xff] %v7585_v1   ;;  %v7605_v11 = vpack.c.bf16 %v6729_v9, %v6721_v8  ;;  %v6817_v13 = vld [vmem:[#allocation0 + $0x1e0] sm:$0xff]  ;;  %v6793_v14 = vld [vmem:[#allocation0 + $0x1c8] sm:$0xff]  ;;  %v6449_v57 = vld [vmem:[#allocation0 + $0x70] sm:$0xff] }
 0x193   :  { %7667 = vst [vmem:[%s8791_s1 + $0xd0] sm:$0xff] %v7615_v10   ;;  %v6825_v15 = vld [vmem:[#allocation0 + $0x1e8] sm:$0xff]  ;;  %v7625_v18 = vpack.c.bf16 %v6793_v14, %v6785_v12  ;;  %v6417_v58 = vld [vmem:[#allocation0 + $0x50] sm:$0xff] }
 0x194   :  { %7665 = vst [vmem:[%s8791_s1 + $0xc0] sm:$0xff] %v7605_v11   ;;  %v7635_v17 = vpack.c.bf16 %v6825_v15, %v6817_v13  ;;  %v6513_v0 = vld [vmem:[#allocation0 + $0xb0] sm:$0xff] }
 0x195   :  { %7669 = vst [vmem:[%s8791_s1 + $0xe0] sm:$0xff] %v7625_v18   ;;  %v6481_v3 = vld [vmem:[#allocation0 + $0x90] sm:$0xff] }
 0x196   :  { %7671 = vst [vmem:[%s8791_s1 + $0xf0] sm:$0xff] %v7635_v17   ;;  %v6577_v14 = vld [vmem:[#allocation0 + $0xf0] sm:$0xff] }
 0x197   :  { %v6545_v15 = vld [vmem:[#allocation0 + $0xd0] sm:$0xff] }
 0x198   :  { %v6641_v20 = vld [vmem:[#allocation0 + $0x130] sm:$0xff] }
 0x199   :  { %v6609_v23 = vld [vmem:[#allocation0 + $0x110] sm:$0xff] }
 0x19f   :  { %v7781_v34 = vpop.permute.xlu1 %7780 }
 0x1a0   :  { %v7783_v35 = vunpack.i.h.bf16 %v7781_v34  ;;  %v7782_v36 = vunpack.i.l.bf16 %v7781_v34 }
 0x1a2   :  { %6114 = vst.msk [vmem:[#allocation0 + $0x170] sm:$0xff] %vm5640_vm2, %v7783_v35   ;;  %6103 = vst.msk [vmem:[#allocation0 + $0x150] sm:$0xff] %vm5640_vm2, %v7782_v36  }
 0x1a9   :  { %v7786_v37 = vpop.permute.xlu0 %7785  ;;  %v6705_v28 = vld [vmem:[#allocation0 + $0x170] sm:$0xff] }
 0x1aa   :  { %v7788_v38 = vunpack.i.h.bf16 %v7786_v37  ;;  %v7787_v39 = vunpack.i.l.bf16 %v7786_v37  ;;  %v6673_v31 = vld [vmem:[#allocation0 + $0x150] sm:$0xff] }
 0x1ac   :  { %6125 = vst.msk [vmem:[#allocation0 + $0x190] sm:$0xff] %vm5640_vm2, %v7787_v39   ;;  %6136 = vst.msk [vmem:[#allocation0 + $0x1b0] sm:$0xff] %vm5640_vm2, %v7788_v38  }
 0x1b3   :  { %v6737_v39 = vld [vmem:[#allocation0 + $0x190] sm:$0xff] }
 0x1b9   :  { %v7796_v40 = vpop.permute.xlu0 %7795 }
 0x1ba   :  { %v7798_v41 = vunpack.i.h.bf16 %v7796_v40  ;;  %v7797_v42 = vunpack.i.l.bf16 %v7796_v40  ;;  %v7791_v43 = vpop.permute.xlu1 %7790  ;;  %v6769_v40 = vld [vmem:[#allocation0 + $0x1b0] sm:$0xff] }
 0x1bb   :  { %v7793_v44 = vunpack.i.h.bf16 %v7791_v43  ;;  %v7792_v45 = vunpack.i.l.bf16 %v7791_v43 }
 0x1bc   :  { %6180 = vst.msk [vmem:[#allocation0 + $0x38] sm:$0xff] %vm5640_vm2, %v7798_v41   ;;  %6169 = vst.msk [vmem:[#allocation0 + $0x18] sm:$0xff] %vm5640_vm2, %v7797_v42  }
 0x1bd   :  { %6147 = vst.msk [vmem:[#allocation0 + $0x1d0] sm:$0xff] %vm5640_vm2, %v7792_v45   ;;  %6158 = vst.msk [vmem:[#allocation0 + $0x1f0] sm:$0xff] %vm5640_vm2, %v7793_v44  }
 0x1c1   :  { %v7801_v46 = vpop.permute.xlu1 %7800 }
 0x1c2   :  { %v7803_v47 = vunpack.i.h.bf16 %v7801_v46  ;;  %v7802_v48 = vunpack.i.l.bf16 %v7801_v46 }
 0x1c3   :  { %v6393_v22 = vld [vmem:[#allocation0 + $0x38] sm:$0xff] }
 0x1c4   :  { %6202 = vst.msk [vmem:[#allocation0 + $0x78] sm:$0xff] %vm5640_vm2, %v7803_v47   ;;  %6191 = vst.msk [vmem:[#allocation0 + $0x58] sm:$0xff] %vm5640_vm2, %v7802_v48   ;;  %v6361_v51 = vld [vmem:[#allocation0 + $0x18] sm:$0xff]  ;;  %v7500_v53 = vpack.c.bf16 %v6393_v22, %v6385_v49  ;;  %v6801_v45 = vld [vmem:[#allocation0 + $0x1d0] sm:$0xff] }
 0x1c5   :  { %v7490_v52 = vpack.c.bf16 %v6361_v51, %v6353_v50  ;;  %v6833_v46 = vld [vmem:[#allocation0 + $0x1f0] sm:$0xff] }
 0x1c6   :  { %7644 = vst [vmem:[%s8791_s1 + $0x18] sm:$0xff] %v7500_v53  }
 0x1c7   :  { %7642 = vst [vmem:[%s8791_s1 + $0x8] sm:$0xff] %v7490_v52  }
 0x1cb   :  { %v7806_v54 = vpop.permute.xlu0 %7805  ;;  %v6457_v59 = vld [vmem:[#allocation0 + $0x78] sm:$0xff] }
 0x1cc   :  { %v7808_v55 = vunpack.i.h.bf16 %v7806_v54  ;;  %v7807_v56 = vunpack.i.l.bf16 %v7806_v54  ;;  %v6425_v60 = vld [vmem:[#allocation0 + $0x58] sm:$0xff]  ;;  %v7520_v61 = vpack.c.bf16 %v6457_v59, %v6449_v57 }
 0x1cd   :  { %v7510_v62 = vpack.c.bf16 %v6425_v60, %v6417_v58 }
 0x1ce   :  { %6224 = vst.msk [vmem:[#allocation0 + $0xb8] sm:$0xff] %vm5640_vm2, %v7808_v55   ;;  %6213 = vst.msk [vmem:[#allocation0 + $0x98] sm:$0xff] %vm5640_vm2, %v7807_v56  }
 0x1cf   :  { %7648 = vst [vmem:[%s8791_s1 + $0x38] sm:$0xff] %v7520_v61   ;;  %7646 = vst [vmem:[%s8791_s1 + $0x28] sm:$0xff] %v7510_v62  }
 0x1d5   :  { %v6521_v4 = vld [vmem:[#allocation0 + $0xb8] sm:$0xff] }
 0x1d6   :  { %v6489_v5 = vld [vmem:[#allocation0 + $0x98] sm:$0xff]  ;;  %v7540_v7 = vpack.c.bf16 %v6521_v4, %v6513_v0 }
 0x1d7   :  { %v7530_v6 = vpack.c.bf16 %v6489_v5, %v6481_v3 }
 0x1d8   :  { %7652 = vst [vmem:[%s8791_s1 + $0x58] sm:$0xff] %v7540_v7  }
 0x1d9   :  { %v7811_v63 = vpop.permute.xlu1 %7810  ;;  %7650 = vst [vmem:[%s8791_s1 + $0x48] sm:$0xff] %v7530_v6  }
 0x1da   :  { %v7813_v1 = vunpack.i.h.bf16 %v7811_v63  ;;  %v7812_v2 = vunpack.i.l.bf16 %v7811_v63 }
 0x1dc   :  { %6246 = vst.msk [vmem:[#allocation0 + $0xf8] sm:$0xff] %vm5640_vm2, %v7813_v1   ;;  %6235 = vst.msk [vmem:[#allocation0 + $0xd8] sm:$0xff] %vm5640_vm2, %v7812_v2  }
 0x1dd   :  { %v7816_v8 = vpop.permute.xlu0 %7815 }
 0x1de   :  { %v7818_v9 = vunpack.i.h.bf16 %v7816_v8  ;;  %v7817_v10 = vunpack.i.l.bf16 %v7816_v8 }
 0x1e0   :  { %6268 = vst.msk [vmem:[#allocation0 + $0x138] sm:$0xff] %vm5640_vm2, %v7818_v9   ;;  %6257 = vst.msk [vmem:[#allocation0 + $0x118] sm:$0xff] %vm5640_vm2, %v7817_v10  }
 0x1e1   :  { %v7821_v11 = vpop.permute.xlu1 %7820 }
 0x1e2   :  { %v7823_v12 = vunpack.i.h.bf16 %v7821_v11  ;;  %v7822_v13 = vunpack.i.l.bf16 %v7821_v11 }
 0x1e3   :  { %v6585_v16 = vld [vmem:[#allocation0 + $0xf8] sm:$0xff] }
 0x1e4   :  { %6290 = vst.msk [vmem:[#allocation0 + $0x178] sm:$0xff] %vm5640_vm2, %v7823_v12   ;;  %6279 = vst.msk [vmem:[#allocation0 + $0x158] sm:$0xff] %vm5640_vm2, %v7822_v13   ;;  %v6553_v17 = vld [vmem:[#allocation0 + $0xd8] sm:$0xff]  ;;  %v7560_v18 = vpack.c.bf16 %v6585_v16, %v6577_v14 }
 0x1e5   :  { %v7550_v19 = vpack.c.bf16 %v6553_v17, %v6545_v15 }
 0x1e6   :  { %7656 = vst [vmem:[%s8791_s1 + $0x78] sm:$0xff] %v7560_v18  }
 0x1e7   :  { %v6649_v24 = vld [vmem:[#allocation0 + $0x138] sm:$0xff]  ;;  %7654 = vst [vmem:[%s8791_s1 + $0x68] sm:$0xff] %v7550_v19  }
 0x1e8   :  { %v6617_v25 = vld [vmem:[#allocation0 + $0x118] sm:$0xff]  ;;  %v7580_v30 = vpack.c.bf16 %v6649_v24, %v6641_v20 }
 0x1e9   :  { %v7570_v29 = vpack.c.bf16 %v6617_v25, %v6609_v23 }
 0x1ea   :  { %7660 = vst [vmem:[%s8791_s1 + $0x98] sm:$0xff] %v7580_v30  }
 0x1eb   :  { %v6713_v32 = vld [vmem:[#allocation0 + $0x178] sm:$0xff]  ;;  %7658 = vst [vmem:[%s8791_s1 + $0x88] sm:$0xff] %v7570_v29  }
 0x1ec   :  { %v7826_v21 = vpop.permute.xlu0 %7825  ;;  %v6681_v33 = vld [vmem:[#allocation0 + $0x158] sm:$0xff]  ;;  %v7600_v35 = vpack.c.bf16 %v6713_v32, %v6705_v28 }
 0x1ed   :  { %v7828_v26 = vunpack.i.h.bf16 %v7826_v21  ;;  %v7827_v27 = vunpack.i.l.bf16 %v7826_v21  ;;  %v7590_v34 = vpack.c.bf16 %v6681_v33, %v6673_v31 }
 0x1ee   :  { %7664 = vst [vmem:[%s8791_s1 + $0xb8] sm:$0xff] %v7600_v35  }
 0x1ef   :  { %6301 = vst.msk [vmem:[#allocation0 + $0x198] sm:$0xff] %vm5640_vm2, %v7827_v27   ;;  %6312 = vst.msk [vmem:[#allocation0 + $0x1b8] sm:$0xff] %vm5640_vm2, %v7828_v26  }
 0x1f0   :  { %7662 = vst [vmem:[%s8791_s1 + $0xa8] sm:$0xff] %v7590_v34  }
 0x1f6   :  { %v6745_v41 = vld [vmem:[#allocation0 + $0x198] sm:$0xff] }
 0x1f7   :  { %v6777_v42 = vld [vmem:[#allocation0 + $0x1b8] sm:$0xff]  ;;  %v7610_v43 = vpack.c.bf16 %v6745_v41, %v6737_v39 }
 0x1f8   :  { %v7620_v44 = vpack.c.bf16 %v6777_v42, %v6769_v40 }
 0x1f9   :  { %v7831_v36 = vpop.permute.xlu1 %7830  ;;  %7666 = vst [vmem:[%s8791_s1 + $0xc8] sm:$0xff] %v7610_v43  }
 0x1fa   :  { %v7833_v37 = vunpack.i.h.bf16 %v7831_v36  ;;  %v7832_v38 = vunpack.i.l.bf16 %v7831_v36  ;;  %7668 = vst [vmem:[%s8791_s1 + $0xd8] sm:$0xff] %v7620_v44  }
 0x1fc   :  { %6323 = vst.msk [vmem:[#allocation0 + $0x1d8] sm:$0xff] %vm5640_vm2, %v7832_v38   ;;  %6334 = vst.msk [vmem:[#allocation0 + $0x1f8] sm:$0xff] %vm5640_vm2, %v7833_v37  }
 0x203   :  { %v6809_v47 = vld [vmem:[#allocation0 + $0x1d8] sm:$0xff] }
 0x204   :  { %v6841_v48 = vld [vmem:[#allocation0 + $0x1f8] sm:$0xff]  ;;  %v7630_v49 = vpack.c.bf16 %v6809_v47, %v6801_v45 }
 0x205   :  { %v7640_v50 = vpack.c.bf16 %v6841_v48, %v6833_v46 }
 0x206   :  { %7670 = vst [vmem:[%s8791_s1 + $0xe8] sm:$0xff] %v7630_v49  }
 0x207   :  { %7672 = vst [vmem:[%s8791_s1 + $0xf8] sm:$0xff] %v7640_v50  }

// kernel: tile.18
= control target key start
LH: loop header
LB: loop body
LE: loop exit
PB: predicated region body
PF: predicated region fallthrough
CT: control target
= control target key end

     0   :  { %s22_s0 = inlined_call_operand.vmem [shape: f32[64], index: 0, kind: input, shape index: {}]   ;;  %s23_s1 = inlined_call_operand.vmem [shape: f32[4,64], index: 1, kind: output, shape index: {}]  }
   0x1   :  { %v4_v0 = vld [vmem:[%s22_s0] ss:$0 sm:$0xff] }
   0x2   :  { %5 = vst [vmem:[%s23_s1] sm:$0xf] %v4_v0 }

// kernel: tile.19
= control target key start
LH: loop header
LB: loop body
LE: loop exit
PB: predicated region body
PF: predicated region fallthrough
CT: control target
= control target key end

     0   :  { %s7_s8 = smov 3  ;;  %vm9_vm0 = vcmask 523264   ;;  %s34_s9 = smov 64   ;;  %vm16_vm1 = vcmask 1048064   ;;  %s54_s0 = inlined_call_operand.vmem [shape: f32[4,64], index: 0, kind: input, shape index: {}]   ;;  %s55_s1 = inlined_call_operand.vmem [shape: f32[1,256], index: 1, kind: output, shape index: {}]  }
   0x1   :  { %v5_v0 = vld [vmem:[%s54_s0] sm:$0xf]  ;;  %s12_s0 = smov 3 }
   0x2   :  { %6 = vst [vmem:[#allocation1] sm:$0xf] %v5_v0 }
   0x9   :  { %v13_v1 = vld [vmem:[#allocation1 + $0x1] ss:$2 sm:%s12_s0]   ;;  %v8_v2 = vld [vmem:[#allocation1] ss:$2 sm:%s7_s8]  }
   0xa   :  { %14 = vrot.lane.b32.xlu0 %v13_v1, %s34_s9  ;;  %10 = vst.msk [vmem:[#allocation0] ss:$8 sm:$0x3] %vm9_vm0, %v8_v2  }
  0x7c   :  { %v15_v3 = vpop.permute.xlu0 %14  }
  0x7d   :  { %17 = vst.msk [vmem:[#allocation0] ss:$8 sm:$0x3] %vm16_vm1, %v15_v3  }
  0x84   :  { %v22_v4 = vld [vmem:[#allocation0] sm:$0x1]  ;;  %v27_v5 = vld [vmem:[#allocation0 + $0x8] sm:$0x1] }
  0x85   :  { %25 = vst [vmem:[%s55_s1] sm:$0x1] %v22_v4  ;;  %32 = vst [vmem:[%s55_s1 + $0x1] sm:$0x1] %v27_v5 }

// kernel: pan_stem0_forward.1
= control target key start
LH: loop header
LB: loop body
LE: loop exit
PB: predicated region body
PF: predicated region fallthrough
CT: control target
= control target key end

     0   :  { %v152_v0 = vlaneseq  ;;  %vm175_vm0 = vcmask 1040384   ;;  %v1615_v2 = vmov 0   ;;  %v1616_v3 = vmov 1983009808   ;;  %s2125_s2 = inlined_call_operand.vmem [shape: bf16[18,256], index: 2, kind: input, shape index: {}]   ;;  %s2126_s0 = inlined_call_operand.vmem [shape: bf16[2,4,5,18], index: 0, kind: input, shape index: {}]   ;;  %s2127_s1 = inlined_call_operand.vmem [shape: bf16[18,256], index: 1, kind: input, shape index: {}]   ;;  %s2128_s3 = inlined_call_operand.vmem [shape: bf16[18,256], index: 3, kind: input, shape index: {}]   ;;  %s2129_s6 = inlined_call_operand.vmem [shape: bf16[256,256], index: 6, kind: input, shape index: {}]   ;;  %s2130_s5 = inlined_call_operand.vmem [shape: bf16[256,256], index: 5, kind: input, shape index: {}]   ;;  %s2131_s7 = inlined_call_operand.vmem [shape: bf16[256,256], index: 7, kind: input, shape index: {}]   ;;  %s2132_s4 = inlined_call_operand.vmem [shape: f32[1,256], index: 4, kind: input, shape index: {}]   ;;  %s2133_s8 = inlined_call_operand.vmem [shape: f32[1,256], index: 8, kind: input, shape index: {}]   ;;  %s2134_s9 = inlined_call_operand.vmem [shape: f32[2,4,256], index: 9, kind: output, shape index: {}]  }
   0x1   :  { %v46_v1 = vld [vmem:[%s2125_s2 + $0x10] sm:$0x11]  ;;  %214 = vmatprep.mubr.bf16.mxu1 %v1615_v2  ;;  %v150_v4 = vunpack.c.l.s4 %v1616_v3  ;;  %v1676_v7 = vld [vmem:[%s2125_s2 + $0x4] ss:$8 sps:$4 sm:$0xff]   ;;  %v1695_v13 = vld [vmem:[%s2125_s2] ss:$8 sps:$4 sm:$0xff]  }
   0x2   :  { %v1671_v5 = vcombine.high %v46_v1, %v46_v1  ;;  %v1331_v6 = vcombine.low %v46_v1, %v46_v1  ;;  %v1457_v8 = vld [vmem:[%s2126_s0 + $0x4] ss:$16 sps:$4 sm:$0x77]   ;;  %v1681_v10 = vshrl.u32 %v152_v0, 7  ;;  %vm171_vm1 = vcmask 146432  }
   0x3   :  { %v151_v9 = vunpack.c.0.s8 %v150_v4  ;;  %v43_v12 = vld [vmem:[%s2127_s1 + $0x10] sm:$0x11]  ;;  %v33_v18 = vld [vmem:[%s2126_s0] sm:$0x7]  ;;  %v1719_v21 = vld [vmem:[%s2127_s1 + $0x4] ss:$8 sps:$4 sm:$0xff]  }
   0x4   :  { %1333 = vmatprep.subr.msk.bf16.mxu1 %vm175_vm0, %v1671_v5  ;;  %v1686_v11 = vsel %vm175_vm0, %v1331_v6, 0  ;;  %v1701_v15 = vcombine.high %v43_v12, %v43_v12  ;;  %v1337_v16 = vcombine.low %v43_v12, %v43_v12  ;;  %v37_v19 = vld [vmem:[%s2126_s0 + $0x10] sm:$0x7]  ;;  %v1729_v24 = vld [vmem:[%s2127_s1] ss:$8 sps:$4 sm:$0xff]  }
   0x5   :  { %195 = vmatpush1.bf16.msra.mxu1 %v1686_v11  ;;  %v1698_v14 = vsub.s32 %v151_v9, %v1681_v10  ;;  %v49_v22 = vld [vmem:[%s2128_s3 + $0x10] sm:$0x11]  ;;  %v225_v23 = vcombine.low %v33_v18, %v37_v19  ;;  %v1474_v29 = vld [vmem:[%s2129_s6 + $0x64] ss:$8 sps:$4 sm:$0xff]   ;;  %v1476_v31 = vld [vmem:[%s2129_s6 + $0x60] ss:$8 sps:$4 sm:$0xff]  }
   0x6   :  { %196 = vmatprep.subr.bf16.mxu1 %v1676_v7  ;;  %v1714_v20 = vsel %vm175_vm0, %v1337_v16, 0  ;;  %v1471_v25 = vld [vmem:[%s2129_s6 + $0x74] ss:$8 sps:$4 sm:$0xff]   ;;  %v1736_v26 = vcombine.high %v49_v22, %v49_v22  ;;  %v1343_v27 = vcombine.low %v49_v22, %v49_v22  ;;  %v1473_v28 = vld [vmem:[%s2129_s6 + $0x70] ss:$8 sps:$4 sm:$0xff]  }
   0x7   :  { %v155_v17 = vrot.slane %v1457_v8, %v1698_v14  ;;  %845 = vmatprep.subr.bf16.mxu0 %v1471_v25  ;;  %v232_v30 = vrot.slane %v225_v23, %v1698_v14  ;;  %v1757_v33 = vld [vmem:[%s2128_s3 + $0x4] ss:$8 sps:$4 sm:$0xff]   ;;  %v1477_v34 = vld [vmem:[%s2129_s6 + $0x54] ss:$8 sps:$4 sm:$0xff]   ;;  %v494_v35 = vrot.slane %v33_v18, %v1698_v14  ;;  %v502_v37 = vrot.slane %v37_v19, %v1698_v14  ;;  %v1479_v38 = vld [vmem:[%s2129_s6 + $0x50] ss:$8 sps:$4 sm:$0xff]  }
   0x8   :  { %846 = vmatpush1.bf16.msra.mxu0 %v1473_v28  ;;  %v1752_v32 = vsel %vm175_vm0, %v1343_v27, 0  ;;  %v1469_v36 = vld [vmem:[%s2126_s0 + $0x8] ss:$16 sps:$4 sm:$0x77]   ;;  %v1480_v40 = vld [vmem:[%s2129_s6 + $0x44] ss:$8 sps:$4 sm:$0xff]  }
   0x9   :  { %197 = vmatpush1.bf16.msra.mxu1 %v1695_v13  ;;  %847 = vmatprep.subr.bf16.mxu0 %v1474_v29  ;;  %v1775_v39 = vld [vmem:[%s2128_s3] ss:$8 sps:$4 sm:$0xff]   ;;  %v512_v41 = vshrl.u32 %v494_v35, 16  ;;  %v515_v42 = vshll.u32 %v494_v35, 16  ;;  %v526_v43 = vshrl.u32 %v502_v37, 16  ;;  %v307_v44 = vrot.slane %v1469_v36, %v1698_v14 }
   0xa   :  { %1339 = vmatprep.subr.msk.bf16.mxu1 %vm175_vm0, %v1701_v15  ;;  %v1482_v45 = vld [vmem:[%s2129_s6 + $0x40] ss:$8 sps:$4 sm:$0xff]   ;;  %v529_v46 = vshll.u32 %v502_v37, 16  ;;  %v1483_v47 = vld [vmem:[%s2129_s6 + $0x34] ss:$8 sps:$4 sm:$0xff]   ;;  %v495_v55 = vcombine.high %v494_v35, %v494_v35  ;;  %v503_v56 = vcombine.high %v502_v37, %v502_v37 }
   0xb   :  { %v1470_v48 = vld [vmem:[%s2126_s0 + $0xc] ss:$16 sps:$4 sm:$0x77]   ;;  %v1485_v49 = vld [vmem:[%s2129_s6 + $0x30] ss:$8 sps:$4 sm:$0xff]   ;;  %v514_v50 = vrot.slane %v512_v41, 6 }
   0xc   :  { %1334 = vmatmul.mubr.msk.bf16.vlgmr.msra.gmra.mxu1 %vm171_vm1, %v155_v17  ;;  %848 = vmatpush1.bf16.msra.mxu0 %v1476_v31  ;;  %v517_v51 = vrot.slane %v515_v42, 7  ;;  %v1486_v52 = vld [vmem:[%s2129_s6 + $0x24] ss:$8 sps:$4 sm:$0xff]   ;;  %v528_v53 = vrot.slane %v526_v43, 6  ;;  %vm504_vm2 = vsmask.f32 1280  ;;  %v402_v57 = vrot.slane %v1470_v48, %v1698_v14 }
   0xd   :  { %270 = vmatpush1.bf16.msra.mxu1 %v1714_v20  ;;  %289 = vmatprep.mubr.bf16.mxu1 %v1615_v2  ;;  %v531_v54 = vrot.slane %v529_v46, 7  ;;  %vm505_vm3 = vsmask.f32 3336  ;;  %vm507_vm5 = vsmask.f32 5392  ;;  %v521_v60 = vshll.u32 %v495_v55, 16 }
   0xe   :  { %271 = vmatprep.subr.bf16.mxu1 %v1719_v21  ;;  %849 = vmatprep.subr.bf16.mxu0 %v1477_v34  ;;  %vm506_vm4 = vmor %vm504_vm2, %vm505_vm3  ;;  %v1488_v58 = vld [vmem:[%s2129_s6 + $0x20] ss:$8 sps:$4 sm:$0xff]   ;;  %v518_v59 = vor.u32 %v517_v51, %v514_v50  ;;  %v535_v62 = vshll.u32 %v503_v56, 16  ;;  %v1489_v63 = vld [vmem:[%s2129_s6 + $0x14] ss:$8 sps:$4 sm:$0xff]  }
   0xf   :  { %v532_v61 = vor.u32 %v531_v54, %v528_v53  ;;  %vm508_vm6 = vmor %vm506_vm4, %vm507_vm5  ;;  %vm509_vm7 = vsmask.f32 7448  ;;  %v1491_v0 = vld [vmem:[%s2129_s6 + $0x10] ss:$8 sps:$4 sm:$0xff]   ;;  %v523_v3 = vrot.slane %v521_v60, 7 }
  0x10   :  { %850 = vmatpush1.bf16.msra.mxu0 %v1479_v38  ;;  %v519_v1 = vrot.slane %v518_v59, 2  ;;  %v1492_v6 = vld [vmem:[%s2129_s6 + $0x4] ss:$8 sps:$4 sm:$0xff]   ;;  %vm510_vm8 = vmor %vm508_vm6, %vm509_vm7  ;;  %v1500_v17 = vld [vmem:[%s2129_s6 + $0xe0] ss:$8 sps:$4 sm:$0xff]  }
  0x11   :  { %272 = vmatpush1.bf16.msra.mxu1 %v1729_v24  ;;  %851 = vmatprep.subr.bf16.mxu0 %v1480_v40  ;;  %v533_v4 = vrot.slane %v532_v61, 2  ;;  %v1503_v18 = vld [vmem:[%s2129_s6 + $0xd0] ss:$8 sps:$4 sm:$0xff]   ;;  %v1504_v19 = vld [vmem:[%s2129_s6 + $0xc4] ss:$8 sps:$4 sm:$0xff]  }
  0x12   :  { %1345 = vmatprep.subr.msk.bf16.mxu1 %vm175_vm0, %v1736_v26  ;;  %v524_v8 = vsel %vm510_vm8, %v519_v1, %v523_v3  ;;  %v1509_v22 = vld [vmem:[%s2129_s6 + $0xb0] ss:$8 sps:$4 sm:$0xff]   ;;  %v1512_v23 = vld [vmem:[%s2130_s5 + $0x74] ss:$8 sps:$4 sm:$0xff]   ;;  %v1513_v25 = vld [vmem:[%s2129_s6 + $0xa4] ss:$8 sps:$4 sm:$0xff]  }
  0x13   :  { %v1518_v27 = vld [vmem:[%s2130_s5 + $0x64] ss:$8 sps:$4 sm:$0xff]   ;;  %v1516_v28 = vld [vmem:[%s2130_s5 + $0x60] ss:$8 sps:$4 sm:$0xff]   ;;  %v1519_v29 = vld [vmem:[%s2129_s6 + $0x94] ss:$8 sps:$4 sm:$0xff]  }
  0x14   :  { %1340 = vmatmul.mubr.msk.bf16.vlgmr.msra.gmra.mxu1 %vm171_vm1, %v232_v30  ;;  %852 = vmatpush1.bf16.msra.mxu0 %v1482_v45  ;;  %v1521_v30 = vld [vmem:[%s2129_s6 + $0x90] ss:$8 sps:$4 sm:$0xff]   ;;  %v1524_v31 = vld [vmem:[%s2130_s5 + $0x54] ss:$8 sps:$4 sm:$0xff]   ;;  %v1527_v34 = vld [vmem:[%s2129_s6 + $0x80] ss:$8 sps:$4 sm:$0xff]  }
  0x15   :  { %345 = vmatpush1.bf16.msra.mxu1 %v1752_v32  ;;  %364 = vmatprep.mubr.bf16.mxu1 %v1615_v2  ;;  %v1530_v35 = vld [vmem:[%s2130_s5 + $0x44] ss:$8 sps:$4 sm:$0xff]   ;;  %v1528_v36 = vld [vmem:[%s2130_s5 + $0x40] ss:$8 sps:$4 sm:$0xff]   ;;  %v1533_v37 = vld [vmem:[%s2131_s7 + $0x74] ss:$8 sps:$4 sm:$0xff]  }
  0x16   :  { %346 = vmatprep.subr.bf16.mxu1 %v1757_v33  ;;  %853 = vmatprep.subr.bf16.mxu0 %v1483_v47  ;;  %v1536_v38 = vld [vmem:[%s2130_s5 + $0x34] ss:$8 sps:$4 sm:$0xff]   ;;  %v1542_v40 = vld [vmem:[%s2130_s5 + $0x24] ss:$8 sps:$4 sm:$0xff]   ;;  %v1540_v41 = vld [vmem:[%s2130_s5 + $0x20] ss:$8 sps:$4 sm:$0xff]  }
  0x17   :  { %v1548_v42 = vld [vmem:[%s2130_s5 + $0x14] ss:$8 sps:$4 sm:$0xff]   ;;  %v1546_v43 = vld [vmem:[%s2130_s5 + $0x10] ss:$8 sps:$4 sm:$0xff]   ;;  %v1552_v45 = vld [vmem:[%s2130_s5] ss:$8 sps:$4 sm:$0xff]  }
  0x18   :  { %854 = vmatpush1.bf16.msra.mxu0 %v1485_v49  ;;  %v1560_v46 = vld [vmem:[%s2130_s5 + $0xf4] ss:$8 sps:$4 sm:$0xff]   ;;  %v1558_v47 = vld [vmem:[%s2130_s5 + $0xf0] ss:$8 sps:$4 sm:$0xff]   ;;  %v1566_v48 = vld [vmem:[%s2130_s5 + $0xe4] ss:$8 sps:$4 sm:$0xff]  }
  0x19   :  { %347 = vmatpush1.bf16.msra.mxu1 %v1775_v39  ;;  %855 = vmatprep.subr.bf16.mxu0 %v1486_v52  ;;  %v1564_v49 = vld [vmem:[%s2130_s5 + $0xe0] ss:$8 sps:$4 sm:$0xff]   ;;  %v1572_v50 = vld [vmem:[%s2130_s5 + $0xd4] ss:$8 sps:$4 sm:$0xff]   ;;  %v1570_v51 = vld [vmem:[%s2130_s5 + $0xd0] ss:$8 sps:$4 sm:$0xff]  }
  0x1a   :  { %1347 = vmatprep.subr.msk.bf16.mxu1 %vm175_vm0, %v1671_v5  ;;  %v537_v5 = vrot.slane %v535_v62, 7  ;;  %v1578_v52 = vld [vmem:[%s2130_s5 + $0xc4] ss:$8 sps:$4 sm:$0xff]   ;;  %v1576_v53 = vld [vmem:[%s2130_s5 + $0xc0] ss:$8 sps:$4 sm:$0xff]  }
  0x1b   :  { %v1584_v54 = vld [vmem:[%s2130_s5 + $0xb4] ss:$8 sps:$4 sm:$0xff]   ;;  %v1582_v55 = vld [vmem:[%s2130_s5 + $0xb0] ss:$8 sps:$4 sm:$0xff]   ;;  %v1590_v56 = vld [vmem:[%s2130_s5 + $0xa4] ss:$8 sps:$4 sm:$0xff]  }
  0x1c   :  { %1346 = vmatmul.mubr.msk.bf16.vlgmr.msra.gmra.mxu1 %vm171_vm1, %v307_v44  ;;  %856 = vmatpush1.bf16.msra.mxu0 %v1488_v58  ;;  %v538_v9 = vsel %vm510_vm8, %v533_v4, %v537_v5  ;;  %v1596_v58 = vld [vmem:[%s2130_s5 + $0x94] ss:$8 sps:$4 sm:$0xff]   ;;  %v1594_v59 = vld [vmem:[%s2130_s5 + $0x90] ss:$8 sps:$4 sm:$0xff]   ;;  %v1602_v60 = vld [vmem:[%s2130_s5 + $0x84] ss:$8 sps:$4 sm:$0xff]  }
  0x1d   :  { %419 = vmatpush1.bf16.msra.mxu1 %v1686_v11  ;;  %438 = vmatprep.mubr.bf16.mxu1 %v1615_v2  ;;  %v1495_v11 = vld [vmem:[%s2129_s6 + $0xf4] ss:$8 sps:$4 sm:$0xff]   ;;  %v539_v12 = vcombine.low %v524_v8, %v538_v9  ;;  %v1600_v61 = vld [vmem:[%s2130_s5 + $0x80] ss:$8 sps:$4 sm:$0xff]   ;;  %v379_v5 = vsub.s32 0, %v1681_v10  ;;  %v383_v8 = vsub.s32 1, %v1681_v10 }
  0x1e   :  { %420 = vmatprep.subr.bf16.mxu1 %v1676_v7  ;;  %857 = vmatprep.subr.bf16.mxu0 %v1489_v63  ;;  %v1494_v7 = vld [vmem:[%s2129_s6] ss:$8 sps:$4 sm:$0xff]   ;;  %vm659_vm9 = vsmask.f32 256 }
  0x1f   :  { %v546_v16 = vrot.slane %v539_v12, %v1698_v14  ;;  %vm2056_vm10 = vmand %vm175_vm0, %vm659_vm9 }
  0x20   :  { %858 = vmatpush1.bf16.msra.mxu0 %v1491_v0 }
  0x21   :  { %421 = vmatpush1.bf16.msra.mxu1 %v1695_v13  ;;  %859 = vmatprep.subr.bf16.mxu0 %v1492_v6  ;;  %v1497_v13 = vld [vmem:[%s2129_s6 + $0xf0] ss:$8 sps:$4 sm:$0xff]  }
  0x22   :  { %1349 = vmatprep.subr.msk.bf16.mxu1 %vm175_vm0, %v1701_v15  ;;  %v1498_v15 = vld [vmem:[%s2129_s6 + $0xe4] ss:$8 sps:$4 sm:$0xff]  }
  0x24   :  { %1348 = vmatmul.mubr.msk.bf16.vlgmr.msra.gmra.mxu1 %vm171_vm1, %v402_v57  ;;  %860 = vmatpush1.bf16.msra.mxu0 %v1494_v7  ;;  %v1588_v57 = vld [vmem:[%s2130_s5 + $0xa0] ss:$8 sps:$4 sm:$0xff]  }
  0x25   :  { %460 = vmatpush1.bf16.msra.mxu1 %v1714_v20  ;;  %479 = vmatprep.mubr.bf16.mxu1 %v1615_v2  ;;  %v1506_v20 = vld [vmem:[%s2129_s6 + $0xc0] ss:$8 sps:$4 sm:$0xff]  }
  0x26   :  { %461 = vmatprep.subr.bf16.mxu1 %v1719_v21  ;;  %861 = vmatprep.subr.bf16.mxu0 %v1495_v11  ;;  %v1507_v21 = vld [vmem:[%s2129_s6 + $0xb4] ss:$8 sps:$4 sm:$0xff]   ;;  %v375_v7 = vld [vmem:[%s2132_s4] sm:$0x3] }
  0x27   :  { %v380_v12 = vrot.slane %v375_v7, %v379_v5 }
  0x28   :  { %862 = vmatpush2.bf16.msra.mxu0 %v1497_v13 }
  0x29   :  { %462 = vmatpush1.bf16.msra.mxu1 %v1729_v24  ;;  %863 = vmatprep.subr.bf16.mxu0 %v1498_v15  ;;  %v1510_v24 = vld [vmem:[%s2130_s5 + $0x70] ss:$8 sps:$4 sm:$0xff]  }
  0x2a   :  { %1351 = vmatprep.subr.msk.bf16.mxu1 %vm175_vm0, %v1736_v26  ;;  %v1515_v26 = vld [vmem:[%s2129_s6 + $0xa0] ss:$8 sps:$4 sm:$0xff]  }
  0x2c   :  { %1350 = vmatmul.mubr.msk.bf16.vlgmr.msra.gmra.mxu1 %vm171_vm1, %v307_v44  ;;  %864 = vmatpush2.bf16.msra.mxu0 %v1500_v17  ;;  %v1554_v44 = vld [vmem:[%s2130_s5 + $0x4] ss:$8 sps:$4 sm:$0xff]   ;;  %v384_v17 = vrot.slane %v375_v7, %v383_v8 }
  0x2d   :  { %563 = vmatpush1.bf16.msra.mxu1 %v1752_v32  ;;  %582 = vmatprep.mubr.bf16.mxu1 %v1615_v2  ;;  %v1501_v2 = vld [vmem:[%s2129_s6 + $0xd4] ss:$8 sps:$4 sm:$0xff]   ;;  %v1522_v32 = vld [vmem:[%s2130_s5 + $0x50] ss:$8 sps:$4 sm:$0xff]  }
  0x2e   :  { %564 = vmatprep.subr.bf16.mxu1 %v1757_v33  ;;  %865 = vmatprep.subr.bf16.mxu0 %v1501_v2  ;;  %v1525_v33 = vld [vmem:[%s2129_s6 + $0x84] ss:$8 sps:$4 sm:$0xff]  }
  0x30   :  { %866 = vmatpush2.bf16.msra.mxu0 %v1503_v18 }
  0x31   :  { %565 = vmatpush1.bf16.msra.mxu1 %v1775_v39  ;;  %867 = vmatprep.subr.bf16.mxu0 %v1504_v19  ;;  %v1534_v39 = vld [vmem:[%s2130_s5 + $0x30] ss:$8 sps:$4 sm:$0xff]  }
  0x32   :  { %1057 = vmatprep.subr.bf16.mxu1 %v1512_v23 }
  0x34   :  { %1352 = vmatmul.mubr.msk.bf16.vlgmr.msra.gmra.mxu1 %vm171_vm1, %v546_v16  ;;  %868 = vmatpush2.bf16.msra.mxu0 %v1506_v20 }
  0x35   :  { %869 = vmatprep.subr.bf16.mxu0 %v1507_v21  ;;  %1058 = vmatpush1.bf16.msra.mxu1 %v1510_v24 }
  0x36   :  { %1059 = vmatprep.subr.bf16.mxu1 %v1518_v27  ;;  %v1531_v27 = vld [vmem:[%s2131_s7 + $0x70] ss:$8 sps:$4 sm:$0xff]  }
  0x38   :  { %870 = vmatpush2.bf16.msra.mxu0 %v1509_v22 }
  0x39   :  { %871 = vmatprep.subr.bf16.mxu0 %v1513_v25  ;;  %1060 = vmatpush1.bf16.msra.mxu1 %v1516_v28 }
  0x3a   :  { %1061 = vmatprep.subr.bf16.mxu1 %v1524_v31 }
  0x3c   :  { %872 = vmatpush2.bf16.msra.mxu0 %v1515_v26 }
  0x3d   :  { %873 = vmatprep.subr.bf16.mxu0 %v1519_v29  ;;  %1062 = vmatpush1.bf16.msra.mxu1 %v1522_v32  ;;  %v1537_v32 = vld [vmem:[%s2131_s7 + $0x60] ss:$8 sps:$4 sm:$0xff]  }
  0x3e   :  { %1063 = vmatprep.subr.bf16.mxu1 %v1530_v35 }
  0x40   :  { %874 = vmatpush2.bf16.msra.mxu0 %v1521_v30  ;;  %v1539_v30 = vld [vmem:[%s2131_s7 + $0x64] ss:$8 sps:$4 sm:$0xff]  }
  0x41   :  { %875 = vmatprep.subr.bf16.mxu0 %v1525_v33  ;;  %1064 = vmatpush1.bf16.msra.mxu1 %v1528_v36  ;;  %v1543_v36 = vld [vmem:[%s2131_s7 + $0x50] ss:$8 sps:$4 sm:$0xff]  }
  0x42   :  { %1065 = vmatprep.subr.bf16.mxu1 %v1536_v38  ;;  %v1551_v38 = vld [vmem:[%s2131_s7 + $0x44] ss:$8 sps:$4 sm:$0xff]  }
  0x44   :  { %876 = vmatpush2.bf16.msra.mxu0 %v1527_v34  ;;  %v1545_v34 = vld [vmem:[%s2131_s7 + $0x54] ss:$8 sps:$4 sm:$0xff]  }
  0x45   :  { %1258 = vmatprep.subr.bf16.mxu0 %v1533_v37  ;;  %1066 = vmatpush1.bf16.msra.mxu1 %v1534_v39 }
  0x46   :  { %1067 = vmatprep.subr.bf16.mxu1 %v1542_v40  ;;  %v1549_v40 = vld [vmem:[%s2131_s7 + $0x40] ss:$8 sps:$4 sm:$0xff]  }
  0x49   :  { %1068 = vmatpush1.bf16.msra.mxu1 %v1540_v41 }
  0x4a   :  { %1069 = vmatprep.subr.bf16.mxu1 %v1548_v42  ;;  %v1557_v42 = vld [vmem:[%s2131_s7 + $0x34] ss:$8 sps:$4 sm:$0xff]  }
  0x4d   :  { %1070 = vmatpush1.bf16.msra.mxu1 %v1546_v43 }
  0x4e   :  { %1071 = vmatprep.subr.bf16.mxu1 %v1554_v44 }
  0x51   :  { %1072 = vmatpush1.bf16.msra.mxu1 %v1552_v45 }
  0x52   :  { %1073 = vmatprep.subr.bf16.mxu1 %v1560_v46 }
  0x55   :  { %1074 = vmatpush2.bf16.msra.mxu1 %v1558_v47  ;;  %v1555_v47 = vld [vmem:[%s2131_s7 + $0x30] ss:$8 sps:$4 sm:$0xff]  }
  0x56   :  { %1075 = vmatprep.subr.bf16.mxu1 %v1566_v48 }
  0x59   :  { %1076 = vmatpush2.bf16.msra.mxu1 %v1564_v49  ;;  %v1563_v49 = vld [vmem:[%s2131_s7 + $0x24] ss:$8 sps:$4 sm:$0xff]  }
  0x5a   :  { %1077 = vmatprep.subr.bf16.mxu1 %v1572_v50 }
  0x5d   :  { %1078 = vmatpush2.bf16.msra.mxu1 %v1570_v51 }
  0x5e   :  { %1079 = vmatprep.subr.bf16.mxu1 %v1578_v52 }
  0x61   :  { %1080 = vmatpush2.bf16.msra.mxu1 %v1576_v53 }
  0x62   :  { %1081 = vmatprep.subr.bf16.mxu1 %v1584_v54  ;;  %v1561_v54 = vld [vmem:[%s2131_s7 + $0x20] ss:$8 sps:$4 sm:$0xff]  }
  0x65   :  { %1082 = vmatpush2.bf16.msra.mxu1 %v1582_v55  ;;  %v1569_v55 = vld [vmem:[%s2131_s7 + $0x14] ss:$8 sps:$4 sm:$0xff]  }
  0x66   :  { %1083 = vmatprep.subr.bf16.mxu1 %v1590_v56 }
  0x69   :  { %1084 = vmatpush2.bf16.msra.mxu1 %v1588_v57 }
  0x6a   :  { %1085 = vmatprep.subr.bf16.mxu1 %v1596_v58 }
  0x6d   :  { %1086 = vmatpush2.bf16.msra.mxu1 %v1594_v59 }
  0x6e   :  { %1087 = vmatprep.subr.bf16.mxu1 %v1602_v60  ;;  %v1567_v60 = vld [vmem:[%s2131_s7 + $0x10] ss:$8 sps:$4 sm:$0xff]  }
  0x71   :  { %1088 = vmatpush2.bf16.msra.mxu1 %v1600_v61 }
  0xcc   :  { %v216_v62 = vpop.f32.mrf.mxu1 }
  0xce   :  { %v218_v63 = vpop.f32.mrf.mxu1 }
  0xd0   :  { %v220_v0 = vpop.f32.mrf.mxu1 }
  0xd2   :  { %v221_v1 = vpop.f32.mrf.mxu1 }
  0xd4   :  { %v291_v3 = vpop.f32.mrf.mxu1 }
  0xd5   :  { %v292_v11 = vadd.f32 %v291_v3, %v216_v62  ;;  %v1575_v62 = vld [vmem:[%s2131_s7 + $0x4] ss:$8 sps:$4 sm:$0xff]   ;;  %v1573_v3 = vld [vmem:[%s2131_s7] ss:$8 sps:$4 sm:$0xff]  }
  0xd6   :  { %v293_v4 = vpop.f32.mrf.mxu1 }
  0xd7   :  { %v294_v15 = vadd.f32 %v293_v4, %v218_v63  ;;  %v1581_v4 = vld [vmem:[%s2131_s7 + $0xf4] ss:$8 sps:$4 sm:$0xff]  }
  0xd8   :  { %v295_v6 = vpop.f32.mrf.mxu1 }
  0xda   :  { %v296_v9 = vpop.f32.mrf.mxu1 }
  0xdc   :  { %v366_v13 = vpop.f32.mrf.mxu1 }
  0xdd   :  { %v373_v16 = vadd.f32 %v366_v13, %v292_v11 }
  0xde   :  { %v368_v2 = vpop.f32.mrf.mxu1 }
  0xdf   :  { %v387_v18 = vadd.f32 %v380_v12, %v373_v16  ;;  %v374_v19 = vadd.f32 %v368_v2, %v294_v15  ;;  %v1579_v16 = vld [vmem:[%s2131_s7 + $0xf0] ss:$8 sps:$4 sm:$0xff]   ;;  %v1587_v2 = vld [vmem:[%s2131_s7 + $0xe4] ss:$8 sps:$4 sm:$0xff]  }
  0xe0   :  { %v370_v20 = vpop.f32.mrf.mxu1 }
  0xe1   :  { %v388_v21 = vadd.f32 %v384_v17, %v374_v19  ;;  %v389_v22 = vmax.f32 %v387_v18, 0.0 }
  0xe2   :  { %v371_v23 = vpop.f32.mrf.mxu1 }
  0xe3   :  { %v390_v24 = vmax.f32 %v388_v21, 0.0  ;;  %v391_v28 = vpack.c.bf16 %v389_v22, %v389_v22 }
  0xe4   :  { %v440_v25 = vpop.f32.mrf.mxu1 }
  0xe5   :  { %v392_v26 = vpack.c.bf16 %v390_v24, %v390_v24 }
  0xe6   :  { %v442_v29 = vpop.f32.mrf.mxu1 }
  0xe7   :  { %877 = vmatprep.mubr.bf16.mxu0 %v392_v26 }
  0xe8   :  { %v444_v31 = vpop.f32.mrf.mxu1  ;;  %878 = vmatmul.mubr.bf16.vlgmr.msra.gmra.mxu0 %v391_v28 }
  0xe9   :  { %1259 = vmatpush1.bf16.msra.mxu0 %v1531_v27 }
  0xea   :  { %v445_v33 = vpop.f32.mrf.mxu1  ;;  %1260 = vmatprep.subr.bf16.mxu0 %v1539_v30 }
  0xec   :  { %v481_v35 = vpop.f32.mrf.mxu1 }
  0xed   :  { %1261 = vmatpush1.bf16.msra.mxu0 %v1537_v32  ;;  %v482_v43 = vadd.f32 %v481_v35, %v440_v25  ;;  %v1585_v25 = vld [vmem:[%s2131_s7 + $0xe0] ss:$8 sps:$4 sm:$0xff]   ;;  %v1591_v35 = vld [vmem:[%s2131_s7 + $0xd0] ss:$8 sps:$4 sm:$0xff]  }
  0xee   :  { %v483_v37 = vpop.f32.mrf.mxu1  ;;  %1262 = vmatprep.subr.bf16.mxu0 %v1545_v34 }
  0xef   :  { %v484_v45 = vadd.f32 %v483_v37, %v442_v29  ;;  %v1593_v29 = vld [vmem:[%s2131_s7 + $0xd4] ss:$8 sps:$4 sm:$0xff]  }
  0xf0   :  { %v485_v39 = vpop.f32.mrf.mxu1 }
  0xf1   :  { %1263 = vmatpush1.bf16.msra.mxu0 %v1543_v36 }
  0xf2   :  { %v486_v41 = vpop.f32.mrf.mxu1  ;;  %1264 = vmatprep.subr.bf16.mxu0 %v1551_v38  ;;  %v1599_v38 = vld [vmem:[%s2131_s7 + $0xc4] ss:$8 sps:$4 sm:$0xff]  }
  0xf4   :  { %v584_v44 = vpop.f32.mrf.mxu1 }
  0xf5   :  { %v591_v46 = vadd.f32 %v584_v44, %v482_v43  ;;  %1265 = vmatpush1.bf16.msra.mxu0 %v1549_v40  ;;  %v1605_v43 = vld [vmem:[%s2131_s7 + $0xb4] ss:$8 sps:$4 sm:$0xff]  }
  0xf6   :  { %v586_v48 = vpop.f32.mrf.mxu1  ;;  %1266 = vmatprep.subr.bf16.mxu0 %v1557_v42  ;;  %v1597_v42 = vld [vmem:[%s2131_s7 + $0xc0] ss:$8 sps:$4 sm:$0xff]  }
  0xf7   :  { %v593_v50 = vadd.f32 %v591_v46, %v380_v12  ;;  %v592_v51 = vadd.f32 %v586_v48, %v484_v45  ;;  %v1603_v46 = vld [vmem:[%s2131_s7 + $0xb0] ss:$8 sps:$4 sm:$0xff]   ;;  %v1608_v48 = vld [vmem:[%s2131_s7 + $0xa4] ss:$8 sps:$4 sm:$0xff]  }
  0xf8   :  { %v588_v52 = vpop.f32.mrf.mxu1 }
  0xf9   :  { %v594_v53 = vadd.f32 %v592_v51, %v384_v17  ;;  %1267 = vmatpush1.bf16.msra.mxu0 %v1555_v47  ;;  %v2030_v57 = vmax.f32 %v593_v50, 0.0  ;;  %v1609_v50 = vld [vmem:[%s2131_s7 + $0x90] ss:$8 sps:$4 sm:$0xff]   ;;  %v1614_v51 = vld [vmem:[%s2131_s7 + $0x84] ss:$8 sps:$4 sm:$0xff]  }
  0xfa   :  { %1268 = vmatprep.subr.bf16.mxu0 %v1563_v49  ;;  %v589_v56 = vpop.f32.mrf.mxu1  ;;  %v1606_v49 = vld [vmem:[%s2131_s7 + $0xa0] ss:$8 sps:$4 sm:$0xff]  }
  0xfb   :  { %v596_v58 = vmax.f32 %v594_v53, 0.0  ;;  %v1612_v52 = vld [vmem:[%s2131_s7 + $0x80] ss:$8 sps:$4 sm:$0xff]   ;;  %v597_v53 = vpack.c.bf16 %v2030_v57, %v2030_v57 }
  0xfd   :  { %v1353_v59 = vpack.c.bf16 %v596_v58, %v2030_v57  ;;  %1269 = vmatpush1.bf16.msra.mxu0 %v1561_v54  ;;  %v598_v61 = vpack.c.bf16 %v596_v58, %v596_v58 }
  0xfe   :  { %1270 = vmatprep.subr.bf16.mxu0 %v1569_v55 }
  0xff   :  { %v608_v63 = vrot.slane %v1353_v59, %v1698_v14  ;;  %1290 = vmatprep.mubr.bf16.mxu0 %v598_v61 }
 0x101   :  { %v609_v0 = vcombine.high %v608_v63, %v608_v63  ;;  %v616_v1 = vrot.slane %v608_v63, %v1698_v14  ;;  %1271 = vmatpush1.bf16.msra.mxu0 %v1567_v60  ;;  %v1301_v63 = vld [vmem:[%s2133_s8] sm:$0x3] }
 0x102   :  { %1272 = vmatprep.subr.bf16.mxu0 %v1575_v62 }
 0x103   :  { %v617_v6 = vcombine.high %v616_v1, %v616_v1  ;;  %v624_v7 = vrot.slane %v609_v0, %v1698_v14  ;;  %v627_v9 = vshrl.u32 %v616_v1, 16  ;;  %v630_v13 = vshll.u32 %v616_v1, 16 }
 0x104   :  { %v1306_v1 = vrot.slane %v1301_v63, %v379_v5 }
 0x105   :  { %v625_v11 = vcombine.high %v624_v7, %v624_v7  ;;  %v629_v12 = vrot.slane %v627_v9, 7  ;;  %v634_v15 = vshrl.u32 %v617_v6, 16  ;;  %1273 = vmatpush1.bf16.msra.mxu0 %v1573_v3  ;;  %v641_v17 = vshrl.u32 %v624_v7, 16 }
 0x106   :  { %1274 = vmatprep.subr.bf16.mxu0 %v1581_v4  ;;  %v637_v19 = vshll.u32 %v617_v6, 16  ;;  %v644_v23 = vshll.u32 %v624_v7, 16  ;;  %v1310_v6 = vrot.slane %v1301_v63, %v383_v8 }
 0x107   :  { %v636_v18 = vrot.slane %v634_v15, 7  ;;  %v632_v20 = vor.u32 %v630_v13, %v629_v12  ;;  %v648_v21 = vshrl.u32 %v625_v11, 16  ;;  %v643_v22 = vrot.slane %v641_v17, 7 }
 0x108   :  { %v651_v28 = vshll.u32 %v625_v11, 16 }
 0x109   :  { %1275 = vmatpush2.bf16.msra.mxu0 %v1579_v16  ;;  %v639_v26 = vor.u32 %v637_v19, %v636_v18  ;;  %v650_v27 = vrot.slane %v648_v21, 7  ;;  %v646_v30 = vor.u32 %v644_v23, %v643_v22  ;;  %v661_v32 = vsel %vm2056_vm10, 0, %v632_v20 }
 0x10a   :  { %1276 = vmatprep.subr.bf16.mxu0 %v1587_v2 }
 0x10b   :  { %v653_v31 = vor.u32 %v651_v28, %v650_v27  ;;  %v662_v33 = vsel %vm2056_vm10, 0, %v639_v26  ;;  %v663_v36 = vsel %vm2056_vm10, 0, %v646_v30 }
 0x10c   :  { %v669_v34 = vcombine.low %v661_v32, %v662_v33 }
 0x10d   :  { %1277 = vmatpush2.bf16.msra.mxu0 %v1585_v25  ;;  %v664_v37 = vsel %vm2056_vm10, 0, %v653_v31 }
 0x10e   :  { %1278 = vmatprep.subr.bf16.mxu0 %v1593_v29  ;;  %v677_v39 = vcombine.low %v663_v36, %v664_v37  ;;  %v676_v40 = vrot.slane %v669_v34, %v1698_v14 }
 0x110   :  { %v684_v41 = vrot.slane %v677_v39, %v1698_v14 }
 0x111   :  { %1279 = vmatpush2.bf16.msra.mxu0 %v1591_v35 }
 0x112   :  { %1280 = vmatprep.subr.bf16.mxu0 %v1599_v38  ;;  %v886_v44 = vcombine.low %v676_v40, %v684_v41 }
 0x114   :  { %v893_v45 = vrot.slane %v886_v44, %v1698_v14  ;;  %v1611_v14 = vld [vmem:[%s2131_s7 + $0x94] ss:$8 sps:$4 sm:$0xff]  }
 0x115   :  { %1281 = vmatpush2.bf16.msra.mxu0 %v1597_v42 }
 0x116   :  { %1282 = vmatprep.subr.bf16.mxu0 %v1605_v43  ;;  %v894_v47 = vcombine.high %v893_v45, %v893_v45 }
 0x118   :  { %1089 = vmatprep.mubr.bf16.mxu1 %v894_v47 }
 0x119   :  { %1283 = vmatpush2.bf16.msra.mxu0 %v1603_v46  ;;  %1090 = vmatmul.mubr.bf16.vlgmr.msra.gmra.mxu1 %v893_v45 }
 0x11a   :  { %1284 = vmatprep.subr.bf16.mxu0 %v1608_v48 }
 0x11d   :  { %1285 = vmatpush2.bf16.msra.mxu0 %v1606_v49 }
 0x11e   :  { %1286 = vmatprep.subr.bf16.mxu0 %v1611_v14 }
 0x121   :  { %1287 = vmatpush2.bf16.msra.mxu0 %v1609_v50 }
 0x122   :  { %1288 = vmatprep.subr.bf16.mxu0 %v1614_v51 }
 0x125   :  { %1289 = vmatpush2.bf16.msra.mxu0 %v1612_v52 }
 0x128   :  { %1291 = vmatmul.mubr.bf16.vlgmr.msra.gmra.mxu0 %v597_v53 }
 0x1a8   :  { %v879_v54 = vpop.f32.mrf.mxu0 }
 0x1aa   :  { %v881_v55 = vpop.f32.mrf.mxu0 }
 0x1ac   :  { %v883_v56 = vpop.f32.mrf.mxu0 }
 0x1ae   :  { %v884_v58 = vpop.f32.mrf.mxu0 }
 0x1d9   :  { %v1091_v59 = vpop.f32.mrf.mxu1 }
 0x1da   :  { %v1092_v0 = vadd.f32 %v1091_v59, %v879_v54 }
 0x1db   :  { %v1093_v60 = vpop.f32.mrf.mxu1 }
 0x1dc   :  { %v1094_v4 = vadd.f32 %v1093_v60, %v881_v55 }
 0x1dd   :  { %v1095_v61 = vpop.f32.mrf.mxu1 }
 0x1df   :  { %v1096_v62 = vpop.f32.mrf.mxu1 }
 0x1e8   :  { %v1292_v3 = vpop.f32.mrf.mxu0 }
 0x1e9   :  { %v1299_v57 = vadd.f32 %v1292_v3, %v1092_v0 }
 0x1ea   :  { %v1294_v7 = vpop.f32.mrf.mxu0 }
 0x1eb   :  { %v1313_v9 = vadd.f32 %v1306_v1, %v1299_v57  ;;  %v1300_v11 = vadd.f32 %v1294_v7, %v1094_v4 }
 0x1ec   :  { %v1296_v12 = vpop.f32.mrf.mxu0 }
 0x1ed   :  { %v1314_v13 = vadd.f32 %v1310_v6, %v1300_v11  ;;  %v1315_v16 = vmax.f32 %v1313_v9, 0.0 }
 0x1ee   :  { %v1297_v15 = vpop.f32.mrf.mxu0 }
 0x1ef   :  { %v1316_v17 = vmax.f32 %v1314_v13, 0.0 }
 0x1f1   :  { %v1319_v2 = vcombine.low %v1315_v16, %v1316_v17  ;;  %v1320_v18 = vcombine.high %v1315_v16, %v1316_v17 }
 0x1f3   :  { %1323 = vst [vmem:[%s2134_s9] sm:$0xff] %v1319_v2  ;;  %1324 = vst [vmem:[%s2134_s9 + $0x8] sm:$0xff] %v1320_v18 }

</bundles_post_ra>
